<compile_context>
chip_gen: v6e
topology: v6e:2x2x1
jax: 0.10.0
libtpu: 0.0.40
codegen_flags: <defaults>
</compile_context>

<pallas_src>
import functools

import jax
import jax.numpy as jnp
from jax.experimental import pallas as pl
from jax.experimental.pallas import tpu as pltpu

BN_EPS = 1e-5
LANE = 128
_VMEM_LIMIT = 48 * 1024 * 1024  # > 16 MiB v5e scoped default, < 64 MiB v7x physical


def _round_up(x, m):
    return ((x + m - 1) // m) * m


def _auto_tile_h(H, W, cin_p, cout_p, budget_bytes=8 * 1024 * 1024):
    """Row-tile height whose per-step VMEM footprint stays ~<= 8 MiB (v7x-safe)."""
    per_row = W * (3 * cin_p * 2        # bf16 input block (double buffered) + halo build
                   + 9 * cin_p * 2      # bf16 im2col patches
                   + cout_p * 4         # f32 accumulator
                   + 2 * cout_p * 2)    # bf16 output block (double buffered)
    fixed = 2 * 9 * cin_p * cout_p * 2  # resident packed weights
    th = max(1, min(H, (budget_bytes - fixed) // max(per_row, 1)))
    while H % th:                       # largest divisor of H <= th (no partial tiles)
        th -= 1
    return int(th)


# ---------------------------------------------------------------------------
# Pass 1 / pass 2 kernel: [optional BN+ReLU of the input] -> 3x3 "same" conv
# -> pre-BN conv output (bf16) + per-channel (sum, sum of squares) partials.
# ---------------------------------------------------------------------------
def _conv_bn_stats_pass(x, w, scale, shift, *, tile_h, apply_bn_relu):
    N, H, W, Cin = x.shape          # channels already padded to a multiple of 128
    K9, Cout = w.shape              # (9 * Cin, Cout_padded)
    TH = tile_h
    nH = H // TH

    def body(x_any, x_blk, scale_ref, shift_ref, w_ref, mid_ref, stats_ref, halo, sems):
        n = pl.program_id(0)
        i = pl.program_id(1)
        row0 = i * TH
        base = n * H + row0         # row index into the (N*H, W, Cin) HBM view

        # ---- 1-row halos straight from HBM (manual DMA); the TH-row tile body
        # ---- arrives through the auto-pipelined BlockSpec block.
        @pl.when(i > 0)
        def _():
            pltpu.make_async_copy(x_any.at[pl.ds(base - 1, 1)],
                                  halo.at[pl.ds(0, 1)], sems.at[0]).start()

        @pl.when(i < nH - 1)
        def _():
            pltpu.make_async_copy(x_any.at[pl.ds(base + TH, 1)],
                                  halo.at[pl.ds(1, 1)], sems.at[1]).start()

        @pl.when(i > 0)
        def _():
            pltpu.make_async_copy(x_any.at[pl.ds(base - 1, 1)],
                                  halo.at[pl.ds(0, 1)], sems.at[0]).wait()

        @pl.when(i < nH - 1)
        def _():
            pltpu.make_async_copy(x_any.at[pl.ds(base + TH, 1)],
                                  halo.at[pl.ds(1, 1)], sems.at[1]).wait()

        # (TH+2, W, Cin): top halo row, tile body, bottom halo row
        xt = jnp.concatenate([halo[0:1], x_blk[0], halo[1:2]], axis=0)

        if apply_bn_relu:
            s = scale_ref[...].reshape(1, 1, Cin)
            b = shift_ref[...].reshape(1, 1, Cin)
            xt = jnp.maximum(xt.astype(jnp.float32) * s + b, 0.0).astype(jnp.bfloat16)

        # The conv's zero padding lives in the post-BN/ReLU domain: zero halo rows
        # that fall outside the image (this also masks uninitialised halo scratch).
        gr = row0 - 1 + jax.lax.broadcasted_iota(jnp.int32, (TH + 2, 1, 1), 0)
        xt = jnp.where((gr >= 0) & (gr < H), xt, jnp.zeros_like(xt))

        # Zero-pad W, then im2col: ONE bf16 MXU matmul with K = 9*Cin, f32 accum.
        zc = jnp.zeros((TH + 2, 1, Cin), xt.dtype)
        xp = jnp.concatenate([zc, xt, zc], axis=1)                  # (TH+2, W+2, Cin)
        patches = jnp.concatenate(
            [xp[dy:dy + TH, dx:dx + W, :] for dy in range(3) for dx in range(3)],
            axis=-1).reshape(TH * W, 9 * Cin)
        acc = jnp.dot(patches, w_ref[...], preferred_element_type=jnp.float32)

        # Per-channel partial sums for the following BatchNorm, accumulated across
        # the ("arbitrary") row-tile axis in the resident output block.
        ps = jnp.sum(acc, axis=0, keepdims=True)
        psq = jnp.sum(acc * acc, axis=0, keepdims=True)

        @pl.when(i == 0)
        def _():
            stats_ref[...] = jnp.zeros_like(stats_ref)

        stats_ref[...] += jnp.concatenate([ps, psq], axis=0)[None]

        mid_ref[...] = acc.reshape(1, TH, W, Cout).astype(mid_ref.dtype)

    if apply_bn_relu:
        kernel = body
    else:
        def kernel(x_any, x_blk, w_ref, mid_ref, stats_ref, halo, sems):
            body(x_any, x_blk, None, None, w_ref, mid_ref, stats_ref, halo, sems)

    in_specs = [pl.BlockSpec(memory_space=pl.ANY),                          # halo rows (HBM)
                pl.BlockSpec((1, TH, W, Cin), lambda n, i: (n, i, 0, 0))]   # tile body
    args = [x.reshape(N * H, W, Cin), x]
    if apply_bn_relu:
        in_specs += [pl.BlockSpec((1, Cin), lambda n, i: (0, 0)),
                     pl.BlockSpec((1, Cin), lambda n, i: (0, 0))]
        args += [scale, shift]
    in_specs += [pl.BlockSpec((K9, Cout), lambda n, i: (0, 0))]
    args += [w]

    mid, stats = pl.pallas_call(
        kernel,
        grid=(N, nH),
        in_specs=in_specs,
        out_specs=(pl.BlockSpec((1, TH, W, Cout), lambda n, i: (n, i, 0, 0)),
                   pl.BlockSpec((1, 2, Cout), lambda n, i: (n, 0, 0))),
        out_shape=(jax.ShapeDtypeStruct((N, H, W, Cout), jnp.bfloat16),
                   jax.ShapeDtypeStruct((N, 2, Cout), jnp.float32)),
        scratch_shapes=[pltpu.VMEM((2, W, Cin), x.dtype),
                        pltpu.SemaphoreType.DMA((2,))],
        compiler_params=pltpu.CompilerParams(
            dimension_semantics=("parallel", "arbitrary"),
            vmem_limit_bytes=_VMEM_LIMIT),
    )(*args)
    return mid, stats


# ---------------------------------------------------------------------------
# Pass 3 kernel: per-channel affine (folded BN) + ReLU, tiled & pipelined.
# ---------------------------------------------------------------------------
def _bn_relu_apply(mid, scale, shift, *, tile_h, out_dtype=jnp.float32):
    N, H, W, C = mid.shape
    TH = tile_h
    nH = H // TH

    def kernel(m_ref, s_ref, b_ref, o_ref):
        y = (m_ref[...].astype(jnp.float32) * s_ref[...].reshape(1, 1, 1, C)
             + b_ref[...].reshape(1, 1, 1, C))
        o_ref[...] = jnp.maximum(y, 0.0).astype(o_ref.dtype)

    return pl.pallas_call(
        kernel,
        grid=(N, nH),
        in_specs=[pl.BlockSpec((1, TH, W, C), lambda n, i: (n, i, 0, 0)),
                  pl.BlockSpec((1, C), lambda n, i: (0, 0)),
                  pl.BlockSpec((1, C), lambda n, i: (0, 0))],
        out_specs=pl.BlockSpec((1, TH, W, C), lambda n, i: (n, i, 0, 0)),
        out_shape=jax.ShapeDtypeStruct((N, H, W, C), out_dtype),
        compiler_params=pltpu.CompilerParams(
            dimension_semantics=("parallel", "parallel"),
            vmem_limit_bytes=_VMEM_LIMIT),
    )(mid, scale, shift)


# ---------------------------------------------------------------------------
# Wrapper glue: weight packing, stats -> folded affine, layout conversion.
# ---------------------------------------------------------------------------
def _pack_conv_weight(w_pt, cin_p, cout_p):
    """PyTorch (Cout, Cin, 3, 3) -> im2col layout (9*Cin_pad, Cout_pad), bf16."""
    cout, cin = w_pt.shape[:2]
    wt = jnp.transpose(w_pt, (2, 3, 1, 0))                          # (3, 3, Cin, Cout)
    wt = jnp.pad(wt, ((0, 0), (0, 0), (0, cin_p - cin), (0, cout_p - cout)))
    return wt.reshape(9 * cin_p, cout_p).astype(jnp.bfloat16)


def _pad_vec(v, cp):
    return jnp.pad(v.astype(jnp.float32), (0, cp - v.shape[0]))


def _bn_scale_shift(stats, count, gamma_p, beta_p):
    """Fold batch statistics + gamma/beta into a single per-channel affine."""
    total = jnp.sum(stats, axis=0)                                  # (2, Cp)
    mean = total[0] / count
    var = jnp.maximum(total[1] / count - mean * mean, 0.0)          # biased variance
    inv = jax.lax.rsqrt(var + BN_EPS)
    scale = gamma_p * inv
    shift = beta_p - mean * scale
    return scale.reshape(1, -1), shift.reshape(1, -1)


def double_conv(x_nchw, params, *, tile_h=None):
    """DoubleConv forward. NCHW f32 in / NCHW f32 out, BatchNorm in training mode."""
    N, in_ch, H, W = x_nchw.shape
    out_ch = params["g1"].shape[0]
    cin_p = _round_up(in_ch, LANE)
    cout_p = _round_up(out_ch, LANE)

    if tile_h is None:
        tile_h = _auto_tile_h(H, W, max(cin_p, cout_p), cout_p)
    assert H % tile_h == 0, "tile_h must divide H"

    # NCHW -> NHWC, bf16, channels zero-padded to a lane multiple (128).
    x = jnp.transpose(x_nchw, (0, 2, 3, 1)).astype(jnp.bfloat16)
    x = jnp.pad(x, ((0, 0), (0, 0), (0, 0), (0, cin_p - in_ch)))

    w1 = _pack_conv_weight(params["w1"], cin_p, cout_p)
    w2 = _pack_conv_weight(params["w2"], cout_p, cout_p)
    g1, be1 = _pad_vec(params["g1"], cout_p), _pad_vec(params["be1"], cout_p)
    g2, be2 = _pad_vec(params["g2"], cout_p), _pad_vec(params["be2"], cout_p)
    # NOTE: conv biases (params["b1"], params["b2"]) are intentionally not added:
    # the training-mode BN mean subtraction cancels them exactly.

    count = N * H * W

    # pass 1: conv1 -> pre-BN mid1 (bf16) + BN1 partial stats
    mid1, st1 = _conv_bn_stats_pass(x, w1, None, None,
                                    tile_h=tile_h, apply_bn_relu=False)
    sc1, sh1 = _bn_scale_shift(st1, count, g1, be1)
    # pass 2: BN1+ReLU on the fly -> conv2 -> pre-BN mid2 (bf16) + BN2 partial stats
    mid2, st2 = _conv_bn_stats_pass(mid1, w2, sc1, sh1,
                                    tile_h=tile_h, apply_bn_relu=True)
    sc2, sh2 = _bn_scale_shift(st2, count, g2, be2)
    # pass 3: BN2 + ReLU
    y = _bn_relu_apply(mid2, sc2, sh2, tile_h=tile_h)               # (N, H, W, cout_p)

    y = y[..., :out_ch]
    return jnp.transpose(y, (0, 3, 1, 2))                           # back to NCHW


# ---------------------------------------------------------------------------
# Parameters + pure-JAX reference (correctness oracle).
# ---------------------------------------------------------------------------
def init_params(key, in_ch, out_ch):
    """Mirror nn.Conv2d / nn.BatchNorm2d defaults (PyTorch layouts)."""
    k = jax.random.split(key, 4)

    def conv(kw, kb, cin, cout):
        bound = 1.0 / (cin * 9) ** 0.5
        w = jax.random.uniform(kw, (cout, cin, 3, 3), jnp.float32, -bound, bound)
        b = jax.random.uniform(kb, (cout,), jnp.float32, -bound, bound)
        return w, b

    w1, b1 = conv(k[0], k[1], in_ch, out_ch)
    w2, b2 = conv(k[2], k[3], out_ch, out_ch)
    return {"w1": w1, "b1": b1,
            "g1": jnp.ones((out_ch,), jnp.float32),
            "be1": jnp.zeros((out_ch,), jnp.float32),
            "w2": w2, "b2": b2,
            "g2": jnp.ones((out_ch,), jnp.float32),
            "be2": jnp.zeros((out_ch,), jnp.float32)}


def double_conv_reference(x, params):
    """Plain-JAX reference of the PyTorch DoubleConv forward (NCHW)."""
    def block(x, w, g, b):
        y = jax.lax.conv_general_dilated(
            x, w, window_strides=(1, 1), padding=((1, 1), (1, 1)),
            dimension_numbers=("NCHW", "OIHW", "NCHW"))
        mean = jnp.mean(y, axis=(0, 2, 3), keepdims=True)
        var = jnp.mean((y - mean) ** 2, axis=(0, 2, 3), keepdims=True)
        yn = (y - mean) * jax.lax.rsqrt(var + BN_EPS)
        yn = yn * g.reshape(1, -1, 1, 1) + b.reshape(1, -1, 1, 1)
        return jnp.maximum(yn, 0.0)
    # conv bias omitted: exactly cancelled by the batch-mean subtraction
    h = block(x, params["w1"], params["g1"], params["be1"])
    return block(h, params["w2"], params["g2"], params["be2"])


if __name__ == "__main__":
    # UNet stem (layer1 = DoubleConv(1, 64)) at a small spatial size.
    in_ch, out_ch = 1, 64
    N, H, W = 2, 16, 16

    key = jax.random.PRNGKey(0)
    kx, kp = jax.random.split(key)
    x = jax.random.normal(kx, (N, in_ch, H, W), jnp.float32)        # NCHW like PyTorch
    params = init_params(kp, in_ch, out_ch)

    # tile_h=8 -> two row-tiles per image so the halo-DMA path is exercised.
    fwd = jax.jit(functools.partial(double_conv, params=params, tile_h=8))
    out = jax.block_until_ready(fwd(x))
    assert out.shape == (N, out_ch, H, W), out.shape

    ref = double_conv_reference(x, params)
    ok = bool(jnp.all(jnp.abs(out - ref) <= 0.08 + 0.08 * jnp.abs(ref)))
    assert ok, "Pallas DoubleConv does not match the JAX reference"
    print("KERNEL_OK")
</pallas_src>

<mosaic_0001>
module attributes {stable_mosaic.version = 11 : i64} {
  func.func @kernel(%arg0: i32, %arg1: i32, %arg2: memref<32x16x128xbf16, #tpu.memory_space<any>>, %arg3: memref<1x8x16x128xbf16, #tpu.memory_space<vmem>>, %arg4: memref<1152x128xbf16, #tpu.memory_space<vmem>>, %arg5: memref<1x8x16x128xbf16, #tpu.memory_space<vmem>>, %arg6: memref<1x2x128xf32, #tpu.memory_space<vmem>>, %arg7: memref<2x16x128xbf16, #tpu.memory_space<vmem>>, %arg8: memref<2x!tpu.dma_semaphore, #tpu.memory_space<semaphore_mem>>) attributes {dimension_semantics = [#tpu.dimension_semantics<parallel>, #tpu.dimension_semantics<arbitrary>], iteration_bounds = array<i64: 2, 2>, scalar_prefetch = 0 : i64, scratch_operands = 2 : i64, tpu.core_type = #tpu.core_type<tc>, window_params = [{}, {transform_indices = @transform_1, window_bounds = array<i64: 1, 8, 16, 128>}, {pipeline_mode = #tpu.pipeline_mode<synchronous>, transform_indices = @transform_2, window_bounds = array<i64: 1152, 128>}, {transform_indices = @transform_3, window_bounds = array<i64: 1, 8, 16, 128>}, {transform_indices = @transform_4, window_bounds = array<i64: 1, 2, 128>}]} {
    %c8_i32 = arith.constant 8 : i32
    %0 = arith.muli %arg1, %c8_i32 : i32
    %c16_i32 = arith.constant 16 : i32
    %1 = arith.muli %arg0, %c16_i32 : i32
    %2 = arith.addi %1, %0 : i32
    %c0_i32 = arith.constant 0 : i32
    %3 = arith.cmpi sgt, %arg1, %c0_i32 : i32
    %4 = arith.extui %3 : i1 to i32
    %c0_i32_0 = arith.constant 0 : i32
    %5 = arith.cmpi ne, %4, %c0_i32_0 : i32
    scf.if %5 {
      %c1_i32_35 = arith.constant 1 : i32
      %64 = arith.subi %2, %c1_i32_35 : i32
      %c0_i32_36 = arith.constant 0 : i32
      %c0_i32_37 = arith.constant 0 : i32
      %c0_i32_38 = arith.constant 0 : i32
      %65 = tpu.memref_slice %arg2[%64, %c0_i32_37, %c0_i32_38] : memref<32x16x128xbf16, #tpu.memory_space<any>> -> memref<1x16x128xbf16, #tpu.memory_space<any>>
      %c0_i32_39 = arith.constant 0 : i32
      %c0_i32_40 = arith.constant 0 : i32
      %c0_i32_41 = arith.constant 0 : i32
      %66 = tpu.memref_slice %arg7[%c0_i32_39, %c0_i32_40, %c0_i32_41] : memref<2x16x128xbf16, #tpu.memory_space<vmem>> -> memref<1x16x128xbf16, #tpu.memory_space<vmem>>
      %67 = tpu.memref_slice %arg8[%c0_i32_36] : memref<2x!tpu.dma_semaphore, #tpu.memory_space<semaphore_mem>> -> memref<1x!tpu.dma_semaphore, #tpu.memory_space<semaphore_mem>>
      %68 = tpu.memref_squeeze %67 : memref<1x!tpu.dma_semaphore, #tpu.memory_space<semaphore_mem>> -> memref<!tpu.dma_semaphore, #tpu.memory_space<semaphore_mem>>
      tpu.enqueue_dma source(%65 : memref<1x16x128xbf16, #tpu.memory_space<any>>) target(%66 : memref<1x16x128xbf16, #tpu.memory_space<vmem>>) target_semaphore(%68 : memref<!tpu.dma_semaphore, #tpu.memory_space<semaphore_mem>>)
    } else {
    }
    %c1_i32 = arith.constant 1 : i32
    %6 = arith.cmpi slt, %arg1, %c1_i32 : i32
    %7 = arith.extui %6 : i1 to i32
    %c0_i32_1 = arith.constant 0 : i32
    %8 = arith.cmpi ne, %7, %c0_i32_1 : i32
    scf.if %8 {
      %c8_i32_35 = arith.constant 8 : i32
      %64 = arith.addi %2, %c8_i32_35 : i32
      %c1_i32_36 = arith.constant 1 : i32
      %c0_i32_37 = arith.constant 0 : i32
      %c0_i32_38 = arith.constant 0 : i32
      %65 = tpu.memref_slice %arg2[%64, %c0_i32_37, %c0_i32_38] : memref<32x16x128xbf16, #tpu.memory_space<any>> -> memref<1x16x128xbf16, #tpu.memory_space<any>>
      %c1_i32_39 = arith.constant 1 : i32
      %c0_i32_40 = arith.constant 0 : i32
      %c0_i32_41 = arith.constant 0 : i32
      %66 = tpu.memref_slice %arg7[%c1_i32_39, %c0_i32_40, %c0_i32_41] : memref<2x16x128xbf16, #tpu.memory_space<vmem>> -> memref<1x16x128xbf16, #tpu.memory_space<vmem>>
      %67 = tpu.memref_slice %arg8[%c1_i32_36] : memref<2x!tpu.dma_semaphore, #tpu.memory_space<semaphore_mem>> -> memref<1x!tpu.dma_semaphore, #tpu.memory_space<semaphore_mem>>
      %68 = tpu.memref_squeeze %67 : memref<1x!tpu.dma_semaphore, #tpu.memory_space<semaphore_mem>> -> memref<!tpu.dma_semaphore, #tpu.memory_space<semaphore_mem>>
      tpu.enqueue_dma source(%65 : memref<1x16x128xbf16, #tpu.memory_space<any>>) target(%66 : memref<1x16x128xbf16, #tpu.memory_space<vmem>>) target_semaphore(%68 : memref<!tpu.dma_semaphore, #tpu.memory_space<semaphore_mem>>)
    } else {
    }
    %c0_i32_2 = arith.constant 0 : i32
    %9 = arith.cmpi sgt, %arg1, %c0_i32_2 : i32
    %10 = arith.extui %9 : i1 to i32
    %c0_i32_3 = arith.constant 0 : i32
    %11 = arith.cmpi ne, %10, %c0_i32_3 : i32
    scf.if %11 {
      %c1_i32_35 = arith.constant 1 : i32
      %64 = arith.subi %2, %c1_i32_35 : i32
      %c0_i32_36 = arith.constant 0 : i32
      %c0_i32_37 = arith.constant 0 : i32
      %c0_i32_38 = arith.constant 0 : i32
      %65 = tpu.memref_slice %arg2[%64, %c0_i32_37, %c0_i32_38] : memref<32x16x128xbf16, #tpu.memory_space<any>> -> memref<1x16x128xbf16, #tpu.memory_space<any>>
      %c0_i32_39 = arith.constant 0 : i32
      %c0_i32_40 = arith.constant 0 : i32
      %c0_i32_41 = arith.constant 0 : i32
      %66 = tpu.memref_slice %arg7[%c0_i32_39, %c0_i32_40, %c0_i32_41] : memref<2x16x128xbf16, #tpu.memory_space<vmem>> -> memref<1x16x128xbf16, #tpu.memory_space<vmem>>
      %67 = tpu.memref_slice %arg8[%c0_i32_36] : memref<2x!tpu.dma_semaphore, #tpu.memory_space<semaphore_mem>> -> memref<1x!tpu.dma_semaphore, #tpu.memory_space<semaphore_mem>>
      %68 = tpu.memref_squeeze %67 : memref<1x!tpu.dma_semaphore, #tpu.memory_space<semaphore_mem>> -> memref<!tpu.dma_semaphore, #tpu.memory_space<semaphore_mem>>
      tpu.wait_dma2 semaphore(%68 : memref<!tpu.dma_semaphore, #tpu.memory_space<semaphore_mem>>) src(%65 : memref<1x16x128xbf16, #tpu.memory_space<any>>) dst(%66 : memref<1x16x128xbf16, #tpu.memory_space<vmem>>)
    } else {
    }
    %c1_i32_4 = arith.constant 1 : i32
    %12 = arith.cmpi slt, %arg1, %c1_i32_4 : i32
    %13 = arith.extui %12 : i1 to i32
    %c0_i32_5 = arith.constant 0 : i32
    %14 = arith.cmpi ne, %13, %c0_i32_5 : i32
    scf.if %14 {
      %c8_i32_35 = arith.constant 8 : i32
      %64 = arith.addi %2, %c8_i32_35 : i32
      %c1_i32_36 = arith.constant 1 : i32
      %c0_i32_37 = arith.constant 0 : i32
      %c0_i32_38 = arith.constant 0 : i32
      %65 = tpu.memref_slice %arg2[%64, %c0_i32_37, %c0_i32_38] : memref<32x16x128xbf16, #tpu.memory_space<any>> -> memref<1x16x128xbf16, #tpu.memory_space<any>>
      %c1_i32_39 = arith.constant 1 : i32
      %c0_i32_40 = arith.constant 0 : i32
      %c0_i32_41 = arith.constant 0 : i32
      %66 = tpu.memref_slice %arg7[%c1_i32_39, %c0_i32_40, %c0_i32_41] : memref<2x16x128xbf16, #tpu.memory_space<vmem>> -> memref<1x16x128xbf16, #tpu.memory_space<vmem>>
      %67 = tpu.memref_slice %arg8[%c1_i32_36] : memref<2x!tpu.dma_semaphore, #tpu.memory_space<semaphore_mem>> -> memref<1x!tpu.dma_semaphore, #tpu.memory_space<semaphore_mem>>
      %68 = tpu.memref_squeeze %67 : memref<1x!tpu.dma_semaphore, #tpu.memory_space<semaphore_mem>> -> memref<!tpu.dma_semaphore, #tpu.memory_space<semaphore_mem>>
      tpu.wait_dma2 semaphore(%68 : memref<!tpu.dma_semaphore, #tpu.memory_space<semaphore_mem>>) src(%65 : memref<1x16x128xbf16, #tpu.memory_space<any>>) dst(%66 : memref<1x16x128xbf16, #tpu.memory_space<vmem>>)
    } else {
    }
    %c0 = arith.constant 0 : index
    %c0_6 = arith.constant 0 : index
    %c0_7 = arith.constant 0 : index
    %15 = vector.load %arg7[%c0, %c0_6, %c0_7] : memref<2x16x128xbf16, #tpu.memory_space<vmem>>, vector<1x16x128xbf16>
    %c0_8 = arith.constant 0 : index
    %c0_9 = arith.constant 0 : index
    %c0_10 = arith.constant 0 : index
    %c0_11 = arith.constant 0 : index
    %16 = vector.load %arg3[%c0_8, %c0_9, %c0_10, %c0_11] : memref<1x8x16x128xbf16, #tpu.memory_space<vmem>>, vector<1x8x16x128xbf16>
    %17 = vector.shape_cast %16 : vector<1x8x16x128xbf16> to vector<8x16x128xbf16>
    %c1 = arith.constant 1 : index
    %c0_12 = arith.constant 0 : index
    %c0_13 = arith.constant 0 : index
    %18 = vector.load %arg7[%c1, %c0_12, %c0_13] : memref<2x16x128xbf16, #tpu.memory_space<vmem>>, vector<1x16x128xbf16>
    %19 = tpu.concatenate %15, %17, %18 in 0 : vector<1x16x128xbf16>, vector<8x16x128xbf16>, vector<1x16x128xbf16> -> vector<10x16x128xbf16>
    %c1_i32_14 = arith.constant 1 : i32
    %20 = arith.subi %0, %c1_i32_14 : i32
    %21 = tpu.iota {dimensions = array<i32: 0>} : vector<10x1x1xi32>
    %22 = vector.broadcast %20 : i32 to vector<10x1x1xi32>
    %23 = arith.addi %22, %21 : vector<10x1x1xi32>
    %c0_i32_15 = arith.constant 0 : i32
    %24 = vector.broadcast %c0_i32_15 : i32 to vector<10x1x1xi32>
    %25 = arith.cmpi sge, %23, %24 : vector<10x1x1xi32>
    %c16_i32_16 = arith.constant 16 : i32
    %26 = vector.broadcast %c16_i32_16 : i32 to vector<10x1x1xi32>
    %27 = arith.cmpi slt, %23, %26 : vector<10x1x1xi32>
    %28 = arith.andi %25, %27 : vector<10x1x1xi1>
    %cst = arith.constant 0.000000e+00 : bf16
    %29 = vector.broadcast %cst : bf16 to vector<10x16x128xbf16>
    %30 = vector.shape_cast %28 : vector<10x1x1xi1> to vector<10x1x1xi1>
    %31 = vector.broadcast %30 : vector<10x1x1xi1> to vector<10x16x128xi1>
    %32 = arith.select %31, %19, %29 : vector<10x16x128xi1>, vector<10x16x128xbf16>
    %cst_17 = arith.constant 0.000000e+00 : bf16
    %33 = vector.broadcast %cst_17 : bf16 to vector<10x1x128xbf16>
    %34 = tpu.concatenate %33, %32, %33 in 1 : vector<10x1x128xbf16>, vector<10x16x128xbf16>, vector<10x1x128xbf16> -> vector<10x18x128xbf16>
    %35 = vector.extract_strided_slice %34 {offsets = [0, 0, 0], sizes = [8, 16, 128], strides = [1, 1, 1]} : vector<10x18x128xbf16> to vector<8x16x128xbf16>
    %36 = vector.extract_strided_slice %34 {offsets = [0, 1, 0], sizes = [8, 16, 128], strides = [1, 1, 1]} : vector<10x18x128xbf16> to vector<8x16x128xbf16>
    %37 = vector.extract_strided_slice %34 {offsets = [0, 2, 0], sizes = [8, 16, 128], strides = [1, 1, 1]} : vector<10x18x128xbf16> to vector<8x16x128xbf16>
    %38 = vector.extract_strided_slice %34 {offsets = [1, 0, 0], sizes = [8, 16, 128], strides = [1, 1, 1]} : vector<10x18x128xbf16> to vector<8x16x128xbf16>
    %39 = vector.extract_strided_slice %34 {offsets = [1, 1, 0], sizes = [8, 16, 128], strides = [1, 1, 1]} : vector<10x18x128xbf16> to vector<8x16x128xbf16>
    %40 = vector.extract_strided_slice %34 {offsets = [1, 2, 0], sizes = [8, 16, 128], strides = [1, 1, 1]} : vector<10x18x128xbf16> to vector<8x16x128xbf16>
    %41 = vector.extract_strided_slice %34 {offsets = [2, 0, 0], sizes = [8, 16, 128], strides = [1, 1, 1]} : vector<10x18x128xbf16> to vector<8x16x128xbf16>
    %42 = vector.extract_strided_slice %34 {offsets = [2, 1, 0], sizes = [8, 16, 128], strides = [1, 1, 1]} : vector<10x18x128xbf16> to vector<8x16x128xbf16>
    %43 = vector.extract_strided_slice %34 {offsets = [2, 2, 0], sizes = [8, 16, 128], strides = [1, 1, 1]} : vector<10x18x128xbf16> to vector<8x16x128xbf16>
    %44 = tpu.concatenate %35, %36, %37, %38, %39, %40, %41, %42, %43 in 2 : vector<8x16x128xbf16>, vector<8x16x128xbf16>, vector<8x16x128xbf16>, vector<8x16x128xbf16>, vector<8x16x128xbf16>, vector<8x16x128xbf16>, vector<8x16x128xbf16>, vector<8x16x128xbf16>, vector<8x16x128xbf16> -> vector<8x16x1152xbf16>
    %45 = vector.shape_cast %44 : vector<8x16x1152xbf16> to vector<128x1152xbf16>
    %c0_18 = arith.constant 0 : index
    %c0_19 = arith.constant 0 : index
    %46 = vector.load %arg4[%c0_18, %c0_19] : memref<1152x128xbf16, #tpu.memory_space<vmem>>, vector<1152x128xbf16>
    %cst_20 = arith.constant dense<0.000000e+00> : vector<128x128xf32>
    %47 = tpu.matmul %45, %46, %cst_20 {dimension_numbers = #tpu.dot_dimension_numbers<[1], [0], [0], [1], [0, 0, 1, 1], [], []>} : vector<128x1152xbf16>, vector<1152x128xbf16>, vector<128x128xf32> -> vector<128x128xf32>
    %cst_21 = arith.constant dense<0.000000e+00> : vector<128xf32>
    %48 = vector.multi_reduction <add>, %47, %cst_21 [0] : vector<128x128xf32> to vector<128xf32>
    %49 = vector.shape_cast %48 : vector<128xf32> to vector<1x128xf32>
    %50 = arith.mulf %47, %47 : vector<128x128xf32>
    %cst_22 = arith.constant dense<0.000000e+00> : vector<128xf32>
    %51 = vector.multi_reduction <add>, %50, %cst_22 [0] : vector<128x128xf32> to vector<128xf32>
    %52 = vector.shape_cast %51 : vector<128xf32> to vector<1x128xf32>
    %c0_i32_23 = arith.constant 0 : i32
    %53 = arith.cmpi eq, %arg1, %c0_i32_23 : i32
    %54 = arith.extui %53 : i1 to i32
    %c0_i32_24 = arith.constant 0 : i32
    %55 = arith.cmpi ne, %54, %c0_i32_24 : i32
    scf.if %55 {
      %cst_35 = arith.constant 0.000000e+00 : f32
      %64 = vector.broadcast %cst_35 : f32 to vector<1x2x128xf32>
      %c0_36 = arith.constant 0 : index
      %c0_37 = arith.constant 0 : index
      %c0_38 = arith.constant 0 : index
      %65 = vector.load %arg6[%c0_36, %c0_37, %c0_38] : memref<1x2x128xf32, #tpu.memory_space<vmem>>, vector<1x2x128xf32>
      tpu.vector_store %arg6[%c0_36, %c0_37, %c0_38], %64 {strides = array<i32>} : memref<1x2x128xf32, #tpu.memory_space<vmem>>, vector<1x2x128xf32>,
    } else {
    }
    %c0_25 = arith.constant 0 : index
    %c0_26 = arith.constant 0 : index
    %c0_27 = arith.constant 0 : index
    %56 = vector.load %arg6[%c0_25, %c0_26, %c0_27] : memref<1x2x128xf32, #tpu.memory_space<vmem>>, vector<1x2x128xf32>
    %57 = tpu.concatenate %49, %52 in 0 : vector<1x128xf32>, vector<1x128xf32> -> vector<2x128xf32>
    %58 = vector.shape_cast %57 : vector<2x128xf32> to vector<1x2x128xf32>
    %59 = arith.addf %56, %58 : vector<1x2x128xf32>
    %c0_28 = arith.constant 0 : index
    %c0_29 = arith.constant 0 : index
    %c0_30 = arith.constant 0 : index
    %60 = vector.load %arg6[%c0_28, %c0_29, %c0_30] : memref<1x2x128xf32, #tpu.memory_space<vmem>>, vector<1x2x128xf32>
    tpu.vector_store %arg6[%c0_28, %c0_29, %c0_30], %59 {strides = array<i32>} : memref<1x2x128xf32, #tpu.memory_space<vmem>>, vector<1x2x128xf32>,
    %61 = vector.shape_cast %47 : vector<128x128xf32> to vector<1x8x16x128xf32>
    %62 = arith.truncf %61 : vector<1x8x16x128xf32> to vector<1x8x16x128xbf16>
    %c0_31 = arith.constant 0 : index
    %c0_32 = arith.constant 0 : index
    %c0_33 = arith.constant 0 : index
    %c0_34 = arith.constant 0 : index
    %63 = vector.load %arg5[%c0_31, %c0_32, %c0_33, %c0_34] : memref<1x8x16x128xbf16, #tpu.memory_space<vmem>>, vector<1x8x16x128xbf16>
    tpu.vector_store %arg5[%c0_31, %c0_32, %c0_33, %c0_34], %62 {strides = array<i32>} : memref<1x8x16x128xbf16, #tpu.memory_space<vmem>>, vector<1x8x16x128xbf16>,
    return
  }
  func.func @transform_1(%arg0: i32, %arg1: i32) -> (i32, i32, i32, i32) {
    %c0_i32 = arith.constant 0 : i32
    %c0_i32_0 = arith.constant 0 : i32
    %c0_i32_1 = arith.constant 0 : i32
    return %arg0, %arg1, %c0_i32, %c0_i32_0 : i32, i32, i32, i32
  }
  func.func @transform_2(%arg0: i32, %arg1: i32) -> (i32, i32) {
    %c0_i32 = arith.constant 0 : i32
    %c0_i32_0 = arith.constant 0 : i32
    %c0_i32_1 = arith.constant 0 : i32
    return %c0_i32, %c0_i32_0 : i32, i32
  }
  func.func @transform_3(%arg0: i32, %arg1: i32) -> (i32, i32, i32, i32) {
    %c0_i32 = arith.constant 0 : i32
    %c0_i32_0 = arith.constant 0 : i32
    %c0_i32_1 = arith.constant 0 : i32
    return %arg0, %arg1, %c0_i32, %c0_i32_0 : i32, i32, i32, i32
  }
  func.func @transform_4(%arg0: i32, %arg1: i32) -> (i32, i32, i32) {
    %c0_i32 = arith.constant 0 : i32
    %c0_i32_0 = arith.constant 0 : i32
    %c0_i32_1 = arith.constant 0 : i32
    return %arg0, %c0_i32, %c0_i32_0 : i32, i32, i32
  }
}

module attributes {stable_mosaic.version = 11 : i64} {
  func.func @kernel(%arg0: i32, %arg1: i32, %arg2: memref<1x8x16x128xbf16, #tpu.memory_space<vmem>>, %arg3: memref<1x128xf32, #tpu.memory_space<vmem>>, %arg4: memref<1x128xf32, #tpu.memory_space<vmem>>, %arg5: memref<1x8x16x128xf32, #tpu.memory_space<vmem>>) attributes {dimension_semantics = [#tpu.dimension_semantics<parallel>, #tpu.dimension_semantics<parallel>], iteration_bounds = array<i64: 2, 2>, scalar_prefetch = 0 : i64, scratch_operands = 0 : i64, tpu.core_type = #tpu.core_type<tc>, window_params = [{transform_indices = @transform_0, window_bounds = array<i64: 1, 8, 16, 128>}, {pipeline_mode = #tpu.pipeline_mode<synchronous>, transform_indices = @transform_1, window_bounds = array<i64: 1, 128>}, {pipeline_mode = #tpu.pipeline_mode<synchronous>, transform_indices = @transform_2, window_bounds = array<i64: 1, 128>}, {transform_indices = @transform_3, window_bounds = array<i64: 1, 8, 16, 128>}]} {
    %c0 = arith.constant 0 : index
    %c0_0 = arith.constant 0 : index
    %c0_1 = arith.constant 0 : index
    %c0_2 = arith.constant 0 : index
    %0 = vector.load %arg2[%c0, %c0_0, %c0_1, %c0_2] : memref<1x8x16x128xbf16, #tpu.memory_space<vmem>>, vector<1x8x16x128xbf16>
    %1 = arith.extf %0 : vector<1x8x16x128xbf16> to vector<1x8x16x128xf32>
    %c0_3 = arith.constant 0 : index
    %c0_4 = arith.constant 0 : index
    %2 = vector.load %arg3[%c0_3, %c0_4] : memref<1x128xf32, #tpu.memory_space<vmem>>, vector<1x128xf32>
    %3 = vector.shape_cast %2 : vector<1x128xf32> to vector<1x1x1x128xf32>
    %4 = vector.broadcast %3 : vector<1x1x1x128xf32> to vector<1x8x16x128xf32>
    %5 = arith.mulf %1, %4 : vector<1x8x16x128xf32>
    %c0_5 = arith.constant 0 : index
    %c0_6 = arith.constant 0 : index
    %6 = vector.load %arg4[%c0_5, %c0_6] : memref<1x128xf32, #tpu.memory_space<vmem>>, vector<1x128xf32>
    %7 = vector.shape_cast %6 : vector<1x128xf32> to vector<1x1x1x128xf32>
    %8 = vector.broadcast %7 : vector<1x1x1x128xf32> to vector<1x8x16x128xf32>
    %9 = arith.addf %5, %8 : vector<1x8x16x128xf32>
    %cst = arith.constant 0.000000e+00 : f32
    %10 = vector.broadcast %cst : f32 to vector<1x8x16x128xf32>
    %11 = arith.maximumf %9, %10 : vector<1x8x16x128xf32>
    %c0_7 = arith.constant 0 : index
    %c0_8 = arith.constant 0 : index
    %c0_9 = arith.constant 0 : index
    %c0_10 = arith.constant 0 : index
    %12 = vector.load %arg5[%c0_7, %c0_8, %c0_9, %c0_10] : memref<1x8x16x128xf32, #tpu.memory_space<vmem>>, vector<1x8x16x128xf32>
    tpu.vector_store %arg5[%c0_7, %c0_8, %c0_9, %c0_10], %11 {strides = array<i32>} : memref<1x8x16x128xf32, #tpu.memory_space<vmem>>, vector<1x8x16x128xf32>,
    return
  }
  func.func @transform_0(%arg0: i32, %arg1: i32) -> (i32, i32, i32, i32) {
    %c0_i32 = arith.constant 0 : i32
    %c0_i32_0 = arith.constant 0 : i32
    %c0_i32_1 = arith.constant 0 : i32
    return %arg0, %arg1, %c0_i32, %c0_i32_0 : i32, i32, i32, i32
  }
  func.func @transform_1(%arg0: i32, %arg1: i32) -> (i32, i32) {
    %c0_i32 = arith.constant 0 : i32
    %c0_i32_0 = arith.constant 0 : i32
    %c0_i32_1 = arith.constant 0 : i32
    return %c0_i32, %c0_i32_0 : i32, i32
  }
  func.func @transform_2(%arg0: i32, %arg1: i32) -> (i32, i32) {
    %c0_i32 = arith.constant 0 : i32
    %c0_i32_0 = arith.constant 0 : i32
    %c0_i32_1 = arith.constant 0 : i32
    return %c0_i32, %c0_i32_0 : i32, i32
  }
  func.func @transform_3(%arg0: i32, %arg1: i32) -> (i32, i32, i32, i32) {
    %c0_i32 = arith.constant 0 : i32
    %c0_i32_0 = arith.constant 0 : i32
    %c0_i32_1 = arith.constant 0 : i32
    return %arg0, %arg1, %c0_i32, %c0_i32_0 : i32, i32, i32, i32
  }
}

module attributes {stable_mosaic.version = 11 : i64} {
  func.func @body(%arg0: i32, %arg1: i32, %arg2: memref<32x16x128xbf16, #tpu.memory_space<any>>, %arg3: memref<1x8x16x128xbf16, #tpu.memory_space<vmem>>, %arg4: memref<1x128xf32, #tpu.memory_space<vmem>>, %arg5: memref<1x128xf32, #tpu.memory_space<vmem>>, %arg6: memref<1152x128xbf16, #tpu.memory_space<vmem>>, %arg7: memref<1x8x16x128xbf16, #tpu.memory_space<vmem>>, %arg8: memref<1x2x128xf32, #tpu.memory_space<vmem>>, %arg9: memref<2x16x128xbf16, #tpu.memory_space<vmem>>, %arg10: memref<2x!tpu.dma_semaphore, #tpu.memory_space<semaphore_mem>>) attributes {dimension_semantics = [#tpu.dimension_semantics<parallel>, #tpu.dimension_semantics<arbitrary>], iteration_bounds = array<i64: 2, 2>, scalar_prefetch = 0 : i64, scratch_operands = 2 : i64, tpu.core_type = #tpu.core_type<tc>, window_params = [{}, {transform_indices = @transform_1, window_bounds = array<i64: 1, 8, 16, 128>}, {pipeline_mode = #tpu.pipeline_mode<synchronous>, transform_indices = @transform_2, window_bounds = array<i64: 1, 128>}, {pipeline_mode = #tpu.pipeline_mode<synchronous>, transform_indices = @transform_3, window_bounds = array<i64: 1, 128>}, {pipeline_mode = #tpu.pipeline_mode<synchronous>, transform_indices = @transform_4, window_bounds = array<i64: 1152, 128>}, {transform_indices = @transform_5, window_bounds = array<i64: 1, 8, 16, 128>}, {transform_indices = @transform_6, window_bounds = array<i64: 1, 2, 128>}]} {
    %c8_i32 = arith.constant 8 : i32
    %0 = arith.muli %arg1, %c8_i32 : i32
    %c16_i32 = arith.constant 16 : i32
    %1 = arith.muli %arg0, %c16_i32 : i32
    %2 = arith.addi %1, %0 : i32
    %c0_i32 = arith.constant 0 : i32
    %3 = arith.cmpi sgt, %arg1, %c0_i32 : i32
    %4 = arith.extui %3 : i1 to i32
    %c0_i32_0 = arith.constant 0 : i32
    %5 = arith.cmpi ne, %4, %c0_i32_0 : i32
    scf.if %5 {
      %c1_i32_40 = arith.constant 1 : i32
      %76 = arith.subi %2, %c1_i32_40 : i32
      %c0_i32_41 = arith.constant 0 : i32
      %c0_i32_42 = arith.constant 0 : i32
      %c0_i32_43 = arith.constant 0 : i32
      %77 = tpu.memref_slice %arg2[%76, %c0_i32_42, %c0_i32_43] : memref<32x16x128xbf16, #tpu.memory_space<any>> -> memref<1x16x128xbf16, #tpu.memory_space<any>>
      %c0_i32_44 = arith.constant 0 : i32
      %c0_i32_45 = arith.constant 0 : i32
      %c0_i32_46 = arith.constant 0 : i32
      %78 = tpu.memref_slice %arg9[%c0_i32_44, %c0_i32_45, %c0_i32_46] : memref<2x16x128xbf16, #tpu.memory_space<vmem>> -> memref<1x16x128xbf16, #tpu.memory_space<vmem>>
      %79 = tpu.memref_slice %arg10[%c0_i32_41] : memref<2x!tpu.dma_semaphore, #tpu.memory_space<semaphore_mem>> -> memref<1x!tpu.dma_semaphore, #tpu.memory_space<semaphore_mem>>
      %80 = tpu.memref_squeeze %79 : memref<1x!tpu.dma_semaphore, #tpu.memory_space<semaphore_mem>> -> memref<!tpu.dma_semaphore, #tpu.memory_space<semaphore_mem>>
      tpu.enqueue_dma source(%77 : memref<1x16x128xbf16, #tpu.memory_space<any>>) target(%78 : memref<1x16x128xbf16, #tpu.memory_space<vmem>>) target_semaphore(%80 : memref<!tpu.dma_semaphore, #tpu.memory_space<semaphore_mem>>)
    } else {
    }
    %c1_i32 = arith.constant 1 : i32
    %6 = arith.cmpi slt, %arg1, %c1_i32 : i32
    %7 = arith.extui %6 : i1 to i32
    %c0_i32_1 = arith.constant 0 : i32
    %8 = arith.cmpi ne, %7, %c0_i32_1 : i32
    scf.if %8 {
      %c8_i32_40 = arith.constant 8 : i32
      %76 = arith.addi %2, %c8_i32_40 : i32
      %c1_i32_41 = arith.constant 1 : i32
      %c0_i32_42 = arith.constant 0 : i32
      %c0_i32_43 = arith.constant 0 : i32
      %77 = tpu.memref_slice %arg2[%76, %c0_i32_42, %c0_i32_43] : memref<32x16x128xbf16, #tpu.memory_space<any>> -> memref<1x16x128xbf16, #tpu.memory_space<any>>
      %c1_i32_44 = arith.constant 1 : i32
      %c0_i32_45 = arith.constant 0 : i32
      %c0_i32_46 = arith.constant 0 : i32
      %78 = tpu.memref_slice %arg9[%c1_i32_44, %c0_i32_45, %c0_i32_46] : memref<2x16x128xbf16, #tpu.memory_space<vmem>> -> memref<1x16x128xbf16, #tpu.memory_space<vmem>>
      %79 = tpu.memref_slice %arg10[%c1_i32_41] : memref<2x!tpu.dma_semaphore, #tpu.memory_space<semaphore_mem>> -> memref<1x!tpu.dma_semaphore, #tpu.memory_space<semaphore_mem>>
      %80 = tpu.memref_squeeze %79 : memref<1x!tpu.dma_semaphore, #tpu.memory_space<semaphore_mem>> -> memref<!tpu.dma_semaphore, #tpu.memory_space<semaphore_mem>>
      tpu.enqueue_dma source(%77 : memref<1x16x128xbf16, #tpu.memory_space<any>>) target(%78 : memref<1x16x128xbf16, #tpu.memory_space<vmem>>) target_semaphore(%80 : memref<!tpu.dma_semaphore, #tpu.memory_space<semaphore_mem>>)
    } else {
    }
    %c0_i32_2 = arith.constant 0 : i32
    %9 = arith.cmpi sgt, %arg1, %c0_i32_2 : i32
    %10 = arith.extui %9 : i1 to i32
    %c0_i32_3 = arith.constant 0 : i32
    %11 = arith.cmpi ne, %10, %c0_i32_3 : i32
    scf.if %11 {
      %c1_i32_40 = arith.constant 1 : i32
      %76 = arith.subi %2, %c1_i32_40 : i32
      %c0_i32_41 = arith.constant 0 : i32
      %c0_i32_42 = arith.constant 0 : i32
      %c0_i32_43 = arith.constant 0 : i32
      %77 = tpu.memref_slice %arg2[%76, %c0_i32_42, %c0_i32_43] : memref<32x16x128xbf16, #tpu.memory_space<any>> -> memref<1x16x128xbf16, #tpu.memory_space<any>>
      %c0_i32_44 = arith.constant 0 : i32
      %c0_i32_45 = arith.constant 0 : i32
      %c0_i32_46 = arith.constant 0 : i32
      %78 = tpu.memref_slice %arg9[%c0_i32_44, %c0_i32_45, %c0_i32_46] : memref<2x16x128xbf16, #tpu.memory_space<vmem>> -> memref<1x16x128xbf16, #tpu.memory_space<vmem>>
      %79 = tpu.memref_slice %arg10[%c0_i32_41] : memref<2x!tpu.dma_semaphore, #tpu.memory_space<semaphore_mem>> -> memref<1x!tpu.dma_semaphore, #tpu.memory_space<semaphore_mem>>
      %80 = tpu.memref_squeeze %79 : memref<1x!tpu.dma_semaphore, #tpu.memory_space<semaphore_mem>> -> memref<!tpu.dma_semaphore, #tpu.memory_space<semaphore_mem>>
      tpu.wait_dma2 semaphore(%80 : memref<!tpu.dma_semaphore, #tpu.memory_space<semaphore_mem>>) src(%77 : memref<1x16x128xbf16, #tpu.memory_space<any>>) dst(%78 : memref<1x16x128xbf16, #tpu.memory_space<vmem>>)
    } else {
    }
    %c1_i32_4 = arith.constant 1 : i32
    %12 = arith.cmpi slt, %arg1, %c1_i32_4 : i32
    %13 = arith.extui %12 : i1 to i32
    %c0_i32_5 = arith.constant 0 : i32
    %14 = arith.cmpi ne, %13, %c0_i32_5 : i32
    scf.if %14 {
      %c8_i32_40 = arith.constant 8 : i32
      %76 = arith.addi %2, %c8_i32_40 : i32
      %c1_i32_41 = arith.constant 1 : i32
      %c0_i32_42 = arith.constant 0 : i32
      %c0_i32_43 = arith.constant 0 : i32
      %77 = tpu.memref_slice %arg2[%76, %c0_i32_42, %c0_i32_43] : memref<32x16x128xbf16, #tpu.memory_space<any>> -> memref<1x16x128xbf16, #tpu.memory_space<any>>
      %c1_i32_44 = arith.constant 1 : i32
      %c0_i32_45 = arith.constant 0 : i32
      %c0_i32_46 = arith.constant 0 : i32
      %78 = tpu.memref_slice %arg9[%c1_i32_44, %c0_i32_45, %c0_i32_46] : memref<2x16x128xbf16, #tpu.memory_space<vmem>> -> memref<1x16x128xbf16, #tpu.memory_space<vmem>>
      %79 = tpu.memref_slice %arg10[%c1_i32_41] : memref<2x!tpu.dma_semaphore, #tpu.memory_space<semaphore_mem>> -> memref<1x!tpu.dma_semaphore, #tpu.memory_space<semaphore_mem>>
      %80 = tpu.memref_squeeze %79 : memref<1x!tpu.dma_semaphore, #tpu.memory_space<semaphore_mem>> -> memref<!tpu.dma_semaphore, #tpu.memory_space<semaphore_mem>>
      tpu.wait_dma2 semaphore(%80 : memref<!tpu.dma_semaphore, #tpu.memory_space<semaphore_mem>>) src(%77 : memref<1x16x128xbf16, #tpu.memory_space<any>>) dst(%78 : memref<1x16x128xbf16, #tpu.memory_space<vmem>>)
    } else {
    }
    %c0 = arith.constant 0 : index
    %c0_6 = arith.constant 0 : index
    %c0_7 = arith.constant 0 : index
    %15 = vector.load %arg9[%c0, %c0_6, %c0_7] : memref<2x16x128xbf16, #tpu.memory_space<vmem>>, vector<1x16x128xbf16>
    %c0_8 = arith.constant 0 : index
    %c0_9 = arith.constant 0 : index
    %c0_10 = arith.constant 0 : index
    %c0_11 = arith.constant 0 : index
    %16 = vector.load %arg3[%c0_8, %c0_9, %c0_10, %c0_11] : memref<1x8x16x128xbf16, #tpu.memory_space<vmem>>, vector<1x8x16x128xbf16>
    %17 = vector.shape_cast %16 : vector<1x8x16x128xbf16> to vector<8x16x128xbf16>
    %c1 = arith.constant 1 : index
    %c0_12 = arith.constant 0 : index
    %c0_13 = arith.constant 0 : index
    %18 = vector.load %arg9[%c1, %c0_12, %c0_13] : memref<2x16x128xbf16, #tpu.memory_space<vmem>>, vector<1x16x128xbf16>
    %19 = tpu.concatenate %15, %17, %18 in 0 : vector<1x16x128xbf16>, vector<8x16x128xbf16>, vector<1x16x128xbf16> -> vector<10x16x128xbf16>
    %c0_14 = arith.constant 0 : index
    %c0_15 = arith.constant 0 : index
    %20 = vector.load %arg4[%c0_14, %c0_15] : memref<1x128xf32, #tpu.memory_space<vmem>>, vector<1x128xf32>
    %21 = vector.shape_cast %20 : vector<1x128xf32> to vector<1x1x128xf32>
    %c0_16 = arith.constant 0 : index
    %c0_17 = arith.constant 0 : index
    %22 = vector.load %arg5[%c0_16, %c0_17] : memref<1x128xf32, #tpu.memory_space<vmem>>, vector<1x128xf32>
    %23 = vector.shape_cast %22 : vector<1x128xf32> to vector<1x1x128xf32>
    %24 = arith.extf %19 : vector<10x16x128xbf16> to vector<10x16x128xf32>
    %25 = vector.broadcast %21 : vector<1x1x128xf32> to vector<10x16x128xf32>
    %26 = arith.mulf %24, %25 : vector<10x16x128xf32>
    %27 = vector.broadcast %23 : vector<1x1x128xf32> to vector<10x16x128xf32>
    %28 = arith.addf %26, %27 : vector<10x16x128xf32>
    %cst = arith.constant 0.000000e+00 : f32
    %29 = vector.broadcast %cst : f32 to vector<10x16x128xf32>
    %30 = arith.maximumf %28, %29 : vector<10x16x128xf32>
    %31 = arith.truncf %30 : vector<10x16x128xf32> to vector<10x16x128xbf16>
    %c1_i32_18 = arith.constant 1 : i32
    %32 = arith.subi %0, %c1_i32_18 : i32
    %33 = tpu.iota {dimensions = array<i32: 0>} : vector<10x1x1xi32>
    %34 = vector.broadcast %32 : i32 to vector<10x1x1xi32>
    %35 = arith.addi %34, %33 : vector<10x1x1xi32>
    %c0_i32_19 = arith.constant 0 : i32
    %36 = vector.broadcast %c0_i32_19 : i32 to vector<10x1x1xi32>
    %37 = arith.cmpi sge, %35, %36 : vector<10x1x1xi32>
    %c16_i32_20 = arith.constant 16 : i32
    %38 = vector.broadcast %c16_i32_20 : i32 to vector<10x1x1xi32>
    %39 = arith.cmpi slt, %35, %38 : vector<10x1x1xi32>
    %40 = arith.andi %37, %39 : vector<10x1x1xi1>
    %cst_21 = arith.constant 0.000000e+00 : bf16
    %41 = vector.broadcast %cst_21 : bf16 to vector<10x16x128xbf16>
    %42 = vector.shape_cast %40 : vector<10x1x1xi1> to vector<10x1x1xi1>
    %43 = vector.broadcast %42 : vector<10x1x1xi1> to vector<10x16x128xi1>
    %44 = arith.select %43, %31, %41 : vector<10x16x128xi1>, vector<10x16x128xbf16>
    %cst_22 = arith.constant 0.000000e+00 : bf16
    %45 = vector.broadcast %cst_22 : bf16 to vector<10x1x128xbf16>
    %46 = tpu.concatenate %45, %44, %45 in 1 : vector<10x1x128xbf16>, vector<10x16x128xbf16>, vector<10x1x128xbf16> -> vector<10x18x128xbf16>
    %47 = vector.extract_strided_slice %46 {offsets = [0, 0, 0], sizes = [8, 16, 128], strides = [1, 1, 1]} : vector<10x18x128xbf16> to vector<8x16x128xbf16>
    %48 = vector.extract_strided_slice %46 {offsets = [0, 1, 0], sizes = [8, 16, 128], strides = [1, 1, 1]} : vector<10x18x128xbf16> to vector<8x16x128xbf16>
    %49 = vector.extract_strided_slice %46 {offsets = [0, 2, 0], sizes = [8, 16, 128], strides = [1, 1, 1]} : vector<10x18x128xbf16> to vector<8x16x128xbf16>
    %50 = vector.extract_strided_slice %46 {offsets = [1, 0, 0], sizes = [8, 16, 128], strides = [1, 1, 1]} : vector<10x18x128xbf16> to vector<8x16x128xbf16>
    %51 = vector.extract_strided_slice %46 {offsets = [1, 1, 0], sizes = [8, 16, 128], strides = [1, 1, 1]} : vector<10x18x128xbf16> to vector<8x16x128xbf16>
    %52 = vector.extract_strided_slice %46 {offsets = [1, 2, 0], sizes = [8, 16, 128], strides = [1, 1, 1]} : vector<10x18x128xbf16> to vector<8x16x128xbf16>
    %53 = vector.extract_strided_slice %46 {offsets = [2, 0, 0], sizes = [8, 16, 128], strides = [1, 1, 1]} : vector<10x18x128xbf16> to vector<8x16x128xbf16>
    %54 = vector.extract_strided_slice %46 {offsets = [2, 1, 0], sizes = [8, 16, 128], strides = [1, 1, 1]} : vector<10x18x128xbf16> to vector<8x16x128xbf16>
    %55 = vector.extract_strided_slice %46 {offsets = [2, 2, 0], sizes = [8, 16, 128], strides = [1, 1, 1]} : vector<10x18x128xbf16> to vector<8x16x128xbf16>
    %56 = tpu.concatenate %47, %48, %49, %50, %51, %52, %53, %54, %55 in 2 : vector<8x16x128xbf16>, vector<8x16x128xbf16>, vector<8x16x128xbf16>, vector<8x16x128xbf16>, vector<8x16x128xbf16>, vector<8x16x128xbf16>, vector<8x16x128xbf16>, vector<8x16x128xbf16>, vector<8x16x128xbf16> -> vector<8x16x1152xbf16>
    %57 = vector.shape_cast %56 : vector<8x16x1152xbf16> to vector<128x1152xbf16>
    %c0_23 = arith.constant 0 : index
    %c0_24 = arith.constant 0 : index
    %58 = vector.load %arg6[%c0_23, %c0_24] : memref<1152x128xbf16, #tpu.memory_space<vmem>>, vector<1152x128xbf16>
    %cst_25 = arith.constant dense<0.000000e+00> : vector<128x128xf32>
    %59 = tpu.matmul %57, %58, %cst_25 {dimension_numbers = #tpu.dot_dimension_numbers<[1], [0], [0], [1], [0, 0, 1, 1], [], []>} : vector<128x1152xbf16>, vector<1152x128xbf16>, vector<128x128xf32> -> vector<128x128xf32>
    %cst_26 = arith.constant dense<0.000000e+00> : vector<128xf32>
    %60 = vector.multi_reduction <add>, %59, %cst_26 [0] : vector<128x128xf32> to vector<128xf32>
    %61 = vector.shape_cast %60 : vector<128xf32> to vector<1x128xf32>
    %62 = arith.mulf %59, %59 : vector<128x128xf32>
    %cst_27 = arith.constant dense<0.000000e+00> : vector<128xf32>
    %63 = vector.multi_reduction <add>, %62, %cst_27 [0] : vector<128x128xf32> to vector<128xf32>
    %64 = vector.shape_cast %63 : vector<128xf32> to vector<1x128xf32>
    %c0_i32_28 = arith.constant 0 : i32
    %65 = arith.cmpi eq, %arg1, %c0_i32_28 : i32
    %66 = arith.extui %65 : i1 to i32
    %c0_i32_29 = arith.constant 0 : i32
    %67 = arith.cmpi ne, %66, %c0_i32_29 : i32
    scf.if %67 {
      %cst_40 = arith.constant 0.000000e+00 : f32
      %76 = vector.broadcast %cst_40 : f32 to vector<1x2x128xf32>
      %c0_41 = arith.constant 0 : index
      %c0_42 = arith.constant 0 : index
      %c0_43 = arith.constant 0 : index
      %77 = vector.load %arg8[%c0_41, %c0_42, %c0_43] : memref<1x2x128xf32, #tpu.memory_space<vmem>>, vector<1x2x128xf32>
      tpu.vector_store %arg8[%c0_41, %c0_42, %c0_43], %76 {strides = array<i32>} : memref<1x2x128xf32, #tpu.memory_space<vmem>>, vector<1x2x128xf32>,
    } else {
    }
    %c0_30 = arith.constant 0 : index
    %c0_31 = arith.constant 0 : index
    %c0_32 = arith.constant 0 : index
    %68 = vector.load %arg8[%c0_30, %c0_31, %c0_32] : memref<1x2x128xf32, #tpu.memory_space<vmem>>, vector<1x2x128xf32>
    %69 = tpu.concatenate %61, %64 in 0 : vector<1x128xf32>, vector<1x128xf32> -> vector<2x128xf32>
    %70 = vector.shape_cast %69 : vector<2x128xf32> to vector<1x2x128xf32>
    %71 = arith.addf %68, %70 : vector<1x2x128xf32>
    %c0_33 = arith.constant 0 : index
    %c0_34 = arith.constant 0 : index
    %c0_35 = arith.constant 0 : index
    %72 = vector.load %arg8[%c0_33, %c0_34, %c0_35] : memref<1x2x128xf32, #tpu.memory_space<vmem>>, vector<1x2x128xf32>
    tpu.vector_store %arg8[%c0_33, %c0_34, %c0_35], %71 {strides = array<i32>} : memref<1x2x128xf32, #tpu.memory_space<vmem>>, vector<1x2x128xf32>,
    %73 = vector.shape_cast %59 : vector<128x128xf32> to vector<1x8x16x128xf32>
    %74 = arith.truncf %73 : vector<1x8x16x128xf32> to vector<1x8x16x128xbf16>
    %c0_36 = arith.constant 0 : index
    %c0_37 = arith.constant 0 : index
    %c0_38 = arith.constant 0 : index
    %c0_39 = arith.constant 0 : index
    %75 = vector.load %arg7[%c0_36, %c0_37, %c0_38, %c0_39] : memref<1x8x16x128xbf16, #tpu.memory_space<vmem>>, vector<1x8x16x128xbf16>
    tpu.vector_store %arg7[%c0_36, %c0_37, %c0_38, %c0_39], %74 {strides = array<i32>} : memref<1x8x16x128xbf16, #tpu.memory_space<vmem>>, vector<1x8x16x128xbf16>,
    return
  }
  func.func @transform_1(%arg0: i32, %arg1: i32) -> (i32, i32, i32, i32) {
    %c0_i32 = arith.constant 0 : i32
    %c0_i32_0 = arith.constant 0 : i32
    %c0_i32_1 = arith.constant 0 : i32
    return %arg0, %arg1, %c0_i32, %c0_i32_0 : i32, i32, i32, i32
  }
  func.func @transform_2(%arg0: i32, %arg1: i32) -> (i32, i32) {
    %c0_i32 = arith.constant 0 : i32
    %c0_i32_0 = arith.constant 0 : i32
    %c0_i32_1 = arith.constant 0 : i32
    return %c0_i32, %c0_i32_0 : i32, i32
  }
  func.func @transform_3(%arg0: i32, %arg1: i32) -> (i32, i32) {
    %c0_i32 = arith.constant 0 : i32
    %c0_i32_0 = arith.constant 0 : i32
    %c0_i32_1 = arith.constant 0 : i32
    return %c0_i32, %c0_i32_0 : i32, i32
  }
  func.func @transform_4(%arg0: i32, %arg1: i32) -> (i32, i32) {
    %c0_i32 = arith.constant 0 : i32
    %c0_i32_0 = arith.constant 0 : i32
    %c0_i32_1 = arith.constant 0 : i32
    return %c0_i32, %c0_i32_0 : i32, i32
  }
  func.func @transform_5(%arg0: i32, %arg1: i32) -> (i32, i32, i32, i32) {
    %c0_i32 = arith.constant 0 : i32
    %c0_i32_0 = arith.constant 0 : i32
    %c0_i32_1 = arith.constant 0 : i32
    return %arg0, %arg1, %c0_i32, %c0_i32_0 : i32, i32, i32, i32
  }
  func.func @transform_6(%arg0: i32, %arg1: i32) -> (i32, i32, i32) {
    %c0_i32 = arith.constant 0 : i32
    %c0_i32_0 = arith.constant 0 : i32
    %c0_i32_1 = arith.constant 0 : i32
    return %arg0, %c0_i32, %c0_i32_0 : i32, i32, i32
  }
}

</mosaic_0001>

<bundles_post_ra>
// kernel: double_conv.5
= control target key start
LH: loop header
LB: loop body
LE: loop exit
PB: predicated region body
PF: predicated region fallthrough
CT: control target
= control target key end

     0   :  { %s580_s12 = smov 0   ;;  %s582_s13 = smov 0   ;;  %s705_s0 = inlined_call_operand.vmem [shape: bf16[2,16,16,128], index: 0, kind: input, shape index: {}]   ;;  %s706_s1 = inlined_call_operand.vmem [shape: f32[1,128], index: 1, kind: input, shape index: {}]   ;;  %s707_s2 = inlined_call_operand.vmem [shape: f32[1,128], index: 2, kind: input, shape index: {}]   ;;  %s708_s3 = inlined_call_operand.vmem [shape: f32[2,16,16,128], index: 3, kind: output, shape index: {}]  }
   0x1   :  { %s584_s14 = smov 0   ;;  %s586_s15 = smov 0  }
   0x2   :  { %s588_s16 = smov 0  }
   0x3 LB: > { %s22_s17 = sadd.s32 1, %s550_s14  ;;  %s25_s18 = sadd.s32 1, %s554_s15  ;;  %s558_s16 = sphi %s588_s16, %s13_s16   ;;  %s554_s15 = sphi %s586_s15, %s712_s15   ;;  %s550_s14 = sphi %s584_s14, %s711_s14   ;;  %s546_s13 = sphi %s582_s13, %s710_s13   ;;  %s542_s12 = sphi %s580_s12, %s709_s12  }
   0x4   : > { %p23_p0 = scmp.ge.s32.totalorder %s22_s17, 2  ;;  %p428_p1 = scmp.ge.s32.totalorder %s558_s16, 1 }
   0x5   : > { %p159_p2 = scmp.lt.s32.totalorder %s558_s16, 5 }
   0x6   : > { %s714_s17 = smov (%p23_p0, %s22_s17), 0  ;;  %s716_s18 = smov (!%p23_p0, %s25_s18), %s554_s15 }
   0x7   : > { %p160_p3 = pnand %p428_p1, %p159_p2  ;;  %p27_p4 = scmp.ge.s32.totalorder %s716_s18, 2 }
   0x8   : > { %s429_s19 = sshll.u32 (!%p160_p3), %s542_s12, 3  ;;  %p194_p5 = scmp.lt.s32.totalorder (!%p160_p3), %s546_s13, 1 }
   0x9   : > { %s718_s18 = smov (%p27_p4, %s716_s18), 0  ;;  %163 = sbr.rel (%p160_p3) target bundleno = 40 (0x28), region = 32 }
   0xa   : > { %p196_p6 = scmp.lt.s32.totalorder (!%p160_p3), %s429_s19, 15 }
   0xe   : > { %s720_s13 = smov (!%p194_p5, %s546_s13), 1  ;;  %s722_s19 = smov (!%p196_p6, %s429_s19), 15  ;;  %v621_v0 = vld [vmem:[%s706_s1] ss:$0 sm:$0xff] }
   0xf   : > { %s431_s20 = sshll.u32 %s720_s13, 5  ;;  %s430_s21 = sshll.u32 %s722_s19, 1  ;;  %v630_v9 = vld [vmem:[%s707_s2] ss:$0 sm:$0xff] }
  0x10   : > { %s610_s22 = sadd.s32 %s431_s20, %s430_s21 }
  0x11   : > { %s432_s23 = sshll.u32 %s610_s22, 2  ;;  %s436_s4 = sshll.u32 %s610_s22, 3 }
  0x12   : > { %s616_s26 = scalar_lea.vmem %s705_s0, %s432_s23  ;;  %s648_s7 = scalar_lea.vmem %s708_s3, %s436_s4 }
  0x13   : > { %v442_v1 = vld [vmem:[%s616_s26] sm:$0xff]   ;;  %v473_v2 = vld [vmem:[%s616_s26 + $0x8] sm:$0xff]   ;;  %v474_v3 = vld [vmem:[%s616_s26 + $0x10] sm:$0xff]  }
  0x14   : > { %v443_v4 = vunpack.c.l.bf16 %v442_v1  ;;  %v444_v5 = vunpack.c.h.bf16 %v442_v1  ;;  %v447_v6 = vunpack.c.l.bf16 %v473_v2  ;;  %v448_v7 = vunpack.c.h.bf16 %v473_v2  ;;  %v475_v8 = vld [vmem:[%s616_s26 + $0x18] sm:$0xff]   ;;  %v476_v30 = vld [vmem:[%s616_s26 + $0x20] sm:$0xff]   ;;  %v477_v31 = vld [vmem:[%s616_s26 + $0x28] sm:$0xff]  }
  0x15   : > { %v451_v10 = vunpack.c.l.bf16 %v474_v3  ;;  %v452_v11 = vunpack.c.h.bf16 %v474_v3  ;;  %v455_v12 = vunpack.c.l.bf16 %v475_v8  ;;  %v456_v13 = vunpack.c.h.bf16 %v475_v8  ;;  %v478_v36 = vld [vmem:[%s616_s26 + $0x30] sm:$0xff]   ;;  %v479_v37 = vld [vmem:[%s616_s26 + $0x38] sm:$0xff]  }
  0x16   : > { %v254_v14 = vmul.f32 %v443_v4, %v621_v0  ;;  %v255_v15 = vmul.f32 %v444_v5, %v621_v0  ;;  %v256_v16 = vmul.f32 %v447_v6, %v621_v0  ;;  %v257_v17 = vmul.f32 %v448_v7, %v621_v0 }
  0x17   : > { %v258_v18 = vmul.f32 %v451_v10, %v621_v0  ;;  %v259_v19 = vmul.f32 %v452_v11, %v621_v0  ;;  %v260_v20 = vmul.f32 %v455_v12, %v621_v0  ;;  %v261_v21 = vmul.f32 %v456_v13, %v621_v0 }
  0x18   : > { %v277_v22 = vadd.f32 %v630_v9, %v254_v14  ;;  %v278_v23 = vadd.f32 %v630_v9, %v255_v15  ;;  %v279_v24 = vadd.f32 %v630_v9, %v256_v16  ;;  %v280_v25 = vadd.f32 %v630_v9, %v257_v17 }
  0x19   : > { %v281_v26 = vadd.f32 %v630_v9, %v258_v18  ;;  %v282_v27 = vadd.f32 %v630_v9, %v259_v19  ;;  %v283_v28 = vadd.f32 %v630_v9, %v260_v20  ;;  %v284_v29 = vadd.f32 %v630_v9, %v261_v21 }
  0x1a   : > { %v293_v32 = vmax.f32 %v277_v22, 0.0  ;;  %v294_v33 = vmax.f32 %v278_v23, 0.0  ;;  %v295_v34 = vmax.f32 %v279_v24, 0.0  ;;  %v296_v35 = vmax.f32 %v280_v25, 0.0 }
  0x1b   : > { %v297_v38 = vmax.f32 %v281_v26, 0.0  ;;  %v298_v39 = vmax.f32 %v282_v27, 0.0  ;;  %v299_v40 = vmax.f32 %v283_v28, 0.0  ;;  %v300_v41 = vmax.f32 %v284_v29, 0.0 }
  0x1c   : > { %309 = vst [vmem:[%s648_s7] sm:$0xff] %v293_v32  ;;  %310 = vst [vmem:[%s648_s7 + $0x8] sm:$0xff] %v294_v33  ;;  %v459_v42 = vunpack.c.l.bf16 %v476_v30  ;;  %v460_v43 = vunpack.c.h.bf16 %v476_v30  ;;  %v463_v44 = vunpack.c.l.bf16 %v477_v31  ;;  %v464_v45 = vunpack.c.h.bf16 %v477_v31 }
  0x1d   : > { %311 = vst [vmem:[%s648_s7 + $0x10] sm:$0xff] %v295_v34  ;;  %312 = vst [vmem:[%s648_s7 + $0x18] sm:$0xff] %v296_v35  ;;  %v467_v46 = vunpack.c.l.bf16 %v478_v36  ;;  %v468_v47 = vunpack.c.h.bf16 %v478_v36  ;;  %v471_v48 = vunpack.c.l.bf16 %v479_v37  ;;  %v472_v49 = vunpack.c.h.bf16 %v479_v37 }
  0x1e   : > { %313 = vst [vmem:[%s648_s7 + $0x20] sm:$0xff] %v297_v38  ;;  %314 = vst [vmem:[%s648_s7 + $0x28] sm:$0xff] %v298_v39  ;;  %v262_v50 = vmul.f32 %v459_v42, %v621_v0  ;;  %v263_v51 = vmul.f32 %v460_v43, %v621_v0  ;;  %v264_v52 = vmul.f32 %v463_v44, %v621_v0 }
  0x1f   : > { %315 = vst [vmem:[%s648_s7 + $0x30] sm:$0xff] %v299_v40  ;;  %316 = vst [vmem:[%s648_s7 + $0x38] sm:$0xff] %v300_v41  ;;  %v265_v53 = vmul.f32 %v464_v45, %v621_v0  ;;  %v266_v54 = vmul.f32 %v467_v46, %v621_v0  ;;  %v267_v55 = vmul.f32 %v468_v47, %v621_v0 }
  0x20   : > { %v268_v56 = vmul.f32 %v471_v48, %v621_v0  ;;  %v269_v57 = vmul.f32 %v472_v49, %v621_v0  ;;  %v285_v58 = vadd.f32 %v630_v9, %v262_v50  ;;  %v286_v59 = vadd.f32 %v630_v9, %v263_v51 }
  0x21   : > { %v287_v60 = vadd.f32 %v630_v9, %v264_v52  ;;  %v288_v61 = vadd.f32 %v630_v9, %v265_v53  ;;  %v289_v62 = vadd.f32 %v630_v9, %v266_v54  ;;  %v290_v63 = vadd.f32 %v630_v9, %v267_v55 }
  0x22   : > { %v291_v0 = vadd.f32 %v630_v9, %v268_v56  ;;  %v292_v1 = vadd.f32 %v630_v9, %v269_v57  ;;  %v301_v2 = vmax.f32 %v285_v58, 0.0  ;;  %v302_v3 = vmax.f32 %v286_v59, 0.0 }
  0x23   : > { %v303_v4 = vmax.f32 %v287_v60, 0.0  ;;  %v304_v5 = vmax.f32 %v288_v61, 0.0  ;;  %v305_v6 = vmax.f32 %v289_v62, 0.0  ;;  %v306_v7 = vmax.f32 %v290_v63, 0.0 }
  0x24   : > { %v307_v8 = vmax.f32 %v291_v0, 0.0  ;;  %v308_v10 = vmax.f32 %v292_v1, 0.0  ;;  %317 = vst [vmem:[%s648_s7 + $0x40] sm:$0xff] %v301_v2  ;;  %318 = vst [vmem:[%s648_s7 + $0x48] sm:$0xff] %v302_v3 }
  0x25   : > { %319 = vst [vmem:[%s648_s7 + $0x50] sm:$0xff] %v303_v4  ;;  %320 = vst [vmem:[%s648_s7 + $0x58] sm:$0xff] %v304_v5 }
  0x26   : > { %321 = vst [vmem:[%s648_s7 + $0x60] sm:$0xff] %v305_v6  ;;  %322 = vst [vmem:[%s648_s7 + $0x68] sm:$0xff] %v306_v7 }
  0x27   : > { %323 = vst [vmem:[%s648_s7 + $0x70] sm:$0xff] %v307_v8  ;;  %324 = vst [vmem:[%s648_s7 + $0x78] sm:$0xff] %v308_v10 }
  0x28 PF: > { %s13_s16 = sadd.s32 1, %s558_s16   ;;  %s709_s12 = smov %s550_s14 }
  0x29   : > { %p10_p7 = scmp.ge.s32.totalorder %s13_s16, 6   ;;  %s710_s13 = smov %s554_s15 }
  0x2a   : > { %s711_s14 = smov %s714_s17  ;;  %s712_s15 = smov %s718_s18 }
  0x2b   :  { %12 = sbr.rel (!%p10_p7) target bundleno = 3 (0x3), region = 62 }

// kernel: double_conv.3
= control target key start
LH: loop header
LB: loop body
LE: loop exit
PB: predicated region body
PF: predicated region fallthrough
CT: control target
= control target key end

     0   :  { %s2894_s15 = smov 0   ;;  %s2896_s16 = smov 0   ;;  %s3890_s0 = inlined_call_operand.vmem [shape: bf16[32,16,128], index: 0, kind: input, shape index: {}, may-alias: {0,1}]   ;;  %s3891_s1 = inlined_call_operand.vmem [shape: bf16[2,16,16,128], index: 1, kind: input, shape index: {}, may-alias: {0,1}]   ;;  %s3892_s2 = inlined_call_operand.vmem [shape: bf16[1152,128], index: 2, kind: input, shape index: {}]   ;;  %s3893_s3 = inlined_call_operand.vmem [shape: bf16[2,16,16,128], index: 3, kind: output, shape index: {0}]   ;;  %s3894_s4 = inlined_call_operand.vmem [shape: f32[2,2,128], index: 4, kind: output, shape index: {1}]  }
   0x1   :  { %s2898_s17 = smov 0   ;;  %s2900_s18 = smov 0  }
   0x2   :  { %s2902_s19 = smov 0  }
   0x3 LB: > { %s24_s20 = sadd.s32 1, %s2858_s17  ;;  %s27_s21 = sadd.s32 1, %s2862_s18  ;;  %s2866_s19 = sphi %s2902_s19, %s15_s19   ;;  %s2862_s18 = sphi %s2900_s18, %s3970_s18   ;;  %s2858_s17 = sphi %s2898_s17, %s3969_s17   ;;  %s2854_s16 = sphi %s2896_s16, %s3968_s16   ;;  %s2850_s15 = sphi %s2894_s15, %s3967_s15  }
   0x4   : > { %p25_p0 = scmp.ge.s32.totalorder %s24_s20, 2  ;;  %p2189_p1 = scmp.ge.s32.totalorder %s2866_s19, 1 }
   0x5   : > { %p163_p2 = scmp.lt.s32.totalorder %s2866_s19, 5 }
   0x6   : > { %s3972_s20 = smov (%p25_p0, %s24_s20), 0  ;;  %s3974_s21 = smov (!%p25_p0, %s27_s21), %s2862_s18 }
   0x7   : > { %p164_p3 = pnand %p2189_p1, %p163_p2  ;;  %p29_p4 = scmp.ge.s32.totalorder %s3974_s21, 2 }
   0x9   : > { %s3976_s21 = smov (%p29_p4, %s3974_s21), 0  ;;  %167 = sbr.rel (%p164_p3) target bundleno = 468 (0x1d4), region = 28 }
   0xe   : > { %s2927_s22 = sshll.u32 %s2850_s15, 3  ;;  %p202_p5 = scmp.lt.s32.totalorder %s2854_s16, 1 }
   0xf   : > { %p204_p6 = scmp.lt.s32.totalorder %s2927_s22, 15  ;;  %s2200_s23 = sshll.u32 %s2854_s16, 4 }
  0x10   : > { %s3978_s16 = smov (!%p202_p5, %s2854_s16), 1  ;;  %s230_s6 = sadd.s32 %s2200_s23, %s2927_s22 }
  0x11   : > { %s205_s24 = scalar_select %p204_p6, %s2927_s22, 15 }
  0x12   : > { %s2192_s25 = sshll.u32 %s3978_s16, 5  ;;  %s2198_s26 = sshll.u32 %s3978_s16, 1 }
  0x13   : > { %s2191_s27 = sshll.u32 %s205_s24, 1  ;;  %s2934_s30 = scalar_lea.vmem %s3894_s4, %s2198_s26 }
  0x14   : > { %s208_s5 = sadd.s32 %s2192_s25, %s2191_s27  ;;  %p2201_p7 = scmp.le.s32.totalorder %s2850_s15, 0 }
  0x15   : > { %s2193_s7 = sshll.u32 %s208_s5, 2  ;;  %s2202_s14 = sadd.s32 (!%p2201_p7), 4294967295, %s230_s6 }
  0x16   : > { %s2940_s10 = scalar_lea.vmem %s3891_s1, %s2193_s7  ;;  %s2945_s13 = scalar_lea.vmem %s3893_s3, %s2193_s7 }
  0x17   : > { %234 = sbr.rel (%p2201_p7) target bundleno = 31 (0x1f), region = 32  ;;  %s2317_s16 = sshll.u32 (!%p2201_p7), %s2202_s14, 3 }
  0x18   : > { %s238_s23 = scalar_lea.vmem (!%p2201_p7), %s3890_s0, %s2317_s16 }
  0x1c   : > { %v272_v0 = vld [vmem:[%s238_s23] sm:$0xff] }
  0x1d   : > { %273 = vst [vmem:[#allocation2] sm:$0xff] %v272_v0 }
  0x1e   : > { %281 = vsyncadd [#allocation3], 128 }
  0x1f PF: > { %p2205_p8 = scmp.ge.s32.totalorder %s2850_s15, 1 }
  0x20   : > { %s2208_s25 = sshll.u32 (!%p2205_p8), %s230_s6, 3 }
  0x21   : > { %285 = sbr.rel (%p2205_p8) target bundleno = 41 (0x29), region = 70  ;;  %s2112_s29 = scalar_lea.vmem (!%p2205_p8), %s3890_s0, %s2208_s25 }
  0x26   : > { %v2209_v1 = vld [vmem:[%s2112_s29 + $0x40] sm:$0xff] }
  0x27   : > { %326 = vst [vmem:[#allocation2 + $0x8] sm:$0xff] %v2209_v1 }
  0x28   : > { %334 = vsyncadd [#allocation3 + $0x1], 128 }
  0x29 PF: > { %p2705_p9 = scmp.gt.s32.totalorder %s2850_s15, 0 }
  0x2b   : > { %2841 = dma.done.wait (%p2705_p9), [#allocation3], 128 }
  0x2c   : > { %2843 = vsyncadd (%p2705_p9), [#allocation3], 4294967168  ;;  %p2706_p10 = scmp.lt.s32.totalorder %s2850_s15, 1 }
  0x2e   : > { %2845 = dma.done.wait (%p2706_p10), [#allocation3 + $0x1], 128 }
  0x2f   : > { %2847 = vsyncadd (%p2706_p10), [#allocation3 + $0x1], 4294967168  ;;  %v2748_v2 = vld [vmem:[%s3892_s2 + $0x78] sm:$0xff]   ;;  %v2752_v6 = vld [vmem:[%s3892_s2 + $0x70] sm:$0xff]   ;;  %s2213_s12 = sadd.s32 4294967295, %s2927_s22  ;;  %vm594_vm6 = vcmask 1040384  }
  0x30   : > { %v2749_v3 = vld [vmem:[%s3892_s2 + $0xf8] sm:$0xff]   ;;  %2381 = vmatprep.subr.bf16.mxu0 %v2748_v2  ;;  %v2753_v7 = vld [vmem:[%s3892_s2 + $0xf0] sm:$0xff]   ;;  %v2756_v10 = vld [vmem:[%s3892_s2 + $0x68] sm:$0xff]   ;;  %v3000_v16 = vstv %s2213_s12  ;;  %vm595_vm7 = vsmask.f32 256  ;;  %vm738_vm12 = vcmask 1046528  }
  0x31   : > { %v2750_v4 = vld [vmem:[%s3892_s2 + $0x38] sm:$0xff]   ;;  %2445 = vmatprep.subr.bf16.mxu1 %v2749_v3  ;;  %v2754_v8 = vld [vmem:[%s3892_s2 + $0x30] sm:$0xff]   ;;  %v2757_v11 = vld [vmem:[%s3892_s2 + $0xe8] sm:$0xff]   ;;  %v375_v18 = vadd.s32 1, %v3000_v16  ;;  %vm384_vm0 = vcmp.ge.s32.totalorder %v3000_v16, 0  ;;  %vm394_vm1 = vcmp.lt.s32.totalorder %v3000_v16, 16 }
  0x32   : > { %v2751_v5 = vld [vmem:[%s3892_s2 + $0xb8] sm:$0xff]   ;;  %2382 = vmatpush3.bf16.msra.mxu0 %v2750_v4  ;;  %v2755_v9 = vld [vmem:[%s3892_s2 + $0xb0] sm:$0xff]   ;;  %v2758_v12 = vld [vmem:[%s3892_s2 + $0x28] sm:$0xff]   ;;  %v376_v32 = vadd.s32 2, %v3000_v16  ;;  %v3056_v34 = vadd.s32 3, %v3000_v16  ;;  %v3062_v36 = vadd.s32 4, %v3000_v16 }
  0x33   : > { %2446 = vmatpush3.bf16.msra.mxu1 %v2751_v5  ;;  %2383 = vmatprep.subr.bf16.mxu0 %v2752_v6  ;;  %v2759_v13 = vld [vmem:[%s3892_s2 + $0xa8] sm:$0xff]   ;;  %v2760_v14 = vld [vmem:[%s3892_s2 + $0x60] sm:$0xff]   ;;  %v2764_v20 = vld [vmem:[%s3892_s2 + $0x58] sm:$0xff]   ;;  %vm385_vm2 = vcmp.ge.s32.totalorder %v375_v18, 0  ;;  %vm395_vm3 = vcmp.lt.s32.totalorder %v375_v18, 16  ;;  %v3068_v38 = vadd.s32 5, %v3000_v16 }
  0x34   : > { %2447 = vmatprep.subr.bf16.mxu1 %v2753_v7  ;;  %v2761_v15 = vld [vmem:[%s3892_s2 + $0xe0] sm:$0xff]   ;;  %v2765_v21 = vld [vmem:[%s3892_s2 + $0xd8] sm:$0xff]   ;;  %v2768_v24 = vld [vmem:[%s3892_s2 + $0x50] sm:$0xff]   ;;  %vm386_vm8 = vcmp.ge.s32.totalorder %v376_v32, 0  ;;  %vm396_vm9 = vcmp.lt.s32.totalorder %v376_v32, 16  ;;  %v3080_v42 = vadd.s32 6, %v3000_v16 }
  0x35   : > { %v2762_v17 = vld [vmem:[%s3892_s2 + $0x20] sm:$0xff]   ;;  %v2766_v22 = vld [vmem:[%s3892_s2 + $0x18] sm:$0xff]   ;;  %v2769_v25 = vld [vmem:[%s3892_s2 + $0xd0] sm:$0xff]   ;;  %vm387_vm11 = vcmp.ge.s32.totalorder %v3056_v34, 0  ;;  %vm397_vm13 = vcmp.lt.s32.totalorder %v3056_v34, 16  ;;  %vm388_vm14 = vcmp.ge.s32.totalorder %v3062_v36, 0 }
  0x36   : > { %2384 = vmatpush3.bf16.msra.mxu0 %v2754_v8  ;;  %v2763_v19 = vld [vmem:[%s3892_s2 + $0xa0] sm:$0xff]   ;;  %v2767_v23 = vld [vmem:[%s3892_s2 + $0x98] sm:$0xff]   ;;  %v2770_v26 = vld [vmem:[%s3892_s2 + $0x10] sm:$0xff]   ;;  %vm617_vm15 = vsmask.f32 7424  ;;  %v3120_v4 = vadd.s32 7, %v3000_v16 }
  0x37   : > { %2448 = vmatpush3.bf16.msra.mxu1 %v2755_v9  ;;  %2385 = vmatprep.subr.bf16.mxu0 %v2756_v10  ;;  %vm3034_vm4 = vmand %vm384_vm0, %vm394_vm1  ;;  %v2771_v29 = vld [vmem:[%s3892_s2 + $0x90] sm:$0xff]   ;;  %v2772_v30 = vld [vmem:[%s3892_s2 + $0x48] sm:$0xff]   ;;  %vm398_vm0 = vcmp.lt.s32.totalorder %v3062_v36, 16  ;;  %v3123_v5 = vadd.s32 8, %v3000_v16  ;;  %p2296_p11 = scmp.ne.s32.totalorder %s2850_s15, 0 }
  0x38   : > { %2449 = vmatprep.subr.bf16.mxu1 %v2757_v11  ;;  %vm3038_vm5 = vmand %vm385_vm2, %vm395_vm3  ;;  %v2773_v31 = vld [vmem:[%s3892_s2 + $0xc8] sm:$0xff]   ;;  %v2776_v37 = vld [vmem:[%s3892_s2 + $0x40] sm:$0xff]   ;;  %vm389_vm2 = vcmp.ge.s32.totalorder %v3068_v38, 0  ;;  %vm399_vm3 = vcmp.lt.s32.totalorder %v3068_v38, 16 }
  0x39   : > { %v2774_v33 = vld [vmem:[%s3892_s2 + $0x8] sm:$0xff]   ;;  %v2777_v39 = vld [vmem:[%s3892_s2 + $0xc0] sm:$0xff]   ;;  %v2780_v50 = vld [vmem:[%s3892_s2 + $0x178] sm:$0xff]  }
  0x3a   : > { %2386 = vmatpush3.bf16.msra.mxu0 %v2758_v12  ;;  %v2775_v35 = vld [vmem:[%s3892_s2 + $0x88] sm:$0xff]   ;;  %v2778_v40 = vld [vmem:[%s3892_s2] sm:$0xff]   ;;  %vm3094_vm10 = vmand %vm386_vm8, %vm396_vm9  ;;  %vm400_vm8 = vcmp.lt.s32.totalorder %v3080_v42, 16 }
  0x3b   : > { %2450 = vmatpush3.bf16.msra.mxu1 %v2759_v13  ;;  %2387 = vmatprep.subr.bf16.mxu0 %v2760_v14  ;;  %v2779_v41 = vld [vmem:[%s3892_s2 + $0x80] sm:$0xff]   ;;  %v356_v55 = vld [vmem:[%s2940_s10 + $0x8] sm:$0xf]  ;;  %v357_v58 = vld [vmem:[%s2940_s10 + $0xc] sm:$0xf] }
  0x3c   : > { %2451 = vmatprep.subr.bf16.mxu1 %v2761_v15  ;;  %v352_v43 = vld [vmem:[#allocation2] sm:$0xf]  ;;  %v353_v44 = vld [vmem:[#allocation2 + $0x4] sm:$0xf]  ;;  %v438_v59 = vsel %vm3094_vm10, %v356_v55, 0  ;;  %v439_v62 = vsel %vm3094_vm10, %v357_v58, 0  ;;  %vm3112_vm1 = vmand %vm594_vm6, %vm595_vm7 }
  0x3d   : > { %v354_v45 = vld [vmem:[%s2940_s10] sm:$0xf]  ;;  %v434_v46 = vsel %vm3034_vm4, %v352_v43, 0  ;;  %v435_v47 = vsel %vm3034_vm4, %v353_v44, 0  ;;  %v355_v48 = vld [vmem:[%s2940_s10 + $0x4] sm:$0xf]  ;;  %v2216_v0 = vcombine.low %v438_v59, %v439_v62  ;;  %vm3150_vm4 = vmand %vm387_vm11, %vm397_vm13 }
  0x3e   : > { %2388 = vmatpush3.bf16.msra.mxu0 %v2762_v17  ;;  %v436_v49 = vsel %vm3038_vm5, %v354_v45, 0  ;;  %v2214_v52 = vcombine.low %v434_v46, %v435_v47  ;;  %v437_v53 = vsel %vm3038_vm5, %v355_v48, 0  ;;  %v2785_v3 = vld [vmem:[%s3892_s2 + $0x1f8] sm:$0xff]   ;;  %v358_v14 = vld [vmem:[%s2940_s10 + $0x10] sm:$0xf]  ;;  %vm3178_vm5 = vmand %vm388_vm14, %vm398_vm0  ;;  %vm390_vm7 = vcmp.ge.s32.totalorder %v3080_v42, 0 }
  0x3f   : > { %2452 = vmatpush3.bf16.msra.mxu1 %v2763_v19  ;;  %2389 = vmatprep.subr.bf16.mxu0 %v2764_v20  ;;  %v2215_v54 = vcombine.low %v436_v49, %v437_v53  ;;  %v519_v8 = vshrl.u32 %v2216_v0, 16  ;;  %v522_v9 = vshll.u32 %v2216_v0, 16  ;;  %v359_v19 = vld [vmem:[%s2940_s10 + $0x14] sm:$0xf]  ;;  %v2787_v20 = vld [vmem:[%s3892_s2 + $0x1b8] sm:$0xff]   ;;  %v2784_v0 = vld [vmem:[%s3892_s2 + $0x168] sm:$0xff]  }
  0x40   : > { %2453 = vmatprep.subr.bf16.mxu1 %v2765_v21  ;;  %v505_v56 = vshrl.u32 %v2214_v52, 16  ;;  %v508_v57 = vshll.u32 %v2214_v52, 16  ;;  %v441_v44 = vsel %vm3150_vm4, %v359_v19, 0  ;;  %v2781_v46 = vld [vmem:[%s3892_s2 + $0x138] sm:$0xff]   ;;  %v2782_v52 = vld [vmem:[%s3892_s2 + $0x170] sm:$0xff]   ;;  %vm3217_vm9 = vmand %vm389_vm2, %vm399_vm3  ;;  %vm391_vm10 = vcmp.ge.s32.totalorder %v3120_v4, 0 }
  0x41   : > { %v512_v60 = vshrl.u32 %v2215_v54, 16  ;;  %v515_v61 = vshll.u32 %v2215_v54, 16  ;;  %v521_v18 = vrot.slane %v519_v8, 7  ;;  %v360_v36 = vld [vmem:[%s2940_s10 + $0x18] sm:$0xf]  ;;  %v2786_v38 = vld [vmem:[%s3892_s2 + $0x128] sm:$0xff]   ;;  %vm3276_vm13 = vmand %vm390_vm7, %vm400_vm8 }
  0x42   : > { %2390 = vmatpush3.bf16.msra.mxu0 %v2766_v22  ;;  %v507_v63 = vrot.slane %v505_v56, 7  ;;  %v361_v55 = vld [vmem:[%s2940_s10 + $0x1c] sm:$0xf]  ;;  %v442_v59 = vsel %vm3178_vm5, %v360_v36, 0  ;;  %v2793_v19 = vld [vmem:[%s3892_s2 + $0x1e8] sm:$0xff]   ;;  %vm401_vm11 = vcmp.lt.s32.totalorder %v3120_v4, 16 }
  0x43   : > { %2454 = vmatpush3.bf16.msra.mxu1 %v2767_v23  ;;  %2391 = vmatprep.subr.bf16.mxu0 %v2768_v24  ;;  %v514_v2 = vrot.slane %v512_v60, 7  ;;  %v524_v32 = vor.u32 %v522_v9, %v521_v18  ;;  %v443_v60 = vsel %vm3178_vm5, %v361_v55, 0  ;;  %v2795_v42 = vld [vmem:[%s3892_s2 + $0x1a8] sm:$0xff]   ;;  %v2794_v36 = vld [vmem:[%s3892_s2 + $0x118] sm:$0xff]   ;;  %vm392_vm14 = vcmp.ge.s32.totalorder %v3123_v5, 0  ;;  %vm3335_vm2 = vmand %vm391_vm10, %vm401_vm11 }
  0x44   : > { %2455 = vmatprep.subr.bf16.mxu1 %v2769_v25  ;;  %v510_v6 = vor.u32 %v508_v57, %v507_v63  ;;  %v607_v7 = vsel %vm3112_vm1, %v507_v63, 0  ;;  %v2783_v57 = vld [vmem:[%s3892_s2 + $0x130] sm:$0xff]   ;;  %vm402_vm0 = vcmp.lt.s32.totalorder %v3123_v5, 16 }
  0x45   : > { %v626_v10 = vshll.u32 %v607_v7, 16  ;;  %v517_v11 = vor.u32 %v515_v61, %v514_v2  ;;  %v740_v12 = vrot.slane %v607_v7, 1  ;;  %v3131_v13 = vsel %vm3112_vm1, %v514_v2, 0  ;;  %v2791_v61 = vld [vmem:[%s3892_s2 + $0x1b0] sm:$0xff]   ;;  %vm3388_vm3 = vmand %vm392_vm14, %vm402_vm0 }
  0x46   : > { %2392 = vmatpush3.bf16.msra.mxu0 %v2770_v26  ;;  %v597_v15 = vsel %vm3112_vm1, 0, %v510_v6  ;;  %v638_v17 = vshll.u32 %v3131_v13, 16  ;;  %v743_v24 = vrot.slane %v3131_v13, 1  ;;  %v3170_v43 = vsel %vm3112_vm1, 0, %v524_v32  ;;  %v363_v13 = vld [vmem:[%s2940_s10 + $0x24] sm:$0xf] }
  0x47   : > { %2456 = vmatpush3.bf16.msra.mxu1 %v2771_v29  ;;  %2393 = vmatprep.subr.bf16.mxu0 %v2772_v30  ;;  %v619_v21 = vshrl.u32 %v597_v15, 16  ;;  %v621_v22 = vshll.u32 %v597_v15, 16  ;;  %v3143_v23 = vsel %vm3112_vm1, 0, %v517_v11  ;;  %v628_v26 = vrot.slane %v626_v10, 1 }
  0x48   : > { %2457 = vmatprep.subr.bf16.mxu1 %v2773_v31  ;;  %1514 = vmatprep.mubr.bf16.mxu1 %v3143_v23  ;;  %v739_v27 = vrot.slane %v597_v15, 1  ;;  %v631_v28 = vshrl.u32 %v3143_v23, 16  ;;  %v633_v29 = vshll.u32 %v3143_v23, 16  ;;  %v640_v31 = vrot.slane %v638_v17, 1 }
  0x49   : > { %v623_v30 = vrot.slane %v621_v22, 1  ;;  %v742_v48 = vrot.slane %v3143_v23, 1  ;;  %v643_v49 = vshrl.u32 %v3170_v43, 16  ;;  %v2218_v2 = vcombine.low %v442_v59, %v443_v60 }
  0x4a   : > { %2394 = vmatpush3.bf16.msra.mxu0 %v2774_v33  ;;  %v3159_v33 = vsel %vm3112_vm1, %v521_v18, 0  ;;  %v741_v34 = vsel %vm738_vm12, %v739_v27, %v740_v12  ;;  %v745_v9 = vrot.slane %v3170_v43, 1  ;;  %v362_v12 = vld [vmem:[%s2940_s10 + $0x20] sm:$0xf]  ;;  %v445_v25 = vsel %vm3217_vm9, %v363_v13, 0 }
  0x4b   : > { %2458 = vmatpush3.bf16.msra.mxu1 %v2775_v35  ;;  %2395 = vmatprep.subr.bf16.mxu0 %v2776_v37  ;;  %v635_v35 = vrot.slane %v633_v29, 1  ;;  %v650_v37 = vshll.u32 %v3159_v33, 16  ;;  %v3223_v6 = vsel %vm738_vm12, %v742_v48, %v743_v24  ;;  %v533_v10 = vshrl.u32 %v2218_v2, 16  ;;  %v2788_v24 = vld [vmem:[%s3892_s2 + $0x160] sm:$0xff]   ;;  %v364_v48 = vld [vmem:[%s2940_s10 + $0x28] sm:$0xf] }
  0x4c   : > { %2459 = vmatprep.subr.bf16.mxu1 %v2777_v39  ;;  %v440_v39 = vsel %vm3150_vm4, %v358_v14, 0  ;;  %v536_v11 = vshll.u32 %v2218_v2, 16  ;;  %v444_v18 = vsel %vm3217_vm9, %v362_v12, 0  ;;  %v2798_v12 = vld [vmem:[%s3892_s2 + $0x110] sm:$0xff]  }
  0x4d   : > { %v636_v47 = vor.u32 %v635_v35, %v631_v28  ;;  %v652_v53 = vrot.slane %v650_v37, 1  ;;  %v2217_v54 = vcombine.low %v440_v39, %v441_v44  ;;  %v535_v17 = vrot.slane %v533_v10, 7 }
  0x4e   : > { %2396 = vmatpush3.bf16.msra.mxu0 %v2778_v40  ;;  %v2789_v40 = vld [vmem:[%s3892_s2 + $0x1f0] sm:$0xff]   ;;  %v2219_v29 = vcombine.low %v444_v18, %v445_v25 }
  0x4f   : > { %2460 = vmatpush3.bf16.msra.mxu1 %v2779_v41  ;;  %2509 = vmatprep.subr.bf16.mxu0 %v2780_v50  ;;  %v624_v41 = vor.u32 %v623_v30, %v619_v21  ;;  %v645_v50 = vshll.u32 %v3170_v43, 16  ;;  %v3198_v56 = vsel %vm617_vm15, %v636_v47, %v640_v31  ;;  %v526_v62 = vshrl.u32 %v2217_v54, 16  ;;  %v2792_v47 = vld [vmem:[%s3892_s2 + $0x158] sm:$0xff]  }
  0x50   : > { %2573 = vmatprep.subr.bf16.mxu1 %v2785_v3  ;;  %v529_v63 = vshll.u32 %v2217_v54, 16  ;;  %v746_v21 = vrot.slane %v3159_v33, 1  ;;  %v538_v27 = vor.u32 %v536_v11, %v535_v17  ;;  %v3257_v28 = vsel %vm3112_vm1, %v535_v17, 0  ;;  %v2790_v33 = vld [vmem:[%s3892_s2 + $0x120] sm:$0xff]   ;;  %v2801_v17 = vld [vmem:[%s3892_s2 + $0x1d8] sm:$0xff]  }
  0x51   : > { %v629_v51 = vsel %vm617_vm15, %v624_v41, %v628_v26  ;;  %v647_v58 = vrot.slane %v645_v50, 1  ;;  %v528_v8 = vrot.slane %v526_v62, 7  ;;  %v543_v35 = vshll.u32 %v2219_v29, 16 }
  0x52   : > { %1515 = vmatmul.mubr.bf16.vlgmr.msra.gmra.mxu1 %v741_v34  ;;  %1417 = vmatprep.mubr.bf16.mxu0 %v629_v51  ;;  %v3267_v32 = vsel %vm3112_vm1, 0, %v538_v27  ;;  %v540_v34 = vshrl.u32 %v2219_v29, 16  ;;  %v674_v41 = vshll.u32 %v3257_v28, 16  ;;  %v365_v51 = vld [vmem:[%s2940_s10 + $0x2c] sm:$0xf]  ;;  %v752_v3 = vrot.slane %v3257_v28, 1 }
  0x53   : > { %1522 = vmatprep.mubr.bf16.mxu1 %v3170_v43  ;;  %2574 = vmatpush3.bf16.msra.mxu1 %v2787_v20  ;;  %v648_v7 = vor.u32 %v647_v58, %v643_v49  ;;  %v531_v14 = vor.u32 %v529_v63, %v528_v8  ;;  %v2797_v58 = vld [vmem:[%s3892_s2 + $0x1e0] sm:$0xff]   ;;  %v751_v2 = vrot.slane %v3267_v32, 1  ;;  %v2803_v29 = vld [vmem:[%s3892_s2 + $0x198] sm:$0xff]  }
  0x54   : > { %2575 = vmatprep.subr.bf16.mxu1 %v2789_v40  ;;  %1418 = vmatmul.mubr.bf16.vlgmr.msra.gmra.mxu0 %v597_v15  ;;  %v3234_v15 = vsel %vm3112_vm1, %v528_v8, 0  ;;  %v669_v40 = vshll.u32 %v3267_v32, 16  ;;  %v676_v60 = vrot.slane %v674_v41, 1  ;;  %v2799_v8 = vld [vmem:[%s3892_s2 + $0x1a0] sm:$0xff]  }
  0x55   : > { %2510 = vmatpush3.bf16.msra.mxu0 %v2781_v46  ;;  %1425 = vmatprep.mubr.bf16.mxu0 %v3198_v56  ;;  %v3242_v20 = vsel %vm617_vm15, %v648_v7, %v652_v53  ;;  %v662_v22 = vshll.u32 %v3234_v15, 16  ;;  %v3253_v26 = vsel %vm3112_vm1, 0, %v531_v14  ;;  %v749_v45 = vrot.slane %v3234_v15, 1  ;;  %v366_v14 = vld [vmem:[%s2940_s10 + $0x30] sm:$0xf] }
  0x56   : > { %2511 = vmatprep.subr.bf16.mxu0 %v2782_v52  ;;  %v655_v30 = vshrl.u32 %v3253_v26, 16  ;;  %v657_v31 = vshll.u32 %v3253_v26, 16  ;;  %v542_v46 = vrot.slane %v540_v34, 7  ;;  %v748_v50 = vrot.slane %v3253_v26, 1  ;;  %v367_v15 = vld [vmem:[%s2940_s10 + $0x34] sm:$0xf] }
  0x57   : > { %2576 = vmatpush3.bf16.msra.mxu1 %v2791_v61  ;;  %v664_v44 = vrot.slane %v662_v22, 1  ;;  %v446_v52 = vsel %vm3276_vm13, %v364_v48, 0  ;;  %v667_v53 = vshrl.u32 %v3267_v32, 16  ;;  %v671_v59 = vrot.slane %v669_v40, 1  ;;  %v2804_v34 = vld [vmem:[%s3892_s2 + $0x1d0] sm:$0xff]  }
  0x58   : > { %2577 = vmatprep.subr.bf16.mxu1 %v2793_v19  ;;  %v659_v39 = vrot.slane %v657_v31, 1  ;;  %v545_v54 = vor.u32 %v543_v35, %v542_v46  ;;  %v3305_v55 = vsel %vm3112_vm1, %v542_v46, 0  ;;  %v3346_v13 = vsel %vm738_vm12, %v748_v50, %v749_v45  ;;  %v2805_v46 = vld [vmem:[%s3892_s2 + $0x190] sm:$0xff]  }
  0x59   : > { %2512 = vmatpush3.bf16.msra.mxu0 %v2783_v57  ;;  %v447_v57 = vsel %vm3276_vm13, %v365_v51, 0  ;;  %v686_v7 = vshll.u32 %v3305_v55, 16  ;;  %v672_v18 = vor.u32 %v671_v59, %v667_v53  ;;  %v449_v22 = vsel %vm3335_vm2, %v367_v15, 0  ;;  %v2806_v53 = vld [vmem:[%s3892_s2 + $0x140] sm:$0xff]  }
  0x5a   : > { %1523 = vmatmul.mubr.bf16.gmra.mxu1 %v3223_v6  ;;  %2513 = vmatprep.subr.bf16.mxu0 %v2784_v0  ;;  %v660_v49 = vor.u32 %v659_v39, %v655_v30  ;;  %v2220_v61 = vcombine.low %v446_v52, %v447_v57  ;;  %v3320_v63 = vsel %vm3112_vm1, 0, %v545_v54  ;;  %v2796_v0 = vld [vmem:[%s3892_s2 + $0x150] sm:$0xff]   ;;  %v755_v48 = vrot.slane %v3305_v55, 1 }
  0x5b   : > { %1530 = vmatprep.mubr.bf16.mxu1 %v3253_v26  ;;  %2578 = vmatpush3.bf16.msra.mxu1 %v2795_v42  ;;  %v679_v10 = vshrl.u32 %v3320_v63, 16  ;;  %v681_v4 = vshll.u32 %v3320_v63, 16  ;;  %v3377_v35 = vsel %vm617_vm15, %v672_v18, %v676_v60  ;;  %v688_v5 = vrot.slane %v686_v7, 1  ;;  %v2808_v7 = vld [vmem:[%s3892_s2 + $0x100] sm:$0xff]   ;;  %v371_v42 = vld [vmem:[#allocation2 + $0x8] sm:$0xf] }
  0x5c   : > { %1426 = vmatmul.mubr.bf16.gmra.mxu0 %v3143_v23  ;;  %v3282_v23 = vsel %vm738_vm12, %v745_v9, %v746_v21  ;;  %v3316_v62 = vsel %vm617_vm15, %v660_v49, %v664_v44  ;;  %2579 = vmatprep.subr.bf16.mxu1 %v2797_v58  ;;  %v547_v11 = vshrl.u32 %v2220_v61, 16  ;;  %v448_v21 = vsel %vm3335_vm2, %v366_v14, 0  ;;  %v368_v49 = vld [vmem:[%s2940_s10 + $0x38] sm:$0xf]  ;;  %v2811_v14 = vld [vmem:[%s3892_s2 + $0x180] sm:$0xff]  }
  0x5d   : > { %1433 = vmatprep.mubr.bf16.mxu0 %v3242_v20  ;;  %2514 = vmatpush3.bf16.msra.mxu0 %v2786_v38  ;;  %v550_v38 = vshll.u32 %v2220_v61, 16  ;;  %v2221_v25 = vcombine.low %v448_v21, %v449_v22  ;;  %v683_v30 = vrot.slane %v681_v4, 1  ;;  %v3393_v44 = vadd.s32 9, %v3000_v16  ;;  %v369_v16 = vld [vmem:[%s2940_s10 + $0x3c] sm:$0xf] }
  0x5e   : > { %2515 = vmatprep.subr.bf16.mxu0 %v2788_v24  ;;  %v549_v19 = vrot.slane %v547_v11, 7  ;;  %v2800_v24 = vld [vmem:[%s3892_s2 + $0x148] sm:$0xff]   ;;  %v450_v51 = vsel %vm3388_vm3, %v368_v49, 0  ;;  %v451_v52 = vsel %vm3388_vm3, %v369_v16, 0  ;;  %v754_v54 = vrot.slane %v3320_v63, 1 }
  0x5f   : > { %2580 = vmatpush3.bf16.msra.mxu1 %v2799_v8  ;;  %v554_v31 = vshrl.u32 %v2221_v25, 16  ;;  %v557_v39 = vshll.u32 %v2221_v25, 16  ;;  %v684_v50 = vor.u32 %v683_v30, %v679_v10  ;;  %v2222_v57 = vcombine.low %v450_v51, %v451_v52  ;;  %v2809_v10 = vld [vmem:[%s3892_s2 + $0x188] sm:$0xff]  }
  0x60   : > { %2581 = vmatprep.subr.bf16.mxu1 %v2801_v17  ;;  %v552_v27 = vor.u32 %v550_v38, %v549_v19  ;;  %v3364_v28 = vsel %vm3112_vm1, %v549_v19, 0  ;;  %vm393_vm4 = vcmp.ge.s32.totalorder %v3393_v44, 0  ;;  %vm403_vm5 = vcmp.lt.s32.totalorder %v3393_v44, 16  ;;  %v2810_v38 = vld [vmem:[%s3892_s2 + $0x1c0] sm:$0xff]   ;;  %v3458_v19 = vld [vmem:[%s3892_s2 + $0x238] sm:$0xff]  }
  0x61   : > { %2516 = vmatpush3.bf16.msra.mxu0 %v2790_v33  ;;  %v2802_v33 = vld [vmem:[%s3892_s2 + $0x108] sm:$0xff]   ;;  %v698_v40 = vshll.u32 %v3364_v28, 16  ;;  %v556_v41 = vrot.slane %v554_v31, 7  ;;  %v758_v55 = vrot.slane %v3364_v28, 1  ;;  %v3432_v8 = vsel %vm617_vm15, %v684_v50, %v688_v5  ;;  %vm3480_vm7 = vmand %vm393_vm4, %vm403_vm5 }
  0x62   : > { %1531 = vmatmul.mubr.bf16.gmra.mxu1 %v3282_v23  ;;  %2517 = vmatprep.subr.bf16.mxu0 %v2792_v47  ;;  %v3381_v37 = vsel %vm3112_vm1, 0, %v552_v27  ;;  %v3402_v47 = vsel %vm738_vm12, %v751_v2, %v752_v3  ;;  %v564_v2 = vshll.u32 %v2222_v57, 16  ;;  %v2807_v3 = vld [vmem:[%s3892_s2 + $0x1c8] sm:$0xff]   ;;  %v452_v44 = vsel %vm3480_vm7, %v371_v42, 0 }
  0x63   : > { %1538 = vmatprep.mubr.bf16.mxu1 %v3267_v32  ;;  %2582 = vmatpush3.bf16.msra.mxu1 %v2803_v29  ;;  %v693_v45 = vshll.u32 %v3381_v37, 16  ;;  %v691_v58 = vshrl.u32 %v3381_v37, 16  ;;  %v700_v60 = vrot.slane %v698_v40, 1  ;;  %v3422_v61 = vsel %vm3112_vm1, %v556_v41, 0  ;;  %v372_v5 = vld [vmem:[#allocation2 + $0xc] sm:$0xf] }
  0x64   : > { %1434 = vmatmul.mubr.bf16.gmra.mxu0 %v3170_v43  ;;  %2583 = vmatprep.subr.bf16.mxu1 %v2804_v34  ;;  %v757_v21 = vrot.slane %v3381_v37, 1  ;;  %v453_v50 = vsel %vm3480_vm7, %v372_v5, 0 }
  0x65   : > { %1441 = vmatprep.mubr.bf16.mxu0 %v3316_v62  ;;  %2518 = vmatpush3.bf16.msra.mxu0 %v2794_v36  ;;  %v559_v36 = vor.u32 %v557_v39, %v556_v41  ;;  %v695_v59 = vrot.slane %v693_v45, 1  ;;  %v2223_v51 = vcombine.low %v452_v44, %v453_v50 }
  0x66   : > { %2519 = vmatprep.subr.bf16.mxu0 %v2796_v0  ;;  %v561_v0 = vshrl.u32 %v2222_v57, 16  ;;  %v3488_v45 = vsel %vm738_vm12, %v757_v21, %v758_v55 }
  0x67   : > { %2584 = vmatpush3.bf16.msra.mxu1 %v2805_v46  ;;  %v3436_v9 = vsel %vm3112_vm1, 0, %v559_v36  ;;  %v696_v17 = vor.u32 %v695_v59, %v691_v58  ;;  %v571_v55 = vshll.u32 %v2223_v51, 16 }
  0x68   : > { %v563_v11 = vrot.slane %v561_v0, 7  ;;  %2585 = vmatprep.subr.bf16.mxu1 %v2807_v3  ;;  %v705_v18 = vshll.u32 %v3436_v9, 16  ;;  %v703_v30 = vshrl.u32 %v3436_v9, 16  ;;  %v760_v52 = vrot.slane %v3436_v9, 1 }
  0x69   : > { %2520 = vmatpush3.bf16.msra.mxu0 %v2798_v12  ;;  %v3447_v12 = vsel %vm738_vm12, %v754_v54, %v755_v48  ;;  %v3472_v29 = vsel %vm617_vm15, %v696_v17, %v700_v60  ;;  %v568_v54 = vshrl.u32 %v2223_v51, 16 }
  0x6a   : > { %1539 = vmatmul.mubr.bf16.gmra.mxu1 %v3346_v13  ;;  %2521 = vmatprep.subr.bf16.mxu0 %v2800_v24  ;;  %v566_v4 = vor.u32 %v564_v2, %v563_v11  ;;  %v615_v15 = vsel %vm3112_vm1, %v563_v11, 0  ;;  %v710_v24 = vshll.u32 %v3422_v61, 16  ;;  %v707_v31 = vrot.slane %v705_v18, 1  ;;  %v2814_v18 = vld [vmem:[%s3892_s2 + $0x228] sm:$0xff]  }
  0x6b   : > { %1546 = vmatprep.mubr.bf16.mxu1 %v3320_v63  ;;  %2586 = vmatpush3.bf16.msra.mxu1 %v2809_v10  ;;  %v779_v22 = vshll.u32 %v615_v15, 16  ;;  %v787_v41 = vrot.slane %v615_v15, 1  ;;  %v570_v58 = vrot.slane %v568_v54, 7  ;;  %v2813_v15 = vld [vmem:[%s3892_s2 + $0x230] sm:$0xff]  }
  0x6c   : > { %1442 = vmatmul.mubr.bf16.gmra.mxu0 %v3253_v26  ;;  %2587 = vmatprep.subr.bf16.mxu1 %v2810_v38  ;;  %v3465_v25 = vsel %vm3112_vm1, 0, %v566_v4  ;;  %v708_v48 = vor.u32 %v707_v31, %v703_v30  ;;  %v712_v49 = vrot.slane %v710_v24, 1 }
  0x6d   : > { %1449 = vmatprep.mubr.bf16.mxu0 %v3377_v35  ;;  %2522 = vmatpush3.bf16.msra.mxu0 %v2802_v33  ;;  %v772_v27 = vshrl.u32 %v3465_v25, 16  ;;  %v774_v28 = vshll.u32 %v3465_v25, 16  ;;  %v781_v39 = vrot.slane %v779_v22, 1  ;;  %v786_v40 = vrot.slane %v3465_v25, 1 }
  0x6e   : > { %2523 = vmatprep.subr.bf16.mxu0 %v2806_v53  ;;  %v761_v53 = vrot.slane %v3422_v61, 1  ;;  %v3505_v57 = vsel %vm617_vm15, %v708_v48, %v712_v49  ;;  %v573_v60 = vor.u32 %v571_v55, %v570_v58  ;;  %v616_v0 = vsel %vm3112_vm1, %v570_v58, 0 }
  0x6f   : > { %2588 = vmatpush3.bf16.msra.mxu1 %v2811_v14  ;;  %v776_v34 = vrot.slane %v774_v28, 1  ;;  %v3493_v16 = vsel %vm738_vm12, %v786_v40, %v787_v41  ;;  %v798_v2 = vshll.u32 %v616_v0, 16  ;;  %v806_v3 = vrot.slane %v616_v0, 1 }
  0x70   : > { %2685 = vmatprep.subr.bf16.mxu1 %v3458_v19  ;;  %v3510_v59 = vsel %vm738_vm12, %v760_v52, %v761_v53  ;;  %v3516_v61 = vsel %vm3112_vm1, 0, %v573_v60 }
  0x71   : > { %2524 = vmatpush3.bf16.msra.mxu0 %v2808_v7  ;;  %v777_v46 = vor.u32 %v776_v34, %v772_v27  ;;  %v791_v7 = vshrl.u32 %v3516_v61, 16  ;;  %v793_v10 = vshll.u32 %v3516_v61, 16  ;;  %v805_v11 = vrot.slane %v3516_v61, 1 }
  0x72   : > { %1547 = vmatmul.mubr.bf16.gmra.mxu1 %v3402_v47  ;;  %2653 = vmatprep.subr.bf16.mxu0 %v3458_v19  ;;  %v800_v4 = vrot.slane %v798_v2, 1 }
  0x73   : > { %1554 = vmatprep.mubr.bf16.mxu1 %v3381_v37  ;;  %v3498_v36 = vsel %vm617_vm15, %v777_v46, %v781_v39  ;;  %v795_v38 = vrot.slane %v793_v10, 1  ;;  %v3524_v14 = vsel %vm738_vm12, %v805_v11, %v806_v3 }
  0x74   : > { %1450 = vmatmul.mubr.bf16.gmra.mxu0 %v3267_v32 }
  0x75   : > { %1457 = vmatprep.mubr.bf16.mxu0 %v3432_v8  ;;  %v796_v1 = vor.u32 %v795_v38, %v791_v7 }
  0x77   : > { %v801_v17 = vsel %vm617_vm15, %v796_v1, %v800_v4 }
  0x7a   : > { %1555 = vmatmul.mubr.bf16.gmra.mxu1 %v3447_v12 }
  0x7b   : > { %1562 = vmatprep.mubr.bf16.mxu1 %v3436_v9 }
  0x7c   : > { %1458 = vmatmul.mubr.bf16.gmra.mxu0 %v3320_v63 }
  0x7d   : > { %1465 = vmatprep.mubr.bf16.mxu0 %v3472_v29 }
  0x82   : > { %1563 = vmatmul.mubr.bf16.gmra.mxu1 %v3488_v45 }
  0x83   : > { %1570 = vmatprep.mubr.bf16.mxu1 %v3465_v25 }
  0x84   : > { %1466 = vmatmul.mubr.bf16.gmra.mxu0 %v3381_v37 }
  0x85   : > { %1473 = vmatprep.mubr.bf16.mxu0 %v3505_v57 }
  0x8a   : > { %1571 = vmatmul.mubr.bf16.gmra.mxu1 %v3510_v59 }
  0x8b   : > { %1708 = vmatprep.mubr.bf16.mxu1 %v3242_v20 }
  0x8c   : > { %1474 = vmatmul.mubr.bf16.gmra.mxu0 %v3436_v9 }
  0x8d   : > { %1611 = vmatprep.mubr.bf16.mxu0 %v3223_v6  ;;  %v2817_v6 = vld [vmem:[%s3892_s2 + $0x210] sm:$0xff]  }
  0x92   : > { %1709 = vmatmul.mubr.bf16.vlgmr.msra.gmra.mxu1 %v3170_v43  ;;  %v2815_v43 = vld [vmem:[%s3892_s2 + $0x220] sm:$0xff]  }
  0x93   : > { %1716 = vmatprep.mubr.bf16.mxu1 %v3316_v62  ;;  %2693 = vmatpush3.bf16.msra.mxu1 %v3458_v19 }
  0x94   : > { %2686 = vmatprep.subr.bf16.mxu1 %v2813_v15  ;;  %1612 = vmatmul.mubr.bf16.vlgmr.msra.gmra.mxu0 %v3198_v56  ;;  %v2816_v56 = vld [vmem:[%s3892_s2 + $0x218] sm:$0xff]  }
  0x95   : > { %2654 = vmatpush3.bf16.msra.mxu0 %v3458_v19  ;;  %1619 = vmatprep.mubr.bf16.mxu0 %v3282_v23 }
  0x96   : > { %2655 = vmatprep.subr.bf16.mxu0 %v2813_v15 }
  0x97   : > { %2694 = vmatpush3.bf16.msra.mxu1 %v2813_v15 }
  0x98   : > { %2687 = vmatprep.subr.bf16.mxu1 %v2814_v18 }
  0x99   : > { %2656 = vmatpush3.bf16.msra.mxu0 %v2813_v15 }
  0x9a   : > { %1717 = vmatmul.mubr.bf16.gmra.mxu1 %v3253_v26  ;;  %2657 = vmatprep.subr.bf16.mxu0 %v2814_v18  ;;  %v2819_v26 = vld [vmem:[%s3892_s2 + $0x200] sm:$0xff]  }
  0x9b   : > { %1724 = vmatprep.mubr.bf16.mxu1 %v3377_v35  ;;  %2695 = vmatpush3.bf16.msra.mxu1 %v2814_v18 }
  0x9c   : > { %2688 = vmatprep.subr.bf16.mxu1 %v2815_v43  ;;  %1620 = vmatmul.mubr.bf16.gmra.mxu0 %v3242_v20  ;;  %v2818_v20 = vld [vmem:[%s3892_s2 + $0x208] sm:$0xff]  }
  0x9d   : > { %1627 = vmatprep.mubr.bf16.mxu0 %v3346_v13  ;;  %2658 = vmatpush3.bf16.msra.mxu0 %v2814_v18 }
  0x9e   : > { %2659 = vmatprep.subr.bf16.mxu0 %v2815_v43 }
  0x9f   : > { %2696 = vmatpush3.bf16.msra.mxu1 %v2815_v43 }
  0xa0   : > { %2689 = vmatprep.subr.bf16.mxu1 %v2816_v56 }
  0xa1   : > { %2660 = vmatpush3.bf16.msra.mxu0 %v2815_v43 }
  0xa2   : > { %1725 = vmatmul.mubr.bf16.gmra.mxu1 %v3267_v32  ;;  %2661 = vmatprep.subr.bf16.mxu0 %v2816_v56 }
  0xa3   : > { %1732 = vmatprep.mubr.bf16.mxu1 %v3432_v8  ;;  %2697 = vmatpush3.bf16.msra.mxu1 %v2816_v56 }
  0xa4   : > { %2690 = vmatprep.subr.bf16.mxu1 %v2817_v6  ;;  %1628 = vmatmul.mubr.bf16.gmra.mxu0 %v3316_v62 }
  0xa5   : > { %1635 = vmatprep.mubr.bf16.mxu0 %v3402_v47  ;;  %2662 = vmatpush3.bf16.msra.mxu0 %v2816_v56 }
  0xa6   : > { %2663 = vmatprep.subr.bf16.mxu0 %v2817_v6 }
  0xa7   : > { %2698 = vmatpush3.bf16.msra.mxu1 %v2817_v6 }
  0xa8   : > { %2691 = vmatprep.subr.bf16.mxu1 %v2818_v20 }
  0xa9   : > { %2664 = vmatpush3.bf16.msra.mxu0 %v2817_v6 }
  0xaa   : > { %1733 = vmatmul.mubr.bf16.gmra.mxu1 %v3320_v63  ;;  %2665 = vmatprep.subr.bf16.mxu0 %v2818_v20 }
  0xab   : > { %1740 = vmatprep.mubr.bf16.mxu1 %v3472_v29  ;;  %2699 = vmatpush3.bf16.msra.mxu1 %v2818_v20 }
  0xac   : > { %2692 = vmatprep.subr.bf16.mxu1 %v2819_v26  ;;  %1636 = vmatmul.mubr.bf16.gmra.mxu0 %v3377_v35 }
  0xad   : > { %1643 = vmatprep.mubr.bf16.mxu0 %v3447_v12  ;;  %2666 = vmatpush3.bf16.msra.mxu0 %v2818_v20 }
  0xae   : > { %2667 = vmatprep.subr.bf16.mxu0 %v2819_v26 }
  0xaf   : > { %2700 = vmatpush3.bf16.msra.mxu1 %v2819_v26 }
  0xb1   : > { %2668 = vmatpush3.bf16.msra.mxu0 %v2819_v26 }
  0xb2   : > { %1741 = vmatmul.mubr.bf16.gmra.mxu1 %v3381_v37 }
  0xb3   : > { %1748 = vmatprep.mubr.bf16.mxu1 %v3505_v57 }
  0xb4   : > { %1644 = vmatmul.mubr.bf16.gmra.mxu0 %v3432_v8 }
  0xb5   : > { %1651 = vmatprep.mubr.bf16.mxu0 %v3488_v45 }
  0xba   : > { %1749 = vmatmul.mubr.bf16.gmra.mxu1 %v3436_v9 }
  0xbb   : > { %1756 = vmatprep.mubr.bf16.mxu1 %v3498_v36 }
  0xbc   : > { %1652 = vmatmul.mubr.bf16.gmra.mxu0 %v3472_v29 }
  0xbd   : > { %1659 = vmatprep.mubr.bf16.mxu0 %v3510_v59 }
  0xc2   : > { %1757 = vmatmul.mubr.bf16.gmra.mxu1 %v3465_v25 }
  0xc3   : > { %1764 = vmatprep.mubr.bf16.mxu1 %v801_v17 }
  0xc4   : > { %1660 = vmatmul.mubr.bf16.gmra.mxu0 %v3505_v57 }
  0xc5   : > { %1667 = vmatprep.mubr.bf16.mxu0 %v3493_v16 }
  0xca   : > { %1765 = vmatmul.mubr.bf16.gmra.mxu1 %v3516_v61 }
  0xcb   : > { %2677 = vmatprep.mubr.bf16.mxu1 %v3488_v45 }
  0xcc   : > { %1668 = vmatmul.mubr.bf16.gmra.mxu0 %v3498_v36 }
  0xcd   : > { %2669 = vmatprep.mubr.bf16.mxu0 %v3282_v23 }
  0xd2   : > { %2678 = vmatmul.mubr.bf16.vlgmr.msra.gmra.mxu1 %v3510_v59 }
  0xd3   : > { %2681 = vmatprep.mubr.bf16.mxu1 %v3493_v16 }
  0xd4   : > { %2670 = vmatmul.mubr.bf16.vlgmr.msra.gmra.mxu0 %v3346_v13 }
  0xd5   : > { %2673 = vmatprep.mubr.bf16.mxu0 %v3402_v47 }
  0xda   : > { %2682 = vmatmul.mubr.bf16.gmra.mxu1 %v3524_v14 }
  0xdc   : > { %2674 = vmatmul.mubr.bf16.gmra.mxu0 %v3447_v12 }
 0x112   : > { %v2461_v32 = vpop.f32.mrf.mxu1 }
 0x114   : > { %v2462_v62 = vpop.f32.mrf.mxu1  ;;  %v2397_v35 = vpop.f32.mrf.mxu0 }
 0x115   : > { %v2463_v63 = vadd.f32 %v2462_v62, %v2461_v32 }
 0x116   : > { %v2464_v37 = vpop.f32.mrf.mxu1  ;;  %v2398_v8 = vpop.f32.mrf.mxu0 }
 0x117   : > { %v2399_v23 = vadd.f32 %v2398_v8, %v2397_v35 }
 0x118   : > { %v2465_v9 = vpop.f32.mrf.mxu1  ;;  %v2400_v21 = vpop.f32.mrf.mxu0 }
 0x119   : > { %v2466_v19 = vadd.f32 %v2465_v9, %v2464_v37  ;;  %v3589_v24 = vadd.f32 %v2463_v63, %v2399_v23 }
 0x11a   : > { %v2467_v22 = vpop.f32.mrf.mxu1  ;;  %v2401_v13 = vpop.f32.mrf.mxu0 }
 0x11b   : > { %v2402_v47 = vadd.f32 %v2401_v13, %v2400_v21 }
 0x11c   : > { %v2468_v25 = vpop.f32.mrf.mxu1  ;;  %v2403_v28 = vpop.f32.mrf.mxu0 }
 0x11d   : > { %v2469_v27 = vadd.f32 %v2468_v25, %v2467_v22  ;;  %v3591_v12 = vadd.f32 %v2466_v19, %v2402_v47 }
 0x11e   : > { %v2470_v29 = vpop.f32.mrf.mxu1  ;;  %v2404_v30 = vpop.f32.mrf.mxu0 }
 0x11f   : > { %v2405_v33 = vadd.f32 %v2404_v30, %v2403_v28 }
 0x120   : > { %v2471_v31 = vpop.f32.mrf.mxu1  ;;  %v2406_v39 = vpop.f32.mrf.mxu0 }
 0x121   : > { %v2472_v34 = vadd.f32 %v2471_v31, %v2470_v29  ;;  %v3593_v41 = vadd.f32 %v2469_v27, %v2405_v33 }
 0x122   : > { %v2473_v40 = vpop.f32.mrf.mxu1  ;;  %v2407_v42 = vpop.f32.mrf.mxu0 }
 0x123   : > { %v2408_v46 = vadd.f32 %v2407_v42, %v2406_v39 }
 0x124   : > { %v2474_v45 = vpop.f32.mrf.mxu1  ;;  %v2409_v44 = vpop.f32.mrf.mxu0 }
 0x125   : > { %v2475_v5 = vadd.f32 %v2474_v45, %v2473_v40  ;;  %v3595_v49 = vadd.f32 %v2472_v34, %v2408_v46 }
 0x126   : > { %v2476_v48 = vpop.f32.mrf.mxu1  ;;  %v2410_v16 = vpop.f32.mrf.mxu0 }
 0x127   : > { %v2411_v36 = vadd.f32 %v2410_v16, %v2409_v44 }
 0x128   : > { %v2477_v50 = vpop.f32.mrf.mxu1  ;;  %v2412_v52 = vpop.f32.mrf.mxu0 }
 0x129   : > { %v2478_v51 = vadd.f32 %v2477_v50, %v2476_v48  ;;  %v3597_v54 = vadd.f32 %v2475_v5, %v2411_v36 }
 0x12a   : > { %v2479_v53 = vpop.f32.mrf.mxu1  ;;  %v2413_v55 = vpop.f32.mrf.mxu0 }
 0x12b   : > { %v2414_v58 = vadd.f32 %v2413_v55, %v2412_v52 }
 0x12c   : > { %v2480_v57 = vpop.f32.mrf.mxu1  ;;  %v2415_v60 = vpop.f32.mrf.mxu0 }
 0x12d   : > { %v2481_v59 = vadd.f32 %v2480_v57, %v2479_v53  ;;  %v3599_v2 = vadd.f32 %v2478_v51, %v2414_v58 }
 0x12e   : > { %v2482_v0 = vpop.f32.mrf.mxu1  ;;  %v2416_v3 = vpop.f32.mrf.mxu0 }
 0x12f   : > { %v2417_v7 = vadd.f32 %v2416_v3, %v2415_v60 }
 0x130   : > { %v2483_v61 = vpop.f32.mrf.mxu1  ;;  %v2418_v11 = vpop.f32.mrf.mxu0 }
 0x131   : > { %v2484_v10 = vadd.f32 %v2483_v61, %v2482_v0  ;;  %v3601_v4 = vadd.f32 %v2481_v59, %v2417_v7 }
 0x132   : > { %v2485_v38 = vpop.f32.mrf.mxu1  ;;  %v2419_v14 = vpop.f32.mrf.mxu0 }
 0x133   : > { %v2420_v15 = vadd.f32 %v2419_v14, %v2418_v11 }
 0x134   : > { %v2486_v1 = vpop.f32.mrf.mxu1  ;;  %v2421_v18 = vpop.f32.mrf.mxu0 }
 0x135   : > { %v2487_v17 = vadd.f32 %v2486_v1, %v2485_v38  ;;  %v3603_v56 = vadd.f32 %v2484_v10, %v2420_v15 }
 0x136   : > { %v2488_v43 = vpop.f32.mrf.mxu1  ;;  %v2422_v6 = vpop.f32.mrf.mxu0 }
 0x137   : > { %v2423_v26 = vadd.f32 %v2422_v6, %v2421_v18 }
 0x138   : > { %v2489_v20 = vpop.f32.mrf.mxu1  ;;  %v2424_v62 = vpop.f32.mrf.mxu0 }
 0x139   : > { %v2490_v32 = vadd.f32 %v2489_v20, %v2488_v43  ;;  %v3605_v35 = vadd.f32 %v2487_v17, %v2423_v26 }
 0x13a   : > { %v2491_v63 = vpop.f32.mrf.mxu1  ;;  %v2425_v37 = vpop.f32.mrf.mxu0 }
 0x13b   : > { %v2426_v9 = vadd.f32 %v2425_v37, %v2424_v62 }
 0x13c   : > { %v2492_v8 = vpop.f32.mrf.mxu1  ;;  %v2427_v19 = vpop.f32.mrf.mxu0 }
 0x13d   : > { %v2493_v23 = vadd.f32 %v2492_v8, %v2491_v63  ;;  %v3607_v22 = vadd.f32 %v2490_v32, %v2426_v9 }
 0x13e   : > { %v2494_v21 = vpop.f32.mrf.mxu1  ;;  %v2428_v13 = vpop.f32.mrf.mxu0 }
 0x13f   : > { %v2429_v47 = vadd.f32 %v2428_v13, %v2427_v19 }
 0x140   : > { %v2495_v25 = vpop.f32.mrf.mxu1  ;;  %v2430_v28 = vpop.f32.mrf.mxu0 }
 0x141   : > { %v2496_v27 = vadd.f32 %v2495_v25, %v2494_v21  ;;  %v3609_v30 = vadd.f32 %v2493_v23, %v2429_v47 }
 0x142   : > { %v2497_v29 = vpop.f32.mrf.mxu1  ;;  %v2431_v31 = vpop.f32.mrf.mxu0 }
 0x143   : > { %3917 = vst [vmem:[#allocation8_spill] sm:$0xff] %v3609_v30  ;;  %v2432_v34 = vadd.f32 %v2431_v31, %v2430_v28 }
 0x144   : > { %v2498_v33 = vpop.f32.mrf.mxu1  ;;  %v2433_v40 = vpop.f32.mrf.mxu0 }
 0x145   : > { %v2499_v39 = vadd.f32 %v2498_v33, %v2497_v29  ;;  %v3611_v45 = vadd.f32 %v2496_v27, %v2432_v34 }
 0x146   : > { %v2500_v42 = vpop.f32.mrf.mxu1  ;;  %v2434_v46 = vpop.f32.mrf.mxu0 }
 0x147   : > { %3918 = vst [vmem:[#allocation9_spill] sm:$0xff] %v3611_v45  ;;  %v2435_v44 = vadd.f32 %v2434_v46, %v2433_v40 }
 0x148   : > { %v2501_v5 = vpop.f32.mrf.mxu1  ;;  %v2436_v16 = vpop.f32.mrf.mxu0 }
 0x149   : > { %v2502_v48 = vadd.f32 %v2501_v5, %v2500_v42  ;;  %v3613_v36 = vadd.f32 %v2499_v39, %v2435_v44 }
 0x14a   : > { %v2503_v50 = vpop.f32.mrf.mxu1  ;;  %v2437_v51 = vpop.f32.mrf.mxu0 }
 0x14b   : > { %3919 = vst [vmem:[#allocation10_spill] sm:$0xff] %v3613_v36  ;;  %v2438_v53 = vadd.f32 %v2437_v51, %v2436_v16 }
 0x14c   : > { %v2504_v52 = vpop.f32.mrf.mxu1  ;;  %v2439_v57 = vpop.f32.mrf.mxu0 }
 0x14d   : > { %v2505_v55 = vadd.f32 %v2504_v52, %v2503_v50  ;;  %v3615_v59 = vadd.f32 %v2502_v48, %v2438_v53 }
 0x14e   : > { %v2506_v58 = vpop.f32.mrf.mxu1  ;;  %v2440_v60 = vpop.f32.mrf.mxu0 }
 0x14f   : > { %3920 = vst [vmem:[#allocation11_spill] sm:$0xff] %v3615_v59  ;;  %v2441_v3 = vadd.f32 %v2440_v60, %v2439_v57 }
 0x150   : > { %v2507_v0 = vpop.f32.mrf.mxu1  ;;  %v2442_v7 = vpop.f32.mrf.mxu0 }
 0x151   : > { %v2508_v61 = vadd.f32 %v2507_v0, %v2506_v58  ;;  %v3619_v11 = vadd.f32 %v2505_v55, %v2441_v3 }
 0x152   : > { %v3617_v10 = vpop.f32.mrf.mxu1  ;;  %v2443_v38 = vpop.f32.mrf.mxu0 }
 0x153   : > { %3921 = vst [vmem:[#allocation12_spill] sm:$0xff] %v3619_v11  ;;  %v2444_v1 = vadd.f32 %v2443_v38, %v2442_v7 }
 0x154   : > { %v3621_v14 = vpop.f32.mrf.mxu1  ;;  %v2525_v15 = vpop.f32.mrf.mxu0 }
 0x155   : > { %v3625_v18 = vadd.f32 %v2508_v61, %v2444_v1 }
 0x156   : > { %v3623_v17 = vpop.f32.mrf.mxu1  ;;  %v2526_v43 = vpop.f32.mrf.mxu0 }
 0x157   : > { %3922 = vst [vmem:[#allocation13_spill] sm:$0xff] %v3625_v18  ;;  %v2527_v20 = vadd.f32 %v2526_v43, %v2525_v15 }
 0x158   : > { %v3627_v6 = vpop.f32.mrf.mxu1  ;;  %v2528_v26 = vpop.f32.mrf.mxu0 }
 0x159   : > { %v3632_v62 = vadd.f32 %v2527_v20, %v3589_v24 }
 0x15a   : > { %v3629_v32 = vpop.f32.mrf.mxu1  ;;  %v2529_v63 = vpop.f32.mrf.mxu0 }
 0x15c   : > { %v3634_v37 = vpop.f32.mrf.mxu1  ;;  %v2531_v8 = vpop.f32.mrf.mxu0 }
 0x15e   : > { %v3636_v9 = vpop.f32.mrf.mxu1  ;;  %v2532_v23 = vpop.f32.mrf.mxu0 }
 0x160   : > { %v3638_v19 = vpop.f32.mrf.mxu1  ;;  %v2534_v21 = vpop.f32.mrf.mxu0 }
 0x162   : > { %v3640_v13 = vpop.f32.mrf.mxu1  ;;  %v2535_v25 = vpop.f32.mrf.mxu0 }
 0x164   : > { %v3642_v47 = vpop.f32.mrf.mxu1  ;;  %v2537_v27 = vpop.f32.mrf.mxu0 }
 0x166   : > { %v3644_v28 = vpop.f32.mrf.mxu1  ;;  %v2538_v24 = vpop.f32.mrf.mxu0 }
 0x168   : > { %v3646_v29 = vpop.f32.mrf.mxu1  ;;  %v2540_v31 = vpop.f32.mrf.mxu0 }
 0x16a   : > { %v3648_v33 = vpop.f32.mrf.mxu1  ;;  %v2541_v34 = vpop.f32.mrf.mxu0 }
 0x16c   : > { %v3650_v39 = vpop.f32.mrf.mxu1  ;;  %v2543_v40 = vpop.f32.mrf.mxu0 }
 0x16e   : > { %v3652_v42 = vpop.f32.mrf.mxu1  ;;  %v2544_v46 = vpop.f32.mrf.mxu0 }
 0x170   : > { %v3654_v5 = vpop.f32.mrf.mxu1  ;;  %v2546_v44 = vpop.f32.mrf.mxu0 }
 0x172   : > { %v3656_v48 = vpop.f32.mrf.mxu1  ;;  %v2547_v16 = vpop.f32.mrf.mxu0 }
 0x174   : > { %v3658_v50 = vpop.f32.mrf.mxu1  ;;  %v3660_v51 = vpop.f32.mrf.mxu0 }
 0x176   : > { %v3662_v52 = vpop.f32.mrf.mxu1  ;;  %v2550_v53 = vpop.f32.mrf.mxu0 }
 0x178   : > { %v3664_v55 = vpop.f32.mrf.mxu1  ;;  %v3666_v57 = vpop.f32.mrf.mxu0 }
 0x17a   : > { %v3668_v58 = vpop.f32.mrf.mxu1  ;;  %v3670_v60 = vpop.f32.mrf.mxu0 }
 0x17b   : > { %3923 = vst [vmem:[#allocation14_spill] sm:$0xff] %v3668_v58 }
 0x17c   : > { %v3672_v0 = vpop.f32.mrf.mxu1  ;;  %v3674_v3 = vpop.f32.mrf.mxu0 }
 0x17d   : > { %3924 = vst [vmem:[#allocation15_spill] sm:$0xff] %v3672_v0 }
 0x17e   : > { %v3676_v61 = vpop.f32.mrf.mxu1  ;;  %v3678_v7 = vpop.f32.mrf.mxu0 }
 0x17f   : > { %3925 = vst [vmem:[#allocation16_spill] sm:$0xff] %v3676_v61 }
 0x180   : > { %v3680_v38 = vpop.f32.mrf.mxu1  ;;  %v3682_v1 = vpop.f32.mrf.mxu0 }
 0x181   : > { %3926 = vst [vmem:[#allocation17_spill] sm:$0xff] %v3680_v38 }
 0x182   : > { %v3684_v15 = vpop.f32.mrf.mxu1  ;;  %v3686_v43 = vpop.f32.mrf.mxu0 }
 0x183   : > { %3927 = vst [vmem:[#allocation18_spill] sm:$0xff] %v3684_v15 }
 0x184   : > { %v3688_v20 = vpop.f32.mrf.mxu1  ;;  %v3690_v18 = vpop.f32.mrf.mxu0 }
 0x185   : > { %3928 = vst [vmem:[#allocation19_spill] sm:$0xff] %v3688_v20  ;;  %3929 = vst [vmem:[#allocation20_spill] sm:$0xff] %v3690_v18 }
 0x186   : > { %v3692_v11 = vpop.f32.mrf.mxu1  ;;  %v3694_v59 = vpop.f32.mrf.mxu0 }
 0x187   : > { %3930 = vst [vmem:[#allocation21_spill] sm:$0xff] %v3692_v11  ;;  %3931 = vst [vmem:[#allocation22_spill] sm:$0xff] %v3694_v59  ;;  %v2530_v59 = vadd.f32 %v2529_v63, %v2528_v26  ;;  %v2597_v26 = vadd.f32 %v3634_v37, %v3629_v32  ;;  %v2542_v63 = vadd.f32 %v2541_v34, %v2540_v31 }
 0x188   : > { %v3696_v36 = vpop.f32.mrf.mxu1  ;;  %v3698_v61 = vpop.f32.mrf.mxu0  ;;  %v2612_v31 = vadd.f32 %v3654_v5, %v3652_v42  ;;  %v2557_v42 = vadd.f32 %v3678_v7, %v3674_v3 }
 0x189   : > { %3932 = vst [vmem:[#allocation23_spill] sm:$0xff] %v3696_v36  ;;  %3933 = vst [vmem:[#allocation24_spill] sm:$0xff] %v3698_v61  ;;  %v2533_v36 = vadd.f32 %v2532_v23, %v2531_v8  ;;  %v1633_v37 = vadd.f32 %v2542_v63, %v3599_v2 }
 0x18a   : > { %v3700_v45 = vpop.f32.mrf.mxu1  ;;  %v3702_v38 = vpop.f32.mrf.mxu0 }
 0x18b   : > { %3934 = vst [vmem:[#allocation25_spill] sm:$0xff] %v3700_v45  ;;  %3935 = vst [vmem:[#allocation26_spill] sm:$0xff] %v3702_v38  ;;  %v2591_v45 = vadd.f32 %v3621_v14, %v3617_v10  ;;  %v2539_v38 = vadd.f32 %v2538_v24, %v2537_v27  ;;  %v2600_v10 = vadd.f32 %v3638_v19, %v3636_v9 }
 0x18c   : > { %v3704_v0 = vpop.f32.mrf.mxu1  ;;  %v3706_v15 = vpop.f32.mrf.mxu0 }
 0x18d   : > { %3936 = vst [vmem:[#allocation27_spill] sm:$0xff] %v3704_v0  ;;  %3937 = vst [vmem:[#allocation28_spill] sm:$0xff] %v3706_v15  ;;  %v2536_v0 = vadd.f32 %v2535_v25, %v2534_v21  ;;  %v1711_v14 = vadd.f32 %v2591_v45, %v3632_v62  ;;  %v2548_v21 = vadd.f32 %v2547_v16, %v2546_v44 }
 0x18e   : > { %v3708_v58 = vpop.f32.mrf.mxu1  ;;  %v3710_v20 = vpop.f32.mrf.mxu0  ;;  %v2551_v25 = vadd.f32 %v2550_v53, %v3660_v51 }
 0x18f   : > { %3938 = vst [vmem:[#allocation29_spill] sm:$0xff] %v3708_v58  ;;  %3939 = vst [vmem:[#allocation30_spill] sm:$0xff] %v3710_v20  ;;  %v1617_v58 = vadd.f32 %v2530_v59, %v3591_v12  ;;  %v2594_v20 = vadd.f32 %v3627_v6, %v3623_v17  ;;  %v1630_v12 = vadd.f32 %v2539_v38, %v3597_v54 }
 0x190   : > { %v3712_v18 = vpop.f32.mrf.mxu1  ;;  %v3714_v11 = vpop.f32.mrf.mxu0  ;;  %v2603_v59 = vadd.f32 %v3642_v47, %v3640_v13  ;;  %v1646_v53 = vadd.f32 %v2551_v25, %v3605_v35  ;;  %v2560_v35 = vadd.f32 %v3686_v43, %v3682_v1  ;;  %v3946_v1 = vld [vmem:[#allocation22_spill] sm:$0xff] }
 0x191   : > { %3940 = vst [vmem:[#allocation31_spill] sm:$0xff] %v3712_v18  ;;  %v1622_v18 = vadd.f32 %v2533_v36, %v3593_v41  ;;  %v2545_v41 = vadd.f32 %v2544_v46, %v2543_v40  ;;  %v1714_v32 = vadd.f32 %v2594_v20, %v1617_v58  ;;  %v2618_v58 = vadd.f32 %v3664_v55, %v3662_v52 }
 0x192   : > { %v3716_v30 = vpop.f32.mrf.mxu0  ;;  %v3718_v61 = vpop.f32.mrf.mxu1  ;;  %v1727_v47 = vadd.f32 %v2603_v59, %v1630_v12 }
 0x193   : > { %3941 = vst [vmem:[#allocation32_spill] sm:$0xff] %v3718_v61  ;;  %v1625_v61 = vadd.f32 %v2536_v0, %v3595_v49  ;;  %v1719_v17 = vadd.f32 %v2597_v26, %v1622_v18  ;;  %v2606_v49 = vadd.f32 %v3646_v29, %v3644_v28  ;;  %v1638_v13 = vadd.f32 %v2545_v41, %v3601_v4  ;;  %v3942_v26 = vld [vmem:[#allocation8_spill] sm:$0xff] }
 0x194   : > { %v2671_v15 = vpop.f32.mrf.mxu0  ;;  %v3728_v23 = vpop.f32.mrf.mxu1  ;;  %v2609_v18 = vadd.f32 %v3650_v39, %v3648_v33  ;;  %v1641_v4 = vadd.f32 %v2548_v21, %v3603_v56  ;;  %v2554_v33 = vadd.f32 %v3670_v60, %v3666_v57  ;;  %v2615_v56 = vadd.f32 %v3658_v50, %v3656_v48  ;;  %v3949_v21 = vld [vmem:[#allocation17_spill] sm:$0xff] }
 0x195   : > { %v3744_v62 = vadd.f32 %v2671_v15, %v1719_v17  ;;  %v1722_v54 = vadd.f32 %v2600_v10, %v1625_v61  ;;  %v1730_v40 = vadd.f32 %v2606_v49, %v1633_v37  ;;  %v1654_v63 = vadd.f32 %v2557_v42, %v3942_v26  ;;  %v3948_v49 = vld [vmem:[#allocation16_spill] sm:$0xff] }
 0x196   : > { %v1807_v8 = vpop.f32.mrf.mxu0  ;;  %v3742_v9 = vpop.f32.mrf.mxu1  ;;  %v1735_v5 = vadd.f32 %v2609_v18, %v1638_v13  ;;  %v1649_v38 = vadd.f32 %v2554_v33, %v3607_v22  ;;  %v1738_v3 = vadd.f32 %v2612_v31, %v1641_v4  ;;  %v3944_v22 = vld [vmem:[#allocation15_spill] sm:$0xff]  ;;  %v1743_v12 = vadd.f32 %v2615_v56, %v1646_v53  ;;  %v3951_v13 = vld [vmem:[#allocation26_spill] sm:$0xff]  ;;  %v3961_v26 = vld [vmem:[#allocation12_spill] sm:$0xff] }
 0x197   : > { %v3737_v6 = vadd.f32 %v1807_v8, %v1711_v14  ;;  %v1893_v46 = vmul.f32 %v3744_v62, %v3744_v62  ;;  %v3943_v8 = vld [vmem:[#allocation14_spill] sm:$0xff]  ;;  %v3945_v14 = vld [vmem:[#allocation20_spill] sm:$0xff] }
 0x198   : > { %v2672_v36 = vpop.f32.mrf.mxu0  ;;  %v1842_v34 = vpop.f32.mrf.mxu1  ;;  %v2621_v10 = vadd.f32 %v3944_v22, %v3943_v8  ;;  %v2563_v43 = vadd.f32 %v3946_v1, %v3945_v14  ;;  %v1746_v25 = vadd.f32 %v2618_v58, %v1649_v38  ;;  %v3952_v4 = vld [vmem:[#allocation10_spill] sm:$0xff]  ;;  %v2572_v38 = vadd.f32 %v3716_v30, %v3714_v11  ;;  %v3962_v8 = vld [vmem:[#allocation25_spill] sm:$0xff]  ;;  %v3963_v22 = vld [vmem:[#allocation27_spill] sm:$0xff] }
 0x199   : > { %v1891_v27 = vmul.f32 %v3737_v6, %v3737_v6  ;;  %v3754_v28 = vadd.f32 %v2672_v36, %v1722_v54  ;;  %v3950_v54 = vld [vmem:[#allocation24_spill] sm:$0xff]  ;;  %v3953_v33 = vld [vmem:[#allocation18_spill] sm:$0xff] }
 0x19a   : > { %v1810_v45 = vpop.f32.mrf.mxu0  ;;  %v2683_v50 = vpop.f32.mrf.mxu1  ;;  %v2566_v18 = vadd.f32 %v3951_v13, %v3950_v54  ;;  %v1662_v31 = vadd.f32 %v2563_v43, %v3952_v4  ;;  %v1751_v53 = vadd.f32 %v2621_v10, %v1654_v63  ;;  %v3816_v56 = vadd.f32 %v1842_v34, %v1746_v25 }
 0x19b   : > { %v3746_v19 = vadd.f32 %v1810_v45, %v1714_v32  ;;  %v1894_v60 = vmul.f32 %v3754_v28, %v3754_v28  ;;  %v3947_v32 = vld [vmem:[#allocation9_spill] sm:$0xff]  ;;  %v2624_v45 = vadd.f32 %v3949_v21, %v3948_v49  ;;  %v2633_v10 = vadd.f32 %v3963_v22, %v3962_v8 }
 0x19c   : > { %v2675_v2 = vpop.f32.mrf.mxu0  ;;  %v1657_v37 = vadd.f32 %v2560_v35, %v3947_v32  ;;  %v1900_v30 = vmul.f32 %v3816_v56, %v3816_v56 }
 0x19d   : > { %v1870_v24 = vadd.f32 %v3746_v19, %v3737_v6  ;;  %v1892_v29 = vmul.f32 %v3746_v19, %v3746_v19  ;;  %v3783_v48 = vadd.f32 %v2675_v2, %v1735_v5  ;;  %v1855_v2 = vpop.f32.mrf.mxu1 }
 0x19e   : > { %v1823_v39 = vpop.f32.mrf.mxu0  ;;  %v1754_v35 = vadd.f32 %v2624_v45, %v1657_v37 }
 0x19f   : > { %v1871_v44 = vadd.f32 %v1870_v24, %v3744_v62  ;;  %v1907_v16 = vadd.f32 %v1892_v29, %v1891_v27  ;;  %v3768_v51 = vadd.f32 %v1823_v39, %v1727_v47  ;;  %v3806_v47 = vadd.f32 %v3728_v23, %v1743_v12  ;;  %v3954_v39 = vld [vmem:[#allocation19_spill] sm:$0xff]  ;;  %v3964_v12 = vld [vmem:[#allocation13_spill] sm:$0xff] }
 0x1a0   : > { %v2676_v57 = vpop.f32.mrf.mxu0  ;;  %v1897_v27 = vmul.f32 %v3783_v48, %v3783_v48  ;;  %v3836_v1 = vadd.f32 %v3742_v9, %v1754_v35 }
 0x1a1   : > { %v1908_v0 = vadd.f32 %v1907_v16, %v1893_v46  ;;  %v1872_v61 = vadd.f32 %v1871_v44, %v3754_v28  ;;  %v1895_v52 = vmul.f32 %v3768_v51, %v3768_v51  ;;  %v3795_v41 = vadd.f32 %v2676_v57, %v1738_v3  ;;  %v3955_v46 = vld [vmem:[#allocation28_spill] sm:$0xff]  ;;  %v3956_v44 = vld [vmem:[#allocation30_spill] sm:$0xff]  ;;  %v3957_v57 = vld [vmem:[#allocation11_spill] sm:$0xff]  ;;  %v2684_v3 = vpop.f32.mrf.mxu1 }
 0x1a2   : > { %v1826_v7 = vpop.f32.mrf.mxu0  ;;  %v2569_v16 = vadd.f32 %v3956_v44, %v3955_v46  ;;  %v1665_v58 = vadd.f32 %v2566_v18, %v3957_v57  ;;  %v1899_v34 = vmul.f32 %v3806_v47, %v3806_v47  ;;  %v1902_v18 = vmul.f32 %v3836_v1, %v3836_v1 }
 0x1a3   : > { %v1873_v15 = vadd.f32 %v1872_v61, %v3768_v51  ;;  %v1909_v55 = vadd.f32 %v1908_v0, %v1894_v60  ;;  %v3788_v20 = vadd.f32 %v1826_v7, %v1730_v40  ;;  %v2627_v40 = vadd.f32 %v3954_v39, %v3953_v33  ;;  %v3958_v60 = vld [vmem:[#allocation21_spill] sm:$0xff]  ;;  %v3959_v0 = vld [vmem:[#allocation23_spill] sm:$0xff]  ;;  %v3960_v7 = vld [vmem:[#allocation32_spill] sm:$0xff]  ;;  %v1858_v49 = vpop.f32.mrf.mxu1 }
 0x1a4   : > { %v1898_v23 = vmul.f32 %v3795_v41, %v3795_v41  ;;  %v2630_v61 = vadd.f32 %v3959_v0, %v3958_v60  ;;  %v1670_v63 = vadd.f32 %v2569_v16, %v3961_v26 }
 0x1a5   : > { %v1910_v59 = vadd.f32 %v1909_v55, %v1895_v52  ;;  %v1874_v36 = vadd.f32 %v1873_v15, %v3788_v20  ;;  %v1896_v17 = vmul.f32 %v3788_v20, %v3788_v20  ;;  %v3827_v15 = vadd.f32 %v3960_v7, %v1751_v53 }
 0x1a6   : > { %v1759_v14 = vadd.f32 %v2627_v40, %v1662_v31  ;;  %v1762_v37 = vadd.f32 %v2630_v61, %v1665_v58  ;;  %v1767_v13 = vadd.f32 %v2633_v10, %v1670_v63 }
 0x1a7   : > { %v1875_v24 = vadd.f32 %v1874_v36, %v3783_v48  ;;  %v1911_v29 = vadd.f32 %v1910_v59, %v1896_v17  ;;  %v1673_v59 = vadd.f32 %v2572_v38, %v3964_v12  ;;  %v3965_v36 = vld [vmem:[#allocation29_spill] sm:$0xff]  ;;  %v3966_v17 = vld [vmem:[#allocation31_spill] sm:$0xff]  ;;  %v1901_v21 = vmul.f32 %v3827_v15, %v3827_v15 }
 0x1a8   : > { %v2636_v32 = vadd.f32 %v3966_v17, %v3965_v36  ;;  %v1856_v45 = vadd.f32 %v1855_v2, %v1759_v14  ;;  %v1859_v25 = vadd.f32 %v1858_v49, %v1762_v37  ;;  %v1864_v4 = vadd.f32 %v2683_v50, %v1767_v13 }
 0x1a9   : > { %v1876_v42 = vadd.f32 %v1875_v24, %v3795_v41  ;;  %v1912_v5 = vadd.f32 %v1911_v29, %v1897_v27 }
 0x1aa   : > { %v1770_v29 = vadd.f32 %v2636_v32, %v1673_v59  ;;  %v1903_v31 = vmul.f32 %v1856_v45, %v1856_v45  ;;  %v1904_v44 = vmul.f32 %v1859_v25, %v1859_v25  ;;  %v1905_v16 = vmul.f32 %v1864_v4, %v1864_v4 }
 0x1ab   : > { %v1877_v52 = vadd.f32 %v1876_v42, %v3806_v47  ;;  %v1913_v55 = vadd.f32 %v1912_v5, %v1898_v23 }
 0x1ac   : > { %v1867_v40 = vadd.f32 %v2684_v3, %v1770_v29 }
 0x1ad   : > { %v1914_v11 = vadd.f32 %v1913_v55, %v1899_v34  ;;  %v1878_v43 = vadd.f32 %v1877_v52, %v3816_v56 }
 0x1ae   : > { %v1906_v42 = vmul.f32 %v1867_v40, %v1867_v40 }
 0x1af   : > { %v1879_v9 = vadd.f32 %v1878_v43, %v3827_v15  ;;  %v1915_v54 = vadd.f32 %v1914_v11, %v1900_v30 }
 0x1b1   : > { %v1880_v27 = vadd.f32 %v1879_v9, %v3836_v1  ;;  %v1916_v24 = vadd.f32 %v1915_v54, %v1901_v21 }
 0x1b3   : > { %v1881_v33 = vadd.f32 %v1880_v27, %v1856_v45  ;;  %v1917_v39 = vadd.f32 %v1916_v24, %v1902_v18 }
 0x1b5   : > { %v1882_v46 = vadd.f32 %v1881_v33, %v1859_v25  ;;  %v1918_v2 = vadd.f32 %v1917_v39, %v1903_v31 }
 0x1b7   : > { %v1883_v53 = vadd.f32 %v1882_v46, %v1864_v4  ;;  %v1919_v23 = vadd.f32 %v1918_v2, %v1904_v44 }
 0x1b9   : > { %v1884_v5 = vadd.f32 %v1883_v53, %v1867_v40  ;;  %v1920_v57 = vadd.f32 %v1919_v23, %v1905_v16 }
 0x1bb   : > { %v1885_v58 = vrot.slane %v1884_v5, 4  ;;  %v1921_v60 = vadd.f32 %v1920_v57, %v1906_v42 }
 0x1bd   : > { %v1886_v0 = vadd.f32 %v1885_v58, %v1884_v5  ;;  %v1922_v61 = vrot.slane %v1921_v60, 4 }
 0x1bf   : > { %v1887_v38 = vrot.slane %v1886_v0, 2  ;;  %v1923_v35 = vadd.f32 %v1922_v61, %v1921_v60 }
 0x1c1   : > { %v1888_v50 = vadd.f32 %v1887_v38, %v1886_v0  ;;  %v1924_v7 = vrot.slane %v1923_v35, 2 }
 0x1c3   : > { %v1889_v34 = vrot.slane %v1888_v50, 1  ;;  %v1925_v52 = vadd.f32 %v1924_v7, %v1923_v35  ;;  %1931 = sbr.rel (%p2296_p11) target bundleno = 458 (0x1ca), region = 116 }
 0x1c5   : > { %v1890_v3 = vadd.f32 %v1889_v34, %v1888_v50  ;;  %v1926_v55 = vrot.slane %v1925_v52, 1 }
 0x1c7   : > { %v1927_v26 = vadd.f32 %v1926_v55, %v1925_v52 }
 0x1c8   : > { %v2868_v63 = vmov 0.0  }
 0x1c9   : > { %1932 = vst [vmem:[%s2934_s30] sm:$0x3] %v2868_v63 }
 0x1ca PF: > { %v1935_v22 = vsel %vm594_vm6, %v1890_v3, %v1927_v26  ;;  %v2337_v10 = vpack.c.bf16 %v3746_v19, %v3737_v6  ;;  %v2342_v14 = vpack.c.bf16 %v3754_v28, %v3744_v62  ;;  %v2347_v30 = vpack.c.bf16 %v3788_v20, %v3768_v51 }
 0x1cb   : > { %v2352_v43 = vpack.c.bf16 %v3795_v41, %v3783_v48  ;;  %v2357_v12 = vpack.c.bf16 %v3816_v56, %v3806_v47  ;;  %v2362_v59 = vpack.c.bf16 %v3836_v1, %v3827_v15  ;;  %v2367_v6 = vpack.c.bf16 %v1859_v25, %v1856_v45 }
 0x1cc   : > { %2338 = vst [vmem:[%s2945_s13] sm:$0xff] %v2337_v10   ;;  %2374 = vst [vmem:[%s2945_s13 + $0x8] sm:$0xff] %v2342_v14   ;;  %v2372_v19 = vpack.c.bf16 %v1867_v40, %v1864_v4 }
 0x1cd   : > { %2375 = vst [vmem:[%s2945_s13 + $0x10] sm:$0xff] %v2347_v30   ;;  %2376 = vst [vmem:[%s2945_s13 + $0x18] sm:$0xff] %v2352_v43  }
 0x1ce   : > { %2377 = vst [vmem:[%s2945_s13 + $0x20] sm:$0xff] %v2357_v12   ;;  %2378 = vst [vmem:[%s2945_s13 + $0x28] sm:$0xff] %v2362_v59  }
 0x1cf   : > { %2379 = vst [vmem:[%s2945_s13 + $0x30] sm:$0xff] %v2367_v6   ;;  %2380 = vst [vmem:[%s2945_s13 + $0x38] sm:$0xff] %v2372_v19  }
 0x1d0   : > { %v1933_v8 = vld [vmem:[%s2934_s30] sm:$0x3] }
 0x1d1   : > { %v1936_v11 = vadd.f32 %v1935_v22, %v1933_v8 }
 0x1d3   : > { %1937 = vst [vmem:[%s2934_s30] sm:$0x3] %v1936_v11 }
 0x1d4 PF: > { %s15_s19 = sadd.s32 1, %s2866_s19   ;;  %s3967_s15 = smov %s2858_s17 }
 0x1d5   : > { %p12_p12 = scmp.ge.s32.totalorder %s15_s19, 6   ;;  %s3968_s16 = smov %s2862_s18 }
 0x1d6   : > { %s3969_s17 = smov %s3972_s20  ;;  %s3970_s18 = smov %s3976_s21 }
 0x1d7   :  { %14 = sbr.rel (!%p12_p12) target bundleno = 3 (0x3), region = 181 }
 0x1dc   :  { %2064 = vsyncmov [#allocation3] }
 0x1df   :  { %s2065_s30 = vpop.sfrf %2064 }
 0x1e0   :  { %p2315_p13 = scmp.ne.s32.totalorder %s2065_s30, 0 }
 0x1e2   :  { %2069 = shalt.err (%p2315_p13)  }
 0x1e3   :  { %2071 = vsyncmov [#allocation3 + $0x1] }
 0x1e6   :  { %s2072_s13 = vpop.sfrf %2071 }
 0x1e7   :  { %p2316_p0 = scmp.ne.s32.totalorder %s2072_s13, 0 }
 0x1e9   :  { %2076 = shalt.err (%p2316_p0)  }

// kernel: double_conv.4
= control target key start
LH: loop header
LB: loop body
LE: loop exit
PB: predicated region body
PF: predicated region fallthrough
CT: control target
= control target key end

     0   :  { %s3041_s21 = smov 0   ;;  %s3043_s22 = smov 0   ;;  %s4039_s0 = inlined_call_operand.vmem [shape: bf16[32,16,128], index: 0, kind: input, shape index: {}, may-alias: {0,1}]   ;;  %s4040_s1 = inlined_call_operand.vmem [shape: bf16[2,16,16,128], index: 1, kind: input, shape index: {}, may-alias: {0,1}]   ;;  %s4041_s2 = inlined_call_operand.vmem [shape: f32[1,128], index: 2, kind: input, shape index: {}]   ;;  %s4042_s3 = inlined_call_operand.vmem [shape: f32[1,128], index: 3, kind: input, shape index: {}]   ;;  %s4043_s4 = inlined_call_operand.vmem [shape: bf16[1152,128], index: 4, kind: input, shape index: {}]   ;;  %s4044_s5 = inlined_call_operand.vmem [shape: bf16[2,16,16,128], index: 5, kind: output, shape index: {0}]   ;;  %s4045_s6 = inlined_call_operand.vmem [shape: f32[2,2,128], index: 6, kind: output, shape index: {1}]  }
   0x1   :  { %s3045_s23 = smov 0   ;;  %s3047_s24 = smov 0  }
   0x2   :  { %s3049_s25 = smov 0  }
   0x3 LB: > { %s26_s26 = sadd.s32 1, %s2995_s23  ;;  %s29_s27 = sadd.s32 1, %s2999_s24  ;;  %s3003_s25 = sphi %s3049_s25, %s17_s25   ;;  %s2999_s24 = sphi %s3047_s24, %s4117_s24   ;;  %s2995_s23 = sphi %s3045_s23, %s4116_s23   ;;  %s2991_s22 = sphi %s3043_s22, %s4115_s22   ;;  %s2987_s21 = sphi %s3041_s21, %s4114_s21  }
   0x4   : > { %p27_p0 = scmp.ge.s32.totalorder %s26_s26, 2  ;;  %p2287_p1 = scmp.ge.s32.totalorder %s3003_s25, 1 }
   0x5   : > { %p213_p2 = scmp.lt.s32.totalorder %s3003_s25, 5 }
   0x6   : > { %s4119_s26 = smov (%p27_p0, %s26_s26), 0  ;;  %s4121_s27 = smov (!%p27_p0, %s29_s27), %s2999_s24 }
   0x7   : > { %p214_p3 = pnand %p2287_p1, %p213_p2  ;;  %p31_p4 = scmp.ge.s32.totalorder %s4121_s27, 2 }
   0x9   : > { %s4123_s27 = smov (%p31_p4, %s4121_s27), 0  ;;  %217 = sbr.rel (%p214_p3) target bundleno = 472 (0x1d8), region = 36 }
   0xa   : > { %4046 = sst [smem:[#allocation8_spill]] %s4123_s27 }
   0xe   : > { %s3074_s28 = sshll.u32 %s2987_s21, 3  ;;  %p256_p5 = scmp.lt.s32.totalorder %s2991_s22, 1 }
   0xf   : > { %p258_p6 = scmp.lt.s32.totalorder %s3074_s28, 15  ;;  %s2298_s29 = sshll.u32 %s2991_s22, 4 }
  0x10   : > { %s4125_s22 = smov (!%p256_p5, %s2991_s22), 1  ;;  %s284_s14 = sadd.s32 %s2298_s29, %s3074_s28 }
  0x11   : > { %s259_s30 = scalar_select %p258_p6, %s3074_s28, 15 }
  0x12   : > { %s2290_s7 = sshll.u32 %s4125_s22, 5  ;;  %s2296_s8 = sshll.u32 %s4125_s22, 1 }
  0x13   : > { %s2289_s9 = sshll.u32 %s259_s30, 1  ;;  %s3081_s12 = scalar_lea.vmem %s4045_s6, %s2296_s8 }
  0x14   : > { %s262_s13 = sadd.s32 %s2290_s7, %s2289_s9  ;;  %p2299_p7 = scmp.le.s32.totalorder %s2987_s21, 0 }
  0x15   : > { %s2291_s15 = sshll.u32 %s262_s13, 2  ;;  %s2300_s22 = sadd.s32 (!%p2299_p7), 4294967295, %s284_s14 }
  0x16   : > { %s3087_s18 = scalar_lea.vmem %s4040_s1, %s2291_s15  ;;  %s3092_s27 = scalar_lea.vmem %s4044_s5, %s2291_s15 }
  0x17   : > { %288 = sbr.rel (%p2299_p7) target bundleno = 31 (0x1f), region = 40  ;;  %s2407_s30 = sshll.u32 (!%p2299_p7), %s2300_s22, 3 }
  0x18   : > { %s292_s29 = scalar_lea.vmem (!%p2299_p7), %s4039_s0, %s2407_s30 }
  0x1c   : > { %v326_v0 = vld [vmem:[%s292_s29] sm:$0xff] }
  0x1d   : > { %327 = vst [vmem:[#allocation2] sm:$0xff] %v326_v0 }
  0x1e   : > { %335 = vsyncadd [#allocation3], 128 }
  0x1f PF: > { %p2303_p8 = scmp.ge.s32.totalorder %s2987_s21, 1 }
  0x20   : > { %s2306_s7 = sshll.u32 (!%p2303_p8), %s284_s14, 3 }
  0x21   : > { %339 = sbr.rel (%p2303_p8) target bundleno = 41 (0x29), region = 78  ;;  %s2210_s13 = scalar_lea.vmem (!%p2303_p8), %s4039_s0, %s2306_s7 }
  0x26   : > { %v2307_v1 = vld [vmem:[%s2210_s13 + $0x40] sm:$0xff] }
  0x27   : > { %380 = vst [vmem:[#allocation2 + $0x8] sm:$0xff] %v2307_v1 }
  0x28   : > { %388 = vsyncadd [#allocation3 + $0x1], 128 }
  0x29 PF: > { %p2842_p9 = scmp.gt.s32.totalorder %s2987_s21, 0 }
  0x2b   : > { %2978 = dma.done.wait (%p2842_p9), [#allocation3], 128 }
  0x2c   : > { %2980 = vsyncadd (%p2842_p9), [#allocation3], 4294967168  ;;  %p2843_p10 = scmp.lt.s32.totalorder %s2987_s21, 1 }
  0x2e   : > { %2982 = dma.done.wait (%p2843_p10), [#allocation3 + $0x1], 128 }
  0x2f   : > { %2984 = vsyncadd (%p2843_p10), [#allocation3 + $0x1], 4294967168  ;;  %v2885_v2 = vld [vmem:[%s4043_s4 + $0x78] sm:$0xff]   ;;  %v2889_v6 = vld [vmem:[%s4043_s4 + $0x70] sm:$0xff]   ;;  %s2313_s17 = sadd.s32 4294967295, %s3074_s28  ;;  %vm692_vm4 = vcmask 1040384  }
  0x30   : > { %v2886_v3 = vld [vmem:[%s4043_s4 + $0xf8] sm:$0xff]   ;;  %2518 = vmatprep.subr.bf16.mxu0 %v2885_v2  ;;  %v2890_v7 = vld [vmem:[%s4043_s4 + $0xf0] sm:$0xff]   ;;  %v2893_v10 = vld [vmem:[%s4043_s4 + $0x68] sm:$0xff]   ;;  %v3186_v29 = vstv %s2313_s17  ;;  %vm693_vm5 = vsmask.f32 256  ;;  %vm836_vm12 = vcmask 1046528  }
  0x31   : > { %v2887_v4 = vld [vmem:[%s4043_s4 + $0x38] sm:$0xff]   ;;  %2582 = vmatprep.subr.bf16.mxu1 %v2886_v3  ;;  %v2891_v8 = vld [vmem:[%s4043_s4 + $0x30] sm:$0xff]   ;;  %v2894_v11 = vld [vmem:[%s4043_s4 + $0xe8] sm:$0xff]   ;;  %vm542_vm0 = vcmp.ge.s32.totalorder %v3186_v29, 0  ;;  %vm552_vm1 = vcmp.lt.s32.totalorder %v3186_v29, 16  ;;  %v533_v33 = vadd.s32 1, %v3186_v29 }
  0x32   : > { %v2888_v5 = vld [vmem:[%s4043_s4 + $0xb8] sm:$0xff]   ;;  %2519 = vmatpush3.bf16.msra.mxu0 %v2887_v4  ;;  %v2892_v9 = vld [vmem:[%s4043_s4 + $0xb0] sm:$0xff]   ;;  %v2895_v12 = vld [vmem:[%s4043_s4 + $0x28] sm:$0xff]   ;;  %v534_v35 = vadd.s32 2, %v3186_v29  ;;  %v3208_v37 = vadd.s32 3, %v3186_v29  ;;  %v3221_v41 = vadd.s32 4, %v3186_v29 }
  0x33   : > { %2583 = vmatpush3.bf16.msra.mxu1 %v2888_v5  ;;  %2520 = vmatprep.subr.bf16.mxu0 %v2889_v6  ;;  %v2896_v13 = vld [vmem:[%s4043_s4 + $0xa8] sm:$0xff]   ;;  %v2897_v14 = vld [vmem:[%s4043_s4 + $0x60] sm:$0xff]   ;;  %v2901_v18 = vld [vmem:[%s4043_s4 + $0x58] sm:$0xff]   ;;  %v3225_v45 = vadd.s32 5, %v3186_v29  ;;  %v3231_v49 = vadd.s32 6, %v3186_v29  ;;  %vm543_vm2 = vcmp.ge.s32.totalorder %v533_v33, 0 }
  0x34   : > { %2584 = vmatprep.subr.bf16.mxu1 %v2890_v7  ;;  %v2898_v15 = vld [vmem:[%s4043_s4 + $0xe0] sm:$0xff]   ;;  %v2902_v19 = vld [vmem:[%s4043_s4 + $0xd8] sm:$0xff]   ;;  %v2905_v22 = vld [vmem:[%s4043_s4 + $0x50] sm:$0xff]   ;;  %vm553_vm3 = vcmp.lt.s32.totalorder %v533_v33, 16  ;;  %vm544_vm6 = vcmp.ge.s32.totalorder %v534_v35, 0  ;;  %vm554_vm7 = vcmp.lt.s32.totalorder %v534_v35, 16 }
  0x35   : > { %v2899_v16 = vld [vmem:[%s4043_s4 + $0x20] sm:$0xff]   ;;  %v2903_v20 = vld [vmem:[%s4043_s4 + $0x18] sm:$0xff]   ;;  %v2906_v23 = vld [vmem:[%s4043_s4 + $0xd0] sm:$0xff]   ;;  %vm545_vm10 = vcmp.ge.s32.totalorder %v3208_v37, 0  ;;  %vm555_vm11 = vcmp.lt.s32.totalorder %v3208_v37, 16  ;;  %p2386_p11 = scmp.ne.s32.totalorder %s2987_s21, 0 }
  0x36   : > { %2521 = vmatpush3.bf16.msra.mxu0 %v2891_v8  ;;  %v2900_v17 = vld [vmem:[%s4043_s4 + $0xa0] sm:$0xff]   ;;  %v2904_v21 = vld [vmem:[%s4043_s4 + $0x98] sm:$0xff]   ;;  %v2907_v24 = vld [vmem:[%s4043_s4 + $0x10] sm:$0xff]   ;;  %vm715_vm14 = vsmask.f32 7424 }
  0x37   : > { %2585 = vmatpush3.bf16.msra.mxu1 %v2892_v9  ;;  %2522 = vmatprep.subr.bf16.mxu0 %v2893_v10  ;;  %v2908_v25 = vld [vmem:[%s4043_s4 + $0x90] sm:$0xff]   ;;  %v2909_v26 = vld [vmem:[%s4043_s4 + $0x48] sm:$0xff]   ;;  %v2913_v31 = vld [vmem:[%s4043_s4 + $0x40] sm:$0xff]  }
  0x38   : > { %2586 = vmatprep.subr.bf16.mxu1 %v2894_v11  ;;  %v2910_v27 = vld [vmem:[%s4043_s4 + $0xc8] sm:$0xff]   ;;  %v2914_v32 = vld [vmem:[%s4043_s4 + $0xc0] sm:$0xff]   ;;  %v2917_v48 = vld [vmem:[%s4043_s4 + $0x178] sm:$0xff]  }
  0x39   : > { %v2911_v28 = vld [vmem:[%s4043_s4 + $0x8] sm:$0xff]   ;;  %v2915_v34 = vld [vmem:[%s4043_s4] sm:$0xff]   ;;  %v2505_v59 = vld [vmem:[%s3087_s18 + $0x10] sm:$0xff]  }
  0x3a   : > { %2523 = vmatpush3.bf16.msra.mxu0 %v2895_v12  ;;  %v2912_v30 = vld [vmem:[%s4043_s4 + $0x88] sm:$0xff]   ;;  %v2916_v36 = vld [vmem:[%s4043_s4 + $0x80] sm:$0xff]   ;;  %v2438_v2 = vunpack.c.l.bf16 %v2505_v59  ;;  %v2439_v3 = vunpack.c.h.bf16 %v2505_v59  ;;  %v2922_v4 = vld [vmem:[%s4043_s4 + $0x1f8] sm:$0xff]  }
  0x3b   : > { %2587 = vmatpush3.bf16.msra.mxu1 %v2896_v13  ;;  %2524 = vmatprep.subr.bf16.mxu0 %v2897_v14  ;;  %v2425_v38 = vld [vmem:[#allocation2] sm:$0xff]   ;;  %v2504_v52 = vld [vmem:[%s3087_s18 + $0x8] sm:$0xff]   ;;  %vm3252_vm8 = vmand %vm542_vm0, %vm552_vm1  ;;  %vm546_vm1 = vcmp.ge.s32.totalorder %v3221_v41, 0 }
  0x3c   : > { %2588 = vmatprep.subr.bf16.mxu1 %v2898_v15  ;;  %v3213_v39 = vld [vmem:[%s4041_s2] ss:$0 sm:$0xff]  ;;  %v2426_v42 = vunpack.c.l.bf16 %v2425_v38  ;;  %v2427_v43 = vunpack.c.h.bf16 %v2425_v38  ;;  %v2434_v55 = vunpack.c.l.bf16 %v2504_v52  ;;  %v2435_v56 = vunpack.c.h.bf16 %v2504_v52  ;;  %vm3260_vm9 = vmand %vm543_vm2, %vm553_vm3  ;;  %v2926_v5 = vld [vmem:[%s4043_s4 + $0x1f0] sm:$0xff]  }
  0x3d   : > { %v3218_v40 = vld [vmem:[%s4042_s3] ss:$0 sm:$0xff]  ;;  %v461_v12 = vmul.f32 %v2438_v2, %v3213_v39  ;;  %v462_v13 = vmul.f32 %v2439_v3, %v3213_v39  ;;  %vm564_vm13 = vmand %vm544_vm6, %vm554_vm7  ;;  %v3284_v38 = vadd.s32 7, %v3186_v29  ;;  %vm556_vm2 = vcmp.lt.s32.totalorder %v3221_v41, 16 }
  0x3e   : > { %2525 = vmatpush3.bf16.msra.mxu0 %v2899_v16  ;;  %v2429_v44 = vld [vmem:[%s3087_s18] sm:$0xff]   ;;  %v455_v50 = vmul.f32 %v2426_v42, %v3213_v39  ;;  %v456_v51 = vmul.f32 %v2427_v43, %v3213_v39  ;;  %v459_v62 = vmul.f32 %v2434_v55, %v3213_v39  ;;  %v460_v63 = vmul.f32 %v2435_v56, %v3213_v39  ;;  %vm3279_vm15 = vmand %vm692_vm4, %vm693_vm5 }
  0x3f   : > { %2589 = vmatpush3.bf16.msra.mxu1 %v2900_v17  ;;  %2526 = vmatprep.subr.bf16.mxu0 %v2901_v18  ;;  %v2430_v46 = vunpack.c.l.bf16 %v2429_v44  ;;  %v2431_v47 = vunpack.c.h.bf16 %v2429_v44  ;;  %v2506_v17 = vld [vmem:[%s3087_s18 + $0x18] sm:$0xff]   ;;  %vm3304_vm0 = vmand %vm545_vm10, %vm555_vm11  ;;  %vm547_vm3 = vcmp.ge.s32.totalorder %v3225_v45, 0  ;;  %vm557_vm5 = vcmp.lt.s32.totalorder %v3225_v45, 16 }
  0x40   : > { %2590 = vmatprep.subr.bf16.mxu1 %v2902_v19  ;;  %v481_v57 = vadd.f32 %v3218_v40, %v455_v50  ;;  %v482_v58 = vadd.f32 %v3218_v40, %v456_v51  ;;  %v485_v8 = vadd.f32 %v3218_v40, %v459_v62  ;;  %v486_v9 = vadd.f32 %v3218_v40, %v460_v63  ;;  %vm3392_vm6 = vmand %vm546_vm1, %vm556_vm2 }
  0x41   : > { %v457_v53 = vmul.f32 %v2430_v46, %v3213_v39  ;;  %v458_v54 = vmul.f32 %v2431_v47, %v3213_v39  ;;  %v487_v19 = vadd.f32 %v3218_v40, %v461_v12  ;;  %vm548_vm7 = vcmp.ge.s32.totalorder %v3231_v49, 0  ;;  %vm3440_vm11 = vmand %vm547_vm3, %vm557_vm5 }
  0x42   : > { %2527 = vmatpush3.bf16.msra.mxu0 %v2903_v20  ;;  %v501_v0 = vmax.f32 %v481_v57, 0.0  ;;  %v502_v1 = vmax.f32 %v482_v58, 0.0  ;;  %v505_v15 = vmax.f32 %v485_v8, 0.0  ;;  %v506_v16 = vmax.f32 %v486_v9, 0.0 }
  0x43   : > { %2591 = vmatpush3.bf16.msra.mxu1 %v2904_v21  ;;  %2528 = vmatprep.subr.bf16.mxu0 %v2905_v22  ;;  %v483_v60 = vadd.f32 %v3218_v40, %v457_v53  ;;  %v484_v61 = vadd.f32 %v3218_v40, %v458_v54  ;;  %v488_v20 = vadd.f32 %v3218_v40, %v462_v13  ;;  %v2442_v21 = vunpack.c.l.bf16 %v2506_v17 }
  0x44   : > { %2592 = vmatprep.subr.bf16.mxu1 %v2906_v23  ;;  %v521_v10 = vpack.c.bf16 %v502_v1, %v501_v0  ;;  %vm559_vm10 = vcmp.lt.s32.totalorder %v3284_v38, 16 }
  0x45   : > { %v503_v6 = vmax.f32 %v483_v60, 0.0  ;;  %v504_v7 = vmax.f32 %v484_v61, 0.0  ;;  %v463_v46 = vmul.f32 %v2442_v21, %v3213_v39  ;;  %v2924_v60 = vld [vmem:[%s4043_s4 + $0x1b8] sm:$0xff]   ;;  %v2507_v21 = vld [vmem:[%s3087_s18 + $0x20] sm:$0xff]  }
  0x46   : > { %2529 = vmatpush3.bf16.msra.mxu0 %v2907_v24  ;;  %v592_v18 = vsel %vm3252_vm8, %v521_v10, 0  ;;  %vm558_vm8 = vcmp.lt.s32.totalorder %v3231_v49, 16 }
  0x47   : > { %2593 = vmatpush3.bf16.msra.mxu1 %v2908_v25  ;;  %2530 = vmatprep.subr.bf16.mxu0 %v2909_v26  ;;  %v522_v14 = vpack.c.bf16 %v504_v7, %v503_v6  ;;  %v603_v22 = vshrl.u32 %v592_v18, 16  ;;  %v606_v23 = vshll.u32 %v592_v18, 16  ;;  %v523_v25 = vpack.c.bf16 %v506_v16, %v505_v15  ;;  %v2918_v7 = vld [vmem:[%s4043_s4 + $0x138] sm:$0xff]   ;;  %v2919_v18 = vld [vmem:[%s4043_s4 + $0x170] sm:$0xff]  }
  0x48   : > { %2594 = vmatprep.subr.bf16.mxu1 %v2910_v27 }
  0x49   : > { %v593_v24 = vsel %vm3260_vm9, %v522_v14, 0  ;;  %v489_v14 = vadd.f32 %v3218_v40, %v463_v46  ;;  %vm549_vm9 = vcmp.ge.s32.totalorder %v3284_v38, 0  ;;  %v2944_v38 = vld [vmem:[%s4043_s4 + $0x1c8] sm:$0xff]  }
  0x4a   : > { %2531 = vmatpush3.bf16.msra.mxu0 %v2911_v28  ;;  %v610_v26 = vshrl.u32 %v593_v24, 16  ;;  %v613_v27 = vshll.u32 %v593_v24, 16  ;;  %v507_v28 = vmax.f32 %v487_v19, 0.0 }
  0x4b   : > { %2595 = vmatpush3.bf16.msra.mxu1 %v2912_v30  ;;  %2532 = vmatprep.subr.bf16.mxu0 %v2913_v31  ;;  %v508_v30 = vmax.f32 %v488_v20, 0.0  ;;  %v605_v31 = vrot.slane %v603_v22, 7  ;;  %v2928_v20 = vld [vmem:[%s4043_s4 + $0x1b0] sm:$0xff]  }
  0x4c   : > { %2596 = vmatprep.subr.bf16.mxu1 %v2914_v32  ;;  %v594_v32 = vsel %vm564_vm13, %v523_v25, 0  ;;  %vm3485_vm13 = vmand %vm548_vm7, %vm558_vm8 }
  0x4d   : > { %v617_v35 = vshrl.u32 %v594_v32, 16  ;;  %v608_v42 = vor.u32 %v606_v23, %v605_v31  ;;  %v705_v43 = vsel %vm3279_vm15, %v605_v31, 0  ;;  %v620_v44 = vshll.u32 %v594_v32, 16 }
  0x4e   : > { %2533 = vmatpush3.bf16.msra.mxu0 %v2915_v34  ;;  %v612_v34 = vrot.slane %v610_v26, 7  ;;  %v724_v47 = vshll.u32 %v705_v43, 16  ;;  %v524_v51 = vpack.c.bf16 %v508_v30, %v507_v28  ;;  %v838_v53 = vrot.slane %v705_v43, 1  ;;  %v2930_v26 = vld [vmem:[%s4043_s4 + $0x1e8] sm:$0xff]   ;;  %v2920_v28 = vld [vmem:[%s4043_s4 + $0x130] sm:$0xff]  }
  0x4f   : > { %2597 = vmatpush3.bf16.msra.mxu1 %v2916_v36  ;;  %2646 = vmatprep.subr.bf16.mxu0 %v2917_v48  ;;  %v2443_v36 = vunpack.c.h.bf16 %v2506_v17  ;;  %v695_v52 = vsel %vm3279_vm15, 0, %v608_v42  ;;  %v619_v55 = vrot.slane %v617_v35, 7  ;;  %v2921_v35 = vld [vmem:[%s4043_s4 + $0x168] sm:$0xff]   ;;  %v509_v42 = vmax.f32 %v489_v14, 0.0 }
  0x50   : > { %2710 = vmatprep.subr.bf16.mxu1 %v2922_v4  ;;  %v615_v48 = vor.u32 %v613_v27, %v612_v34  ;;  %v3291_v50 = vsel %vm3279_vm15, %v612_v34, 0  ;;  %v717_v56 = vshrl.u32 %v695_v52, 16  ;;  %v719_v57 = vshll.u32 %v695_v52, 16 }
  0x51   : > { %v736_v54 = vshll.u32 %v3291_v50, 16  ;;  %v464_v61 = vmul.f32 %v2443_v36, %v3213_v39  ;;  %v726_v62 = vrot.slane %v724_v47, 1  ;;  %v837_v63 = vrot.slane %v695_v52, 1 }
  0x52   : > { %v3298_v58 = vsel %vm3279_vm15, 0, %v615_v48  ;;  %v721_v1 = vrot.slane %v719_v57, 1  ;;  %v622_v3 = vor.u32 %v620_v44, %v619_v55  ;;  %v3319_v4 = vsel %vm3279_vm15, %v619_v55, 0  ;;  %v2932_v44 = vld [vmem:[%s4043_s4 + $0x1a8] sm:$0xff]  }
  0x53   : > { %1612 = vmatprep.mubr.bf16.mxu1 %v3298_v58  ;;  %v729_v37 = vshrl.u32 %v3298_v58, 16  ;;  %v731_v0 = vshll.u32 %v3298_v58, 16  ;;  %v738_v2 = vrot.slane %v736_v54, 1  ;;  %v839_v6 = vsel %vm836_vm12, %v837_v63, %v838_v53  ;;  %v2923_v63 = vld [vmem:[%s4043_s4 + $0x128] sm:$0xff]  }
  0x54   : > { %v748_v9 = vshll.u32 %v3319_v4, 16  ;;  %v595_v10 = vsel %vm3304_vm0, %v524_v51, 0  ;;  %v722_v11 = vor.u32 %v721_v1, %v717_v56  ;;  %1613 = vmatmul.mubr.bf16.vlgmr.msra.gmra.mxu1 %v839_v6  ;;  %v3333_v12 = vsel %vm3279_vm15, 0, %v622_v3  ;;  %v2508_v51 = vld [vmem:[%s3087_s18 + $0x28] sm:$0xff]   ;;  %v2934_v56 = vld [vmem:[%s4043_s4 + $0x1e0] sm:$0xff]   ;;  %vm3502_vm0 = vmand %vm549_vm9, %vm559_vm10 }
  0x55   : > { %v733_v8 = vrot.slane %v731_v0, 1  ;;  %v624_v13 = vshrl.u32 %v595_v10, 16  ;;  %1620 = vmatprep.mubr.bf16.mxu1 %v3333_v12  ;;  %v840_v16 = vrot.slane %v3298_v58, 1  ;;  %v841_v17 = vrot.slane %v3291_v50, 1  ;;  %2711 = vmatpush3.bf16.msra.mxu1 %v2924_v60  ;;  %v2925_v3 = vld [vmem:[%s4043_s4 + $0x160] sm:$0xff]  }
  0x56   : > { %v743_v19 = vshll.u32 %v3333_v12, 16  ;;  %v727_v22 = vsel %vm715_vm14, %v722_v11, %v726_v62  ;;  %v741_v23 = vshrl.u32 %v3333_v12, 16  ;;  %v627_v25 = vshll.u32 %v595_v10, 16  ;;  %2712 = vmatprep.subr.bf16.mxu1 %v2926_v5  ;;  %v2509_v62 = vld [vmem:[%s3087_s18 + $0x30] sm:$0xff]   ;;  %v2936_v11 = vld [vmem:[%s4043_s4 + $0x1a0] sm:$0xff]  }
  0x57   : > { %v734_v15 = vor.u32 %v733_v8, %v729_v37  ;;  %v626_v24 = vrot.slane %v624_v13, 7  ;;  %1515 = vmatprep.mubr.bf16.mxu0 %v727_v22  ;;  %v750_v31 = vrot.slane %v748_v9, 1  ;;  %v490_v32 = vadd.f32 %v3218_v40, %v464_v61  ;;  %v2938_v13 = vld [vmem:[%s4043_s4 + $0x1d8] sm:$0xff]  }
  0x58   : > { %v745_v30 = vrot.slane %v743_v19, 1  ;;  %1516 = vmatmul.mubr.bf16.vlgmr.msra.gmra.mxu0 %v695_v52  ;;  %v2446_v43 = vunpack.c.l.bf16 %v2507_v21  ;;  %v3373_v46 = vsel %vm836_vm12, %v840_v16, %v841_v17  ;;  %v843_v47 = vrot.slane %v3333_v12, 1 }
  0x59   : > { %v3355_v27 = vsel %vm715_vm14, %v734_v15, %v738_v2  ;;  %v629_v34 = vor.u32 %v627_v25, %v626_v24  ;;  %v3366_v36 = vsel %vm3279_vm15, %v626_v24, 0  ;;  %2647 = vmatpush3.bf16.msra.mxu0 %v2918_v7  ;;  %v844_v48 = vrot.slane %v3319_v4, 1  ;;  %2713 = vmatpush3.bf16.msra.mxu1 %v2928_v20 }
  0x5a   : > { %1523 = vmatprep.mubr.bf16.mxu0 %v3355_v27  ;;  %v510_v50 = vmax.f32 %v490_v32, 0.0  ;;  %2648 = vmatprep.subr.bf16.mxu0 %v2919_v18  ;;  %v746_v52 = vor.u32 %v745_v30, %v741_v23  ;;  %v2447_v54 = vunpack.c.h.bf16 %v2507_v21  ;;  %v465_v55 = vmul.f32 %v2446_v43, %v3213_v39  ;;  %v2927_v18 = vld [vmem:[%s4043_s4 + $0x120] sm:$0xff]  }
  0x5b   : > { %v3380_v53 = vsel %vm3279_vm15, 0, %v629_v34  ;;  %v760_v59 = vshll.u32 %v3366_v36, 16  ;;  %v847_v61 = vrot.slane %v3366_v36, 1  ;;  %2714 = vmatprep.subr.bf16.mxu1 %v2930_v26  ;;  %v2450_v4 = vunpack.c.l.bf16 %v2508_v51 }
  0x5c   : > { %v755_v57 = vshll.u32 %v3380_v53, 16  ;;  %1621 = vmatmul.mubr.bf16.gmra.mxu1 %v3373_v46  ;;  %v753_v41 = vshrl.u32 %v3380_v53, 16  ;;  %v525_v37 = vpack.c.bf16 %v510_v50, %v509_v42  ;;  %v466_v0 = vmul.f32 %v2447_v54, %v3213_v39  ;;  %v2931_v42 = vld [vmem:[%s4043_s4 + $0x118] sm:$0xff]  }
  0x5d   : > { %v491_v1 = vadd.f32 %v3218_v40, %v465_v55  ;;  %2649 = vmatpush3.bf16.msra.mxu0 %v2920_v28  ;;  %1628 = vmatprep.mubr.bf16.mxu1 %v3380_v53  ;;  %v2451_v5 = vunpack.c.h.bf16 %v2508_v51  ;;  %v2454_v6 = vunpack.c.l.bf16 %v2509_v62  ;;  %v3414_v7 = vsel %vm715_vm14, %v746_v52, %v750_v31  ;;  %v2929_v31 = vld [vmem:[%s4043_s4 + $0x158] sm:$0xff]   ;;  %v2941_v52 = vld [vmem:[%s4043_s4 + $0x1d0] sm:$0xff]  }
  0x5e   : > { %v757_v2 = vrot.slane %v755_v57, 1  ;;  %2650 = vmatprep.subr.bf16.mxu0 %v2921_v35  ;;  %v596_v8 = vsel %vm3392_vm6, %v525_v37, 0  ;;  %v492_v9 = vadd.f32 %v3218_v40, %v466_v0  ;;  %2715 = vmatpush3.bf16.msra.mxu1 %v2932_v44  ;;  %v3426_v14 = vsel %vm836_vm12, %v843_v47, %v844_v48  ;;  %v2940_v47 = vld [vmem:[%s4043_s4 + $0x198] sm:$0xff]   ;;  %v2933_v37 = vld [vmem:[%s4043_s4 + $0x150] sm:$0xff]  }
  0x5f   : > { %v511_v10 = vmax.f32 %v491_v1, 0.0  ;;  %v631_v15 = vshrl.u32 %v596_v8, 16  ;;  %v634_v16 = vshll.u32 %v596_v8, 16  ;;  %v467_v17 = vmul.f32 %v2450_v4, %v3213_v39  ;;  %2716 = vmatprep.subr.bf16.mxu1 %v2934_v56 }
  0x60   : > { %1524 = vmatmul.mubr.bf16.gmra.mxu0 %v3298_v58  ;;  %v512_v19 = vmax.f32 %v492_v9, 0.0  ;;  %v468_v20 = vmul.f32 %v2451_v5, %v3213_v39  ;;  %v2455_v21 = vunpack.c.h.bf16 %v2509_v62  ;;  %v469_v22 = vmul.f32 %v2454_v6, %v3213_v39  ;;  %v2942_v6 = vld [vmem:[%s4043_s4 + $0x190] sm:$0xff]  }
  0x61   : > { %1531 = vmatprep.mubr.bf16.mxu0 %v3414_v7  ;;  %2651 = vmatpush3.bf16.msra.mxu0 %v2923_v63  ;;  %v758_v23 = vor.u32 %v757_v2, %v753_v41  ;;  %v762_v24 = vrot.slane %v760_v59, 1  ;;  %v633_v25 = vrot.slane %v631_v15, 7  ;;  %v493_v26 = vadd.f32 %v3218_v40, %v467_v17  ;;  %v2510_v59 = vld [vmem:[%s3087_s18 + $0x38] sm:$0xff]  }
  0x62   : > { %v846_v28 = vrot.slane %v3380_v53, 1  ;;  %2652 = vmatprep.subr.bf16.mxu0 %v2925_v3  ;;  %v526_v30 = vpack.c.bf16 %v512_v19, %v511_v10  ;;  %v494_v32 = vadd.f32 %v3218_v40, %v468_v20  ;;  %2717 = vmatpush3.bf16.msra.mxu1 %v2936_v11  ;;  %v470_v34 = vmul.f32 %v2455_v21, %v3213_v39  ;;  %v2935_v3 = vld [vmem:[%s4043_s4 + $0x110] sm:$0xff]  }
  0x63   : > { %v636_v45 = vor.u32 %v634_v16, %v633_v25  ;;  %v3453_v35 = vsel %vm3279_vm15, %v633_v25, 0  ;;  %v513_v43 = vmax.f32 %v493_v26, 0.0  ;;  %v495_v44 = vadd.f32 %v3218_v40, %v469_v22  ;;  %2718 = vmatprep.subr.bf16.mxu1 %v2938_v13  ;;  %v2946_v25 = vld [vmem:[%s4043_s4 + $0x188] sm:$0xff]  }
  0x64   : > { %1629 = vmatmul.mubr.bf16.gmra.mxu1 %v3426_v14  ;;  %v772_v48 = vshll.u32 %v3453_v35, 16  ;;  %v597_v50 = vsel %vm3440_vm11, %v526_v30, 0  ;;  %v514_v51 = vmax.f32 %v494_v32, 0.0  ;;  %v496_v57 = vadd.f32 %v3218_v40, %v470_v34  ;;  %v2943_v30 = vld [vmem:[%s4043_s4 + $0x140] sm:$0xff]  }
  0x65   : > { %v3471_v54 = vsel %vm3279_vm15, 0, %v636_v45  ;;  %2653 = vmatpush3.bf16.msra.mxu0 %v2927_v18  ;;  %v638_v55 = vshrl.u32 %v597_v50, 16  ;;  %v641_v56 = vshll.u32 %v597_v50, 16  ;;  %v3476_v60 = vsel %vm715_vm14, %v758_v23, %v762_v24  ;;  %v2937_v18 = vld [vmem:[%s4043_s4 + $0x148] sm:$0xff]  }
  0x66   : > { %1636 = vmatprep.mubr.bf16.mxu1 %v3471_v54  ;;  %v765_v62 = vshrl.u32 %v3471_v54, 16  ;;  %v767_v63 = vshll.u32 %v3471_v54, 16  ;;  %2654 = vmatprep.subr.bf16.mxu0 %v2929_v31  ;;  %v3493_v0 = vadd.s32 8, %v3186_v29  ;;  %v527_v2 = vpack.c.bf16 %v514_v51, %v513_v43  ;;  %v2939_v23 = vld [vmem:[%s4043_s4 + $0x108] sm:$0xff]   ;;  %v2947_v31 = vld [vmem:[%s4043_s4 + $0x1c0] sm:$0xff]  }
  0x67   : > { %v640_v1 = vrot.slane %v638_v55, 7  ;;  %v515_v4 = vmax.f32 %v495_v44, 0.0  ;;  %v516_v5 = vmax.f32 %v496_v57, 0.0  ;;  %2719 = vmatpush3.bf16.msra.mxu1 %v2940_v47  ;;  %v3513_v8 = vsel %vm836_vm12, %v846_v28, %v847_v61 }
  0x68   : > { %1532 = vmatmul.mubr.bf16.gmra.mxu0 %v3333_v12  ;;  %v769_v9 = vrot.slane %v767_v63, 1  ;;  %2720 = vmatprep.subr.bf16.mxu1 %v2941_v52  ;;  %v2458_v10 = vunpack.c.l.bf16 %v2510_v59  ;;  %v774_v11 = vrot.slane %v772_v48, 1  ;;  %v598_v15 = vsel %vm3485_vm13, %v527_v2, 0  ;;  %v2945_v63 = vld [vmem:[%s4043_s4 + $0x100] sm:$0xff]  }
  0x69   : > { %1539 = vmatprep.mubr.bf16.mxu0 %v3476_v60  ;;  %v643_v13 = vor.u32 %v641_v56, %v640_v1  ;;  %2655 = vmatpush3.bf16.msra.mxu0 %v2931_v42  ;;  %v528_v16 = vpack.c.bf16 %v516_v5, %v515_v4  ;;  %v3523_v61 = vsel %vm3279_vm15, %v640_v1, 0  ;;  %v645_v17 = vshrl.u32 %v598_v15, 16  ;;  %v2948_v42 = vld [vmem:[%s4043_s4 + $0x180] sm:$0xff]   ;;  %v3568_v56 = vld [vmem:[%s4043_s4 + $0x238] sm:$0xff]  }
  0x6a   : > { %v770_v36 = vor.u32 %v769_v9, %v765_v62  ;;  %2656 = vmatprep.subr.bf16.mxu0 %v2933_v37  ;;  %v2459_v19 = vunpack.c.h.bf16 %v2510_v59  ;;  %v648_v21 = vshll.u32 %v598_v15, 16  ;;  %v471_v24 = vmul.f32 %v2458_v10, %v3213_v39 }
  0x6b   : > { %v3530_v20 = vsel %vm3279_vm15, 0, %v643_v13  ;;  %v599_v22 = vsel %vm3502_vm0, %v528_v16, 0  ;;  %2721 = vmatpush3.bf16.msra.mxu1 %v2942_v6  ;;  %v849_v58 = vrot.slane %v3471_v54, 1  ;;  %v850_v26 = vrot.slane %v3453_v35, 1 }
  0x6c   : > { %1637 = vmatmul.mubr.bf16.gmra.mxu1 %v3513_v8  ;;  %v779_v28 = vshll.u32 %v3530_v20, 16  ;;  %2722 = vmatprep.subr.bf16.mxu1 %v2944_v38  ;;  %v3552_v32 = vsel %vm715_vm14, %v770_v36, %v774_v11  ;;  %v784_v34 = vshll.u32 %v3523_v61, 16  ;;  %v647_v45 = vrot.slane %v645_v17, 7 }
  0x6d   : > { %1644 = vmatprep.mubr.bf16.mxu1 %v3530_v20  ;;  %2657 = vmatpush3.bf16.msra.mxu0 %v2935_v3  ;;  %v652_v35 = vshrl.u32 %v599_v22, 16  ;;  %v777_v43 = vshrl.u32 %v3530_v20, 16  ;;  %v472_v47 = vmul.f32 %v2459_v19, %v3213_v39  ;;  %v497_v48 = vadd.f32 %v3218_v40, %v471_v24 }
  0x6e   : > { %v781_v44 = vrot.slane %v779_v28, 1  ;;  %2658 = vmatprep.subr.bf16.mxu0 %v2937_v18  ;;  %v650_v50 = vor.u32 %v648_v21, %v647_v45  ;;  %v655_v52 = vshll.u32 %v599_v22, 16  ;;  %vm550_vm1 = vcmp.ge.s32.totalorder %v3493_v0, 0 }
  0x6f   : > { %v654_v51 = vrot.slane %v652_v35, 7  ;;  %2723 = vmatpush3.bf16.msra.mxu1 %v2946_v25  ;;  %v498_v55 = vadd.f32 %v3218_v40, %v472_v47  ;;  %v3572_v57 = vsel %vm836_vm12, %v849_v58, %v850_v26  ;;  %v517_v62 = vmax.f32 %v497_v48, 0.0 }
  0x70   : > { %1540 = vmatmul.mubr.bf16.gmra.mxu0 %v3380_v53  ;;  %2724 = vmatprep.subr.bf16.mxu1 %v2947_v31  ;;  %v3576_v59 = vsel %vm3279_vm15, 0, %v650_v50  ;;  %vm560_vm2 = vcmp.lt.s32.totalorder %v3493_v0, 16  ;;  %v782_v41 = vor.u32 %v781_v44, %v777_v43  ;;  %v786_v37 = vrot.slane %v784_v34, 1  ;;  %v2461_v0 = vld [vmem:[#allocation2 + $0x8] sm:$0xff]  }
  0x71   : > { %1547 = vmatprep.mubr.bf16.mxu0 %v3552_v32  ;;  %2659 = vmatpush3.bf16.msra.mxu0 %v2939_v23  ;;  %v3584_v1 = vsel %vm3279_vm15, %v647_v45, 0  ;;  %v791_v2 = vshll.u32 %v3576_v59, 16  ;;  %v657_v3 = vor.u32 %v655_v52, %v654_v51  ;;  %v518_v4 = vmax.f32 %v498_v55, 0.0  ;;  %vm570_vm3 = vmand %vm550_vm1, %vm560_vm2 }
  0x72   : > { %2660 = vmatprep.subr.bf16.mxu0 %v2943_v30  ;;  %v852_v5 = vrot.slane %v3530_v20, 1  ;;  %v853_v49 = vrot.slane %v3523_v61, 1  ;;  %v541_v6 = vadd.s32 9, %v3186_v29  ;;  %v789_v9 = vshrl.u32 %v3576_v59, 16 }
  0x73   : > { %2725 = vmatpush3.bf16.msra.mxu1 %v2948_v42  ;;  %v796_v10 = vshll.u32 %v3584_v1, 16  ;;  %v529_v38 = vpack.c.bf16 %v518_v4, %v517_v62  ;;  %v3598_v11 = vsel %vm715_vm14, %v782_v41, %v786_v37  ;;  %v793_v13 = vrot.slane %v791_v2, 1 }
  0x74   : > { %1645 = vmatmul.mubr.bf16.gmra.mxu1 %v3572_v57  ;;  %2822 = vmatprep.subr.bf16.mxu1 %v3568_v56  ;;  %v3603_v15 = vsel %vm3279_vm15, 0, %v657_v3  ;;  %v2462_v16 = vunpack.c.l.bf16 %v2461_v0  ;;  %v2463_v36 = vunpack.c.h.bf16 %v2461_v0  ;;  %vm551_vm5 = vcmp.ge.s32.totalorder %v541_v6, 0 }
  0x75   : > { %1652 = vmatprep.mubr.bf16.mxu1 %v3576_v59  ;;  %2661 = vmatpush3.bf16.msra.mxu0 %v2945_v63  ;;  %v600_v29 = vsel %vm570_vm3, %v529_v38, 0  ;;  %v3608_v18 = vsel %vm836_vm12, %v852_v5, %v853_v49  ;;  %v712_v19 = vsel %vm3279_vm15, %v654_v51, 0  ;;  %v794_v23 = vor.u32 %v793_v13, %v789_v9 }
  0x76   : > { %2790 = vmatprep.subr.bf16.mxu0 %v3568_v56  ;;  %v659_v61 = vshrl.u32 %v600_v29, 16  ;;  %v662_v17 = vshll.u32 %v600_v29, 16  ;;  %v473_v21 = vmul.f32 %v2462_v16, %v3213_v39  ;;  %v474_v22 = vmul.f32 %v2463_v36, %v3213_v39 }
  0x77   : > { %v798_v24 = vrot.slane %v796_v10, 1  ;;  %v803_v25 = vshll.u32 %v3603_v15, 16  ;;  %v856_v26 = vrot.slane %v3584_v1, 1  ;;  %vm561_vm6 = vcmp.lt.s32.totalorder %v541_v6, 16 }
  0x78   : > { %1548 = vmatmul.mubr.bf16.gmra.mxu0 %v3471_v54  ;;  %v661_v58 = vrot.slane %v659_v61, 7  ;;  %v499_v28 = vadd.f32 %v3218_v40, %v473_v21  ;;  %v500_v30 = vadd.f32 %v3218_v40, %v474_v22  ;;  %v855_v31 = vrot.slane %v3576_v59, 1  ;;  %vm571_vm7 = vmand %vm551_vm5, %vm561_vm6 }
  0x79   : > { %1555 = vmatprep.mubr.bf16.mxu0 %v3598_v11  ;;  %v808_v34 = vshll.u32 %v712_v19, 16  ;;  %v3624_v47 = vsel %vm715_vm14, %v794_v23, %v798_v24  ;;  %v801_v40 = vshrl.u32 %v3603_v15, 16  ;;  %v805_v48 = vrot.slane %v803_v25, 1 }
  0x7a   : > { %v664_v45 = vor.u32 %v662_v17, %v661_v58  ;;  %v713_v39 = vsel %vm3279_vm15, %v661_v58, 0  ;;  %v519_v43 = vmax.f32 %v499_v28, 0.0  ;;  %v520_v44 = vmax.f32 %v500_v30, 0.0  ;;  %v2950_v28 = vld [vmem:[%s4043_s4 + $0x230] sm:$0xff]   ;;  %v2951_v30 = vld [vmem:[%s4043_s4 + $0x228] sm:$0xff]  }
  0x7b   : > { %v877_v35 = vshll.u32 %v713_v39, 16  ;;  %v885_v42 = vrot.slane %v713_v39, 1  ;;  %v3639_v63 = vsel %vm836_vm12, %v855_v31, %v856_v26  ;;  %v806_v2 = vor.u32 %v805_v48, %v801_v40 }
  0x7c   : > { %1653 = vmatmul.mubr.bf16.gmra.mxu1 %v3608_v18  ;;  %v3629_v50 = vsel %vm3279_vm15, 0, %v664_v45  ;;  %v530_v62 = vpack.c.bf16 %v520_v44, %v519_v43  ;;  %v810_v3 = vrot.slane %v808_v34, 1  ;;  %v858_v9 = vrot.slane %v3603_v15, 1 }
  0x7d   : > { %1660 = vmatprep.mubr.bf16.mxu1 %v3603_v15  ;;  %v870_v51 = vshrl.u32 %v3629_v50, 16  ;;  %v872_v52 = vshll.u32 %v3629_v50, 16  ;;  %v884_v55 = vrot.slane %v3629_v50, 1  ;;  %v879_v37 = vrot.slane %v877_v35, 1 }
  0x7e   : > { %v601_v4 = vsel %vm571_vm7, %v530_v62, 0  ;;  %v859_v10 = vrot.slane %v712_v19, 1  ;;  %v3651_v0 = vsel %vm715_vm14, %v806_v2, %v810_v3 }
  0x7f   : > { %v874_v41 = vrot.slane %v872_v52, 1  ;;  %v3642_v1 = vsel %vm836_vm12, %v884_v55, %v885_v42  ;;  %v666_v49 = vshrl.u32 %v601_v4, 16  ;;  %v669_v6 = vshll.u32 %v601_v4, 16 }
  0x80   : > { %1556 = vmatmul.mubr.bf16.gmra.mxu0 %v3530_v20  ;;  %v3658_v17 = vsel %vm836_vm12, %v858_v9, %v859_v10 }
  0x81   : > { %1563 = vmatprep.mubr.bf16.mxu0 %v3624_v47  ;;  %v875_v5 = vor.u32 %v874_v41, %v870_v51  ;;  %v668_v13 = vrot.slane %v666_v49, 7 }
  0x83   : > { %v3648_v38 = vsel %vm715_vm14, %v875_v5, %v879_v37  ;;  %v671_v29 = vor.u32 %v669_v6, %v668_v13  ;;  %v714_v16 = vsel %vm3279_vm15, %v668_v13, 0 }
  0x84   : > { %1661 = vmatmul.mubr.bf16.gmra.mxu1 %v3639_v63  ;;  %v896_v36 = vshll.u32 %v714_v16, 16  ;;  %v904_v61 = vrot.slane %v714_v16, 1 }
  0x85   : > { %1668 = vmatprep.mubr.bf16.mxu1 %v3629_v50  ;;  %v3662_v19 = vsel %vm3279_vm15, 0, %v671_v29 }
  0x86   : > { %v889_v21 = vshrl.u32 %v3662_v19, 16  ;;  %v891_v22 = vshll.u32 %v3662_v19, 16  ;;  %v903_v23 = vrot.slane %v3662_v19, 1  ;;  %v898_v25 = vrot.slane %v896_v36, 1 }
  0x88   : > { %1564 = vmatmul.mubr.bf16.gmra.mxu0 %v3576_v59  ;;  %v893_v24 = vrot.slane %v891_v22, 1  ;;  %v3669_v58 = vsel %vm836_vm12, %v903_v23, %v904_v61 }
  0x89   : > { %1571 = vmatprep.mubr.bf16.mxu0 %v3651_v0 }
  0x8a   : > { %v894_v26 = vor.u32 %v893_v24, %v889_v21 }
  0x8c   : > { %1669 = vmatmul.mubr.bf16.gmra.mxu1 %v3658_v17  ;;  %v3674_v33 = vsel %vm715_vm14, %v894_v26, %v898_v25 }
  0x8d   : > { %1806 = vmatprep.mubr.bf16.mxu1 %v3414_v7 }
  0x90   : > { %1572 = vmatmul.mubr.bf16.gmra.mxu0 %v3603_v15 }
  0x91   : > { %1709 = vmatprep.mubr.bf16.mxu0 %v3373_v46  ;;  %v2954_v46 = vld [vmem:[%s4043_s4 + $0x210] sm:$0xff]  }
  0x94   : > { %1807 = vmatmul.mubr.bf16.vlgmr.msra.gmra.mxu1 %v3333_v12  ;;  %v2952_v12 = vld [vmem:[%s4043_s4 + $0x220] sm:$0xff]  }
  0x95   : > { %1814 = vmatprep.mubr.bf16.mxu1 %v3476_v60  ;;  %2830 = vmatpush3.bf16.msra.mxu1 %v3568_v56 }
  0x96   : > { %2823 = vmatprep.subr.bf16.mxu1 %v2950_v28 }
  0x98   : > { %1710 = vmatmul.mubr.bf16.vlgmr.msra.gmra.mxu0 %v3355_v27  ;;  %v2953_v27 = vld [vmem:[%s4043_s4 + $0x218] sm:$0xff]  }
  0x99   : > { %2791 = vmatpush3.bf16.msra.mxu0 %v3568_v56  ;;  %1717 = vmatprep.mubr.bf16.mxu0 %v3426_v14 }
  0x9a   : > { %2792 = vmatprep.subr.bf16.mxu0 %v2950_v28  ;;  %2831 = vmatpush3.bf16.msra.mxu1 %v2950_v28 }
  0x9b   : > { %2824 = vmatprep.subr.bf16.mxu1 %v2951_v30 }
  0x9c   : > { %1815 = vmatmul.mubr.bf16.gmra.mxu1 %v3380_v53  ;;  %v2955_v53 = vld [vmem:[%s4043_s4 + $0x208] sm:$0xff]  }
  0x9d   : > { %2793 = vmatpush3.bf16.msra.mxu0 %v2950_v28  ;;  %1822 = vmatprep.mubr.bf16.mxu1 %v3552_v32 }
  0x9e   : > { %2794 = vmatprep.subr.bf16.mxu0 %v2951_v30  ;;  %2832 = vmatpush3.bf16.msra.mxu1 %v2951_v30 }
  0x9f   : > { %2825 = vmatprep.subr.bf16.mxu1 %v2952_v12 }
  0xa0   : > { %1718 = vmatmul.mubr.bf16.gmra.mxu0 %v3414_v7  ;;  %v2956_v7 = vld [vmem:[%s4043_s4 + $0x200] sm:$0xff]  }
  0xa1   : > { %1725 = vmatprep.mubr.bf16.mxu0 %v3513_v8  ;;  %2795 = vmatpush3.bf16.msra.mxu0 %v2951_v30 }
  0xa2   : > { %2796 = vmatprep.subr.bf16.mxu0 %v2952_v12  ;;  %2833 = vmatpush3.bf16.msra.mxu1 %v2952_v12 }
  0xa3   : > { %2826 = vmatprep.subr.bf16.mxu1 %v2953_v27 }
  0xa4   : > { %1823 = vmatmul.mubr.bf16.gmra.mxu1 %v3471_v54 }
  0xa5   : > { %1830 = vmatprep.mubr.bf16.mxu1 %v3598_v11  ;;  %2797 = vmatpush3.bf16.msra.mxu0 %v2952_v12 }
  0xa6   : > { %2798 = vmatprep.subr.bf16.mxu0 %v2953_v27  ;;  %2834 = vmatpush3.bf16.msra.mxu1 %v2953_v27 }
  0xa7   : > { %2827 = vmatprep.subr.bf16.mxu1 %v2954_v46 }
  0xa8   : > { %1726 = vmatmul.mubr.bf16.gmra.mxu0 %v3476_v60 }
  0xa9   : > { %1733 = vmatprep.mubr.bf16.mxu0 %v3572_v57  ;;  %2799 = vmatpush3.bf16.msra.mxu0 %v2953_v27 }
  0xaa   : > { %2800 = vmatprep.subr.bf16.mxu0 %v2954_v46  ;;  %2835 = vmatpush3.bf16.msra.mxu1 %v2954_v46 }
  0xab   : > { %2828 = vmatprep.subr.bf16.mxu1 %v2955_v53 }
  0xac   : > { %1831 = vmatmul.mubr.bf16.gmra.mxu1 %v3530_v20 }
  0xad   : > { %1838 = vmatprep.mubr.bf16.mxu1 %v3624_v47  ;;  %2801 = vmatpush3.bf16.msra.mxu0 %v2954_v46 }
  0xae   : > { %2802 = vmatprep.subr.bf16.mxu0 %v2955_v53  ;;  %2836 = vmatpush3.bf16.msra.mxu1 %v2955_v53 }
  0xaf   : > { %2829 = vmatprep.subr.bf16.mxu1 %v2956_v7 }
  0xb0   : > { %1734 = vmatmul.mubr.bf16.gmra.mxu0 %v3552_v32 }
  0xb1   : > { %1741 = vmatprep.mubr.bf16.mxu0 %v3608_v18  ;;  %2803 = vmatpush3.bf16.msra.mxu0 %v2955_v53 }
  0xb2   : > { %2804 = vmatprep.subr.bf16.mxu0 %v2956_v7  ;;  %2837 = vmatpush3.bf16.msra.mxu1 %v2956_v7 }
  0xb4   : > { %1839 = vmatmul.mubr.bf16.gmra.mxu1 %v3576_v59 }
  0xb5   : > { %1846 = vmatprep.mubr.bf16.mxu1 %v3651_v0  ;;  %2805 = vmatpush3.bf16.msra.mxu0 %v2956_v7 }
  0xb8   : > { %1742 = vmatmul.mubr.bf16.gmra.mxu0 %v3598_v11 }
  0xb9   : > { %1749 = vmatprep.mubr.bf16.mxu0 %v3639_v63 }
  0xbc   : > { %1847 = vmatmul.mubr.bf16.gmra.mxu1 %v3603_v15 }
  0xbd   : > { %1854 = vmatprep.mubr.bf16.mxu1 %v3648_v38 }
  0xc0   : > { %1750 = vmatmul.mubr.bf16.gmra.mxu0 %v3624_v47 }
  0xc1   : > { %1757 = vmatprep.mubr.bf16.mxu0 %v3658_v17 }
  0xc4   : > { %1855 = vmatmul.mubr.bf16.gmra.mxu1 %v3629_v50 }
  0xc5   : > { %1862 = vmatprep.mubr.bf16.mxu1 %v3674_v33 }
  0xc8   : > { %1758 = vmatmul.mubr.bf16.gmra.mxu0 %v3651_v0 }
  0xc9   : > { %1765 = vmatprep.mubr.bf16.mxu0 %v3642_v1 }
  0xcc   : > { %1863 = vmatmul.mubr.bf16.gmra.mxu1 %v3662_v19 }
  0xcd   : > { %2814 = vmatprep.mubr.bf16.mxu1 %v3639_v63 }
  0xd0   : > { %1766 = vmatmul.mubr.bf16.gmra.mxu0 %v3648_v38 }
  0xd1   : > { %2806 = vmatprep.mubr.bf16.mxu0 %v3426_v14 }
  0xd4   : > { %2815 = vmatmul.mubr.bf16.vlgmr.msra.gmra.mxu1 %v3658_v17 }
  0xd5   : > { %2818 = vmatprep.mubr.bf16.mxu1 %v3642_v1 }
  0xd8   : > { %2807 = vmatmul.mubr.bf16.vlgmr.msra.gmra.mxu0 %v3513_v8 }
  0xd9   : > { %2810 = vmatprep.mubr.bf16.mxu0 %v3572_v57 }
  0xdc   : > { %2819 = vmatmul.mubr.bf16.gmra.mxu1 %v3669_v58 }
  0xe0   : > { %2811 = vmatmul.mubr.bf16.gmra.mxu0 %v3608_v18 }
 0x114   : > { %v2598_v54 = vpop.f32.mrf.mxu1 }
 0x116   : > { %v2599_v60 = vpop.f32.mrf.mxu1 }
 0x117   : > { %v2600_v20 = vadd.f32 %v2599_v60, %v2598_v54 }
 0x118   : > { %v2534_v32 = vpop.f32.mrf.mxu0  ;;  %v2601_v56 = vpop.f32.mrf.mxu1 }
 0x11a   : > { %v2535_v59 = vpop.f32.mrf.mxu0  ;;  %v2602_v11 = vpop.f32.mrf.mxu1 }
 0x11b   : > { %v2536_v14 = vadd.f32 %v2535_v59, %v2534_v32  ;;  %v2603_v15 = vadd.f32 %v2602_v11, %v2601_v56 }
 0x11c   : > { %v2537_v31 = vpop.f32.mrf.mxu0  ;;  %v2604_v34 = vpop.f32.mrf.mxu1 }
 0x11d   : > { %v3738_v45 = vadd.f32 %v2600_v20, %v2536_v14 }
 0x11e   : > { %v2538_v8 = vpop.f32.mrf.mxu0  ;;  %v2605_v39 = vpop.f32.mrf.mxu1 }
 0x11f   : > { %v2539_v57 = vadd.f32 %v2538_v8, %v2537_v31  ;;  %v2606_v35 = vadd.f32 %v2605_v39, %v2604_v34 }
 0x120   : > { %v2540_v42 = vpop.f32.mrf.mxu0  ;;  %v2607_v43 = vpop.f32.mrf.mxu1 }
 0x121   : > { %v3740_v18 = vadd.f32 %v2603_v15, %v2539_v57 }
 0x122   : > { %v2541_v44 = vpop.f32.mrf.mxu0  ;;  %v2608_v47 = vpop.f32.mrf.mxu1 }
 0x123   : > { %v2542_v40 = vadd.f32 %v2541_v44, %v2540_v42  ;;  %v2609_v48 = vadd.f32 %v2608_v47, %v2607_v43 }
 0x124   : > { %v2543_v50 = vpop.f32.mrf.mxu0  ;;  %v2610_v51 = vpop.f32.mrf.mxu1 }
 0x125   : > { %v3742_v52 = vadd.f32 %v2606_v35, %v2542_v40 }
 0x126   : > { %v2544_v55 = vpop.f32.mrf.mxu0  ;;  %v2611_v62 = vpop.f32.mrf.mxu1 }
 0x127   : > { %v2545_v63 = vadd.f32 %v2544_v55, %v2543_v50  ;;  %v2612_v41 = vadd.f32 %v2611_v62, %v2610_v51 }
 0x128   : > { %v2546_v37 = vpop.f32.mrf.mxu0  ;;  %v2613_v1 = vpop.f32.mrf.mxu1 }
 0x129   : > { %v3744_v2 = vadd.f32 %v2609_v48, %v2545_v63 }
 0x12a   : > { %v2547_v3 = vpop.f32.mrf.mxu0  ;;  %v2614_v4 = vpop.f32.mrf.mxu1 }
 0x12b   : > { %v2548_v5 = vadd.f32 %v2547_v3, %v2546_v37  ;;  %v2615_v49 = vadd.f32 %v2614_v4, %v2613_v1 }
 0x12c   : > { %v2549_v6 = vpop.f32.mrf.mxu0  ;;  %v2616_v9 = vpop.f32.mrf.mxu1 }
 0x12d   : > { %v3746_v10 = vadd.f32 %v2612_v41, %v2548_v5 }
 0x12e   : > { %v2550_v38 = vpop.f32.mrf.mxu0  ;;  %v2617_v13 = vpop.f32.mrf.mxu1 }
 0x12f   : > { %v2551_v0 = vadd.f32 %v2550_v38, %v2549_v6  ;;  %v2618_v29 = vadd.f32 %v2617_v13, %v2616_v9 }
 0x130   : > { %v2552_v16 = vpop.f32.mrf.mxu0  ;;  %v2619_v36 = vpop.f32.mrf.mxu1 }
 0x131   : > { %v3748_v61 = vadd.f32 %v2615_v49, %v2551_v0 }
 0x132   : > { %v2553_v17 = vpop.f32.mrf.mxu0  ;;  %v2620_v19 = vpop.f32.mrf.mxu1 }
 0x133   : > { %v2554_v21 = vadd.f32 %v2553_v17, %v2552_v16  ;;  %v2621_v22 = vadd.f32 %v2620_v19, %v2619_v36 }
 0x134   : > { %v2555_v23 = vpop.f32.mrf.mxu0  ;;  %v2622_v24 = vpop.f32.mrf.mxu1 }
 0x135   : > { %v3750_v25 = vadd.f32 %v2618_v29, %v2554_v21 }
 0x136   : > { %v2556_v58 = vpop.f32.mrf.mxu0  ;;  %v2623_v26 = vpop.f32.mrf.mxu1 }
 0x137   : > { %v2557_v33 = vadd.f32 %v2556_v58, %v2555_v23  ;;  %v2624_v28 = vadd.f32 %v2623_v26, %v2622_v24 }
 0x138   : > { %v2558_v30 = vpop.f32.mrf.mxu0  ;;  %v2625_v12 = vpop.f32.mrf.mxu1 }
 0x139   : > { %v3752_v27 = vadd.f32 %v2621_v22, %v2557_v33 }
 0x13a   : > { %v2559_v46 = vpop.f32.mrf.mxu0  ;;  %v2626_v53 = vpop.f32.mrf.mxu1 }
 0x13b   : > { %v2560_v7 = vadd.f32 %v2559_v46, %v2558_v30  ;;  %v2627_v54 = vadd.f32 %v2626_v53, %v2625_v12 }
 0x13c   : > { %v2561_v60 = vpop.f32.mrf.mxu0  ;;  %v2628_v20 = vpop.f32.mrf.mxu1 }
 0x13d   : > { %v3754_v32 = vadd.f32 %v2624_v28, %v2560_v7 }
 0x13e   : > { %v2562_v56 = vpop.f32.mrf.mxu0  ;;  %v2629_v59 = vpop.f32.mrf.mxu1 }
 0x13f   : > { %v2563_v11 = vadd.f32 %v2562_v56, %v2561_v60  ;;  %v2630_v14 = vadd.f32 %v2629_v59, %v2628_v20 }
 0x140   : > { %v2564_v15 = vpop.f32.mrf.mxu0  ;;  %v2631_v31 = vpop.f32.mrf.mxu1 }
 0x141   : > { %v3756_v34 = vadd.f32 %v2627_v54, %v2563_v11 }
 0x142   : > { %v2565_v8 = vpop.f32.mrf.mxu0  ;;  %v2632_v39 = vpop.f32.mrf.mxu1 }
 0x143   : > { %v2566_v57 = vadd.f32 %v2565_v8, %v2564_v15  ;;  %v2633_v35 = vadd.f32 %v2632_v39, %v2631_v31 }
 0x144   : > { %v2567_v42 = vpop.f32.mrf.mxu0  ;;  %v2634_v43 = vpop.f32.mrf.mxu1 }
 0x145   : > { %v3758_v44 = vadd.f32 %v2630_v14, %v2566_v57 }
 0x146   : > { %v2568_v47 = vpop.f32.mrf.mxu0  ;;  %v2635_v40 = vpop.f32.mrf.mxu1 }
 0x147   : > { %4063 = vst [vmem:[#allocation9_spill] sm:$0xff] %v3758_v44  ;;  %v2569_v48 = vadd.f32 %v2568_v47, %v2567_v42  ;;  %v2636_v50 = vadd.f32 %v2635_v40, %v2634_v43 }
 0x148   : > { %v2570_v51 = vpop.f32.mrf.mxu0  ;;  %v2637_v55 = vpop.f32.mrf.mxu1 }
 0x149   : > { %v3760_v62 = vadd.f32 %v2633_v35, %v2569_v48 }
 0x14a   : > { %v2571_v63 = vpop.f32.mrf.mxu0  ;;  %v2638_v41 = vpop.f32.mrf.mxu1 }
 0x14b   : > { %4064 = vst [vmem:[#allocation10_spill] sm:$0xff] %v3760_v62  ;;  %v2572_v37 = vadd.f32 %v2571_v63, %v2570_v51  ;;  %v2639_v1 = vadd.f32 %v2638_v41, %v2637_v55 }
 0x14c   : > { %v2573_v3 = vpop.f32.mrf.mxu0  ;;  %v2640_v4 = vpop.f32.mrf.mxu1 }
 0x14d   : > { %v3762_v5 = vadd.f32 %v2636_v50, %v2572_v37 }
 0x14e   : > { %v2574_v49 = vpop.f32.mrf.mxu0  ;;  %v2641_v6 = vpop.f32.mrf.mxu1 }
 0x14f   : > { %4065 = vst [vmem:[#allocation11_spill] sm:$0xff] %v3762_v5  ;;  %v2575_v9 = vadd.f32 %v2574_v49, %v2573_v3  ;;  %v2642_v38 = vadd.f32 %v2641_v6, %v2640_v4 }
 0x150   : > { %v2576_v13 = vpop.f32.mrf.mxu0  ;;  %v2643_v0 = vpop.f32.mrf.mxu1 }
 0x151   : > { %v3764_v29 = vadd.f32 %v2639_v1, %v2575_v9 }
 0x152   : > { %v2577_v16 = vpop.f32.mrf.mxu0  ;;  %v2644_v36 = vpop.f32.mrf.mxu1 }
 0x153   : > { %4066 = vst [vmem:[#allocation12_spill] sm:$0xff] %v3764_v29  ;;  %v2578_v17 = vadd.f32 %v2577_v16, %v2576_v13  ;;  %v2645_v19 = vadd.f32 %v2644_v36, %v2643_v0 }
 0x154   : > { %v2579_v21 = vpop.f32.mrf.mxu0  ;;  %v3766_v22 = vpop.f32.mrf.mxu1 }
 0x155   : > { %v3768_v23 = vadd.f32 %v2642_v38, %v2578_v17 }
 0x156   : > { %v2580_v24 = vpop.f32.mrf.mxu0  ;;  %v3770_v58 = vpop.f32.mrf.mxu1 }
 0x157   : > { %4067 = vst [vmem:[#allocation13_spill] sm:$0xff] %v3768_v23  ;;  %v2581_v26 = vadd.f32 %v2580_v24, %v2579_v21 }
 0x158   : > { %v2662_v33 = vpop.f32.mrf.mxu0  ;;  %v3772_v28 = vpop.f32.mrf.mxu1 }
 0x159   : > { %v3774_v30 = vadd.f32 %v2645_v19, %v2581_v26 }
 0x15a   : > { %v2663_v12 = vpop.f32.mrf.mxu0  ;;  %v3776_v46 = vpop.f32.mrf.mxu1 }
 0x15b   : > { %4068 = vst [vmem:[#allocation14_spill] sm:$0xff] %v3774_v30  ;;  %v2664_v53 = vadd.f32 %v2663_v12, %v2662_v33 }
 0x15c   : > { %v2665_v7 = vpop.f32.mrf.mxu0  ;;  %v3778_v54 = vpop.f32.mrf.mxu1 }
 0x15d   : > { %v3781_v60 = vadd.f32 %v2664_v53, %v3738_v45 }
 0x15e   : > { %v2666_v20 = vpop.f32.mrf.mxu0  ;;  %v3783_v56 = vpop.f32.mrf.mxu1 }
 0x160   : > { %v2668_v59 = vpop.f32.mrf.mxu0  ;;  %v3785_v11 = vpop.f32.mrf.mxu1 }
 0x162   : > { %v2669_v14 = vpop.f32.mrf.mxu0  ;;  %v3787_v15 = vpop.f32.mrf.mxu1 }
 0x164   : > { %v2671_v31 = vpop.f32.mrf.mxu0  ;;  %v3789_v8 = vpop.f32.mrf.mxu1 }
 0x166   : > { %v2672_v39 = vpop.f32.mrf.mxu0  ;;  %v3791_v57 = vpop.f32.mrf.mxu1 }
 0x168   : > { %v2674_v35 = vpop.f32.mrf.mxu0  ;;  %v3793_v42 = vpop.f32.mrf.mxu1 }
 0x16a   : > { %v2675_v45 = vpop.f32.mrf.mxu0  ;;  %v3795_v43 = vpop.f32.mrf.mxu1 }
 0x16c   : > { %v2677_v47 = vpop.f32.mrf.mxu0  ;;  %v3797_v40 = vpop.f32.mrf.mxu1 }
 0x16e   : > { %v2678_v48 = vpop.f32.mrf.mxu0  ;;  %v3799_v50 = vpop.f32.mrf.mxu1 }
 0x170   : > { %v2680_v51 = vpop.f32.mrf.mxu0  ;;  %v3801_v55 = vpop.f32.mrf.mxu1 }
 0x172   : > { %v2681_v63 = vpop.f32.mrf.mxu0  ;;  %v3803_v41 = vpop.f32.mrf.mxu1 }
 0x174   : > { %v2683_v37 = vpop.f32.mrf.mxu0  ;;  %v3805_v1 = vpop.f32.mrf.mxu1 }
 0x176   : > { %v2684_v3 = vpop.f32.mrf.mxu0  ;;  %v3807_v4 = vpop.f32.mrf.mxu1 }
 0x178   : > { %v3809_v49 = vpop.f32.mrf.mxu0  ;;  %v3811_v6 = vpop.f32.mrf.mxu1 }
 0x17a   : > { %v2687_v9 = vpop.f32.mrf.mxu0  ;;  %v3813_v38 = vpop.f32.mrf.mxu1 }
 0x17c   : > { %v3815_v13 = vpop.f32.mrf.mxu0  ;;  %v3817_v0 = vpop.f32.mrf.mxu1 }
 0x17d   : > { %4069 = vst [vmem:[#allocation15_spill] sm:$0xff] %v3817_v0 }
 0x17e   : > { %v3819_v16 = vpop.f32.mrf.mxu0  ;;  %v3821_v36 = vpop.f32.mrf.mxu1 }
 0x17f   : > { %4070 = vst [vmem:[#allocation16_spill] sm:$0xff] %v3821_v36 }
 0x180   : > { %v3823_v17 = vpop.f32.mrf.mxu0  ;;  %v3825_v19 = vpop.f32.mrf.mxu1 }
 0x181   : > { %4071 = vst [vmem:[#allocation17_spill] sm:$0xff] %v3825_v19 }
 0x182   : > { %v3827_v21 = vpop.f32.mrf.mxu0  ;;  %v3829_v24 = vpop.f32.mrf.mxu1 }
 0x183   : > { %4072 = vst [vmem:[#allocation18_spill] sm:$0xff] %v3829_v24 }
 0x184   : > { %v3831_v26 = vpop.f32.mrf.mxu0  ;;  %v3833_v33 = vpop.f32.mrf.mxu1 }
 0x185   : > { %4073 = vst [vmem:[#allocation19_spill] sm:$0xff] %v3833_v33 }
 0x186   : > { %v3835_v12 = vpop.f32.mrf.mxu0  ;;  %v3837_v53 = vpop.f32.mrf.mxu1 }
 0x187   : > { %4074 = vst [vmem:[#allocation20_spill] sm:$0xff] %v3837_v53 }
 0x188   : > { %v3839_v30 = vpop.f32.mrf.mxu0  ;;  %v3841_v23 = vpop.f32.mrf.mxu1 }
 0x189   : > { %4075 = vst [vmem:[#allocation21_spill] sm:$0xff] %v3839_v30  ;;  %4076 = vst [vmem:[#allocation22_spill] sm:$0xff] %v3841_v23 }
 0x18a   : > { %v3843_v29 = vpop.f32.mrf.mxu0  ;;  %v3845_v5 = vpop.f32.mrf.mxu1 }
 0x18b   : > { %4077 = vst [vmem:[#allocation23_spill] sm:$0xff] %v3843_v29  ;;  %4078 = vst [vmem:[#allocation24_spill] sm:$0xff] %v3845_v5  ;;  %v2667_v29 = vadd.f32 %v2666_v20, %v2665_v7  ;;  %v2670_v5 = vadd.f32 %v2669_v14, %v2668_v59  ;;  %v2734_v7 = vadd.f32 %v3783_v56, %v3778_v54 }
 0x18c   : > { %v3847_v19 = vpop.f32.mrf.mxu0  ;;  %v3849_v62 = vpop.f32.mrf.mxu1  ;;  %v2679_v20 = vadd.f32 %v2678_v48, %v2677_v47  ;;  %v2749_v47 = vadd.f32 %v3803_v41, %v3801_v55  ;;  %v2694_v55 = vadd.f32 %v3827_v21, %v3823_v17 }
 0x18d   : > { %4079 = vst [vmem:[#allocation25_spill] sm:$0xff] %v3847_v19  ;;  %4080 = vst [vmem:[#allocation26_spill] sm:$0xff] %v3849_v62  ;;  %v2728_v62 = vadd.f32 %v3770_v58, %v3766_v22  ;;  %v2737_v22 = vadd.f32 %v3787_v15, %v3785_v11 }
 0x18e   : > { %v3851_v24 = vpop.f32.mrf.mxu0  ;;  %v3853_v36 = vpop.f32.mrf.mxu1  ;;  %v1731_v56 = vadd.f32 %v2679_v20, %v3748_v61 }
 0x18f   : > { %4081 = vst [vmem:[#allocation27_spill] sm:$0xff] %v3851_v24  ;;  %4082 = vst [vmem:[#allocation28_spill] sm:$0xff] %v3853_v36  ;;  %v2673_v36 = vadd.f32 %v2672_v39, %v2671_v31  ;;  %v2676_v24 = vadd.f32 %v2675_v45, %v2674_v35  ;;  %v1809_v58 = vadd.f32 %v2728_v62, %v3781_v60 }
 0x190   : > { %v3855_v33 = vpop.f32.mrf.mxu0  ;;  %v3857_v0 = vpop.f32.mrf.mxu1  ;;  %v2685_v31 = vadd.f32 %v2684_v3, %v2683_v37  ;;  %v2688_v39 = vadd.f32 %v2687_v9, %v3809_v49 }
 0x191   : > { %4083 = vst [vmem:[#allocation29_spill] sm:$0xff] %v3855_v33  ;;  %4084 = vst [vmem:[#allocation30_spill] sm:$0xff] %v3857_v0  ;;  %v1715_v0 = vadd.f32 %v2667_v29, %v3740_v18  ;;  %v1728_v18 = vadd.f32 %v2676_v24, %v3746_v10  ;;  %v2740_v29 = vadd.f32 %v3791_v57, %v3789_v8 }
 0x192   : > { %v3859_v53 = vpop.f32.mrf.mxu0  ;;  %v3861_v30 = vpop.f32.mrf.mxu1  ;;  %v1744_v9 = vadd.f32 %v2688_v39, %v3754_v32  ;;  %v2697_v32 = vadd.f32 %v3835_v12, %v3831_v26  ;;  %v4092_v26 = vld [vmem:[#allocation23_spill] sm:$0xff] }
 0x193   : > { %4085 = vst [vmem:[#allocation31_spill] sm:$0xff] %v3859_v53  ;;  %4086 = vst [vmem:[#allocation32_spill] sm:$0xff] %v3861_v30  ;;  %v2731_v53 = vadd.f32 %v3776_v46, %v3772_v28  ;;  %v1720_v30 = vadd.f32 %v2670_v5, %v3742_v52  ;;  %v2682_v52 = vadd.f32 %v2681_v63, %v2680_v51 }
 0x194   : > { %v3863_v23 = vpop.f32.mrf.mxu0  ;;  %v3867_v19 = vpop.f32.mrf.mxu1  ;;  %v1825_v57 = vadd.f32 %v2740_v29, %v1728_v18 }
 0x195   : > { %4087 = vst [vmem:[#allocation33_spill] sm:$0xff] %v3867_v19  ;;  %v1723_v19 = vadd.f32 %v2673_v36, %v3744_v2  ;;  %v1817_v28 = vadd.f32 %v2734_v7, %v1720_v30  ;;  %v1812_v54 = vadd.f32 %v2731_v53, %v1715_v0  ;;  %v2743_v2 = vadd.f32 %v3795_v43, %v3793_v42  ;;  %v4088_v7 = vld [vmem:[#allocation9_spill] sm:$0xff] }
 0x196   : > { %v3865_v44 = vpop.f32.mrf.mxu0  ;;  %v3877_v14 = vpop.f32.mrf.mxu1  ;;  %v1736_v8 = vadd.f32 %v2682_v52, %v3750_v25  ;;  %v2746_v30 = vadd.f32 %v3799_v50, %v3797_v40  ;;  %v1739_v25 = vadd.f32 %v2685_v31, %v3752_v27  ;;  %v2691_v40 = vadd.f32 %v3819_v16, %v3815_v13  ;;  %v4095_v31 = vld [vmem:[#allocation18_spill] sm:$0xff] }
 0x197   : > { %v1820_v10 = vadd.f32 %v2737_v22, %v1723_v19  ;;  %v1828_v51 = vadd.f32 %v2743_v2, %v1731_v56  ;;  %v2752_v27 = vadd.f32 %v3807_v4, %v3805_v1  ;;  %v2755_v0 = vadd.f32 %v3813_v38, %v3811_v6  ;;  %v4094_v2 = vld [vmem:[#allocation17_spill] sm:$0xff] }
 0x198   : > { %v2808_v33 = vpop.f32.mrf.mxu0  ;;  %v3891_v11 = vpop.f32.mrf.mxu1  ;;  %v1833_v41 = vadd.f32 %v2746_v30, %v1736_v8  ;;  %v1747_v24 = vadd.f32 %v2691_v40, %v3756_v34  ;;  %v1836_v17 = vadd.f32 %v2749_v47, %v1739_v25  ;;  %v1752_v20 = vadd.f32 %v2694_v55, %v4088_v7  ;;  %v4090_v34 = vld [vmem:[#allocation16_spill] sm:$0xff]  ;;  %v4097_v8 = vld [vmem:[#allocation27_spill] sm:$0xff]  ;;  %v4107_v7 = vld [vmem:[#allocation13_spill] sm:$0xff] }
 0x199   : > { %v3893_v60 = vadd.f32 %v2808_v33, %v1817_v28  ;;  %v1841_v18 = vadd.f32 %v2752_v27, %v1744_v9  ;;  %v4098_v25 = vld [vmem:[#allocation11_spill] sm:$0xff] }
 0x19a   : > { %v1905_v59 = vpop.f32.mrf.mxu0  ;;  %v1940_v48 = vpop.f32.mrf.mxu1  ;;  %v1844_v39 = vadd.f32 %v2755_v0, %v1747_v24  ;;  %v4099_v40 = vld [vmem:[#allocation19_spill] sm:$0xff]  ;;  %v2709_v24 = vadd.f32 %v3865_v44, %v3863_v23 }
 0x19b   : > { %v3886_v46 = vadd.f32 %v1905_v59, %v1809_v58  ;;  %v1991_v63 = vmul.f32 %v3893_v60, %v3893_v60  ;;  %v4089_v59 = vld [vmem:[#allocation15_spill] sm:$0xff]  ;;  %v4091_v58 = vld [vmem:[#allocation21_spill] sm:$0xff] }
 0x19c   : > { %v2809_v5 = vpop.f32.mrf.mxu0  ;;  %v2820_v4 = vpop.f32.mrf.mxu1  ;;  %v2758_v22 = vadd.f32 %v4090_v34, %v4089_v59  ;;  %v2700_v12 = vadd.f32 %v4092_v26, %v4091_v58  ;;  %v3965_v27 = vadd.f32 %v1940_v48, %v1844_v39  ;;  %v4108_v59 = vld [vmem:[#allocation26_spill] sm:$0xff]  ;;  %v4109_v34 = vld [vmem:[#allocation28_spill] sm:$0xff] }
 0x19d   : > { %v1989_v35 = vmul.f32 %v3886_v46, %v3886_v46  ;;  %v3903_v42 = vadd.f32 %v2809_v5, %v1820_v10  ;;  %v4096_v10 = vld [vmem:[#allocation25_spill] sm:$0xff] }
 0x19e   : > { %v1908_v62 = vpop.f32.mrf.mxu0  ;;  %v2703_v30 = vadd.f32 %v4097_v8, %v4096_v10  ;;  %v1760_v47 = vadd.f32 %v2700_v12, %v4098_v25  ;;  %v1849_v9 = vadd.f32 %v2758_v22, %v1752_v20  ;;  %v2770_v22 = vadd.f32 %v4109_v34, %v4108_v59 }
 0x19f   : > { %v3895_v15 = vadd.f32 %v1908_v62, %v1812_v54  ;;  %v1992_v16 = vmul.f32 %v3903_v42, %v3903_v42  ;;  %v4093_v54 = vld [vmem:[#allocation10_spill] sm:$0xff]  ;;  %v2761_v62 = vadd.f32 %v4095_v31, %v4094_v2  ;;  %v1998_v44 = vmul.f32 %v3965_v27, %v3965_v27 }
 0x1a0   : > { %v2812_v61 = vpop.f32.mrf.mxu0  ;;  %v1755_v56 = vadd.f32 %v2697_v32, %v4093_v54 }
 0x1a1   : > { %v1968_v45 = vadd.f32 %v3895_v15, %v3886_v46  ;;  %v1990_v43 = vmul.f32 %v3895_v15, %v3895_v15  ;;  %v3932_v1 = vadd.f32 %v2812_v61, %v1833_v41  ;;  %v1953_v61 = vpop.f32.mrf.mxu1 }
 0x1a2   : > { %v1921_v50 = vpop.f32.mrf.mxu0  ;;  %v1852_v32 = vadd.f32 %v2761_v62, %v1755_v56 }
 0x1a3   : > { %v1969_v37 = vadd.f32 %v1968_v45, %v3893_v60  ;;  %v2005_v3 = vadd.f32 %v1990_v43, %v1989_v35  ;;  %v3917_v49 = vadd.f32 %v1921_v50, %v1825_v57  ;;  %v3955_v57 = vadd.f32 %v3877_v14, %v1841_v18  ;;  %v4100_v50 = vld [vmem:[#allocation20_spill] sm:$0xff]  ;;  %v4110_v18 = vld [vmem:[#allocation14_spill] sm:$0xff] }
 0x1a4   : > { %v2813_v13 = vpop.f32.mrf.mxu0  ;;  %v1995_v35 = vmul.f32 %v3932_v1, %v3932_v1  ;;  %v3985_v26 = vadd.f32 %v3891_v11, %v1852_v32 }
 0x1a5   : > { %v2006_v36 = vadd.f32 %v2005_v3, %v1991_v63  ;;  %v1970_v19 = vadd.f32 %v1969_v37, %v3903_v42  ;;  %v1993_v6 = vmul.f32 %v3917_v49, %v3917_v49  ;;  %v3944_v52 = vadd.f32 %v2813_v13, %v1836_v17  ;;  %v4101_v63 = vld [vmem:[#allocation29_spill] sm:$0xff]  ;;  %v4102_v37 = vld [vmem:[#allocation31_spill] sm:$0xff]  ;;  %v4103_v13 = vld [vmem:[#allocation12_spill] sm:$0xff]  ;;  %v2821_v17 = vpop.f32.mrf.mxu1 }
 0x1a6   : > { %v1924_v21 = vpop.f32.mrf.mxu0  ;;  %v2706_v3 = vadd.f32 %v4102_v37, %v4101_v63  ;;  %v1763_v0 = vadd.f32 %v2703_v30, %v4103_v13  ;;  %v1997_v48 = vmul.f32 %v3955_v57, %v3955_v57  ;;  %v2000_v30 = vmul.f32 %v3985_v26, %v3985_v26 }
 0x1a7   : > { %v1971_v33 = vadd.f32 %v1970_v19, %v3917_v49  ;;  %v2007_v38 = vadd.f32 %v2006_v36, %v1992_v16  ;;  %v3937_v53 = vadd.f32 %v1924_v21, %v1828_v51  ;;  %v2764_v51 = vadd.f32 %v4100_v50, %v4099_v40  ;;  %v4104_v16 = vld [vmem:[#allocation22_spill] sm:$0xff]  ;;  %v4105_v36 = vld [vmem:[#allocation24_spill] sm:$0xff]  ;;  %v4106_v21 = vld [vmem:[#allocation33_spill] sm:$0xff]  ;;  %v1956_v2 = vpop.f32.mrf.mxu1 }
 0x1a8   : > { %v1996_v14 = vmul.f32 %v3944_v52, %v3944_v52  ;;  %v2767_v19 = vadd.f32 %v4105_v36, %v4104_v16  ;;  %v1768_v20 = vadd.f32 %v2706_v3, %v4107_v7 }
 0x1a9   : > { %v2008_v29 = vadd.f32 %v2007_v38, %v1993_v6  ;;  %v1972_v5 = vadd.f32 %v1971_v33, %v3937_v53  ;;  %v1994_v28 = vmul.f32 %v3937_v53, %v3937_v53  ;;  %v3976_v33 = vadd.f32 %v4106_v21, %v1849_v9 }
 0x1aa   : > { %v1857_v58 = vadd.f32 %v2764_v51, %v1760_v47  ;;  %v1860_v56 = vadd.f32 %v2767_v19, %v1763_v0  ;;  %v1865_v8 = vadd.f32 %v2770_v22, %v1768_v20 }
 0x1ab   : > { %v1973_v45 = vadd.f32 %v1972_v5, %v3932_v1  ;;  %v2009_v43 = vadd.f32 %v2008_v29, %v1994_v28  ;;  %v1771_v29 = vadd.f32 %v2709_v24, %v4110_v18  ;;  %v4111_v5 = vld [vmem:[#allocation30_spill] sm:$0xff]  ;;  %v4112_v28 = vld [vmem:[#allocation32_spill] sm:$0xff]  ;;  %v1999_v31 = vmul.f32 %v3976_v33, %v3976_v33 }
 0x1ac   : > { %v2773_v54 = vadd.f32 %v4112_v28, %v4111_v5  ;;  %v1954_v62 = vadd.f32 %v1953_v61, %v1857_v58  ;;  %v1957_v39 = vadd.f32 %v1956_v2, %v1860_v56  ;;  %v1962_v25 = vadd.f32 %v2820_v4, %v1865_v8 }
 0x1ad   : > { %v1974_v55 = vadd.f32 %v1973_v45, %v3944_v52  ;;  %v2010_v41 = vadd.f32 %v2009_v43, %v1995_v35 }
 0x1ae   : > { %v1868_v43 = vadd.f32 %v2773_v54, %v1771_v29  ;;  %v2001_v47 = vmul.f32 %v1954_v62, %v1954_v62  ;;  %v2002_v37 = vmul.f32 %v1957_v39, %v1957_v39  ;;  %v2003_v3 = vmul.f32 %v1962_v25, %v1962_v25 }
 0x1af   : > { %v1975_v6 = vadd.f32 %v1974_v55, %v3955_v57  ;;  %v2011_v38 = vadd.f32 %v2010_v41, %v1996_v14 }
 0x1b0   : > { %v1965_v51 = vadd.f32 %v2821_v17, %v1868_v43 }
 0x1b1   : > { %v2012_v23 = vadd.f32 %v2011_v38, %v1997_v48  ;;  %v1976_v12 = vadd.f32 %v1975_v6, %v3965_v27 }
 0x1b2   : > { %v2004_v55 = vmul.f32 %v1965_v51, %v1965_v51 }
 0x1b3   : > { %v1977_v11 = vadd.f32 %v1976_v12, %v3976_v33  ;;  %v2013_v10 = vadd.f32 %v2012_v23, %v1998_v44 }
 0x1b5   : > { %v1978_v35 = vadd.f32 %v1977_v11, %v3985_v26  ;;  %v2014_v45 = vadd.f32 %v2013_v10, %v1999_v31 }
 0x1b7   : > { %v1979_v40 = vadd.f32 %v1978_v35, %v1954_v62  ;;  %v2015_v50 = vadd.f32 %v2014_v45, %v2000_v30 }
 0x1b9   : > { %v1980_v63 = vadd.f32 %v1979_v40, %v1957_v39  ;;  %v2016_v61 = vadd.f32 %v2015_v50, %v2001_v47 }
 0x1bb   : > { %v1981_v9 = vadd.f32 %v1980_v63, %v1962_v25  ;;  %v2017_v14 = vadd.f32 %v2016_v61, %v2002_v37 }
 0x1bd   : > { %v1982_v41 = vadd.f32 %v1981_v9, %v1965_v51  ;;  %v2018_v13 = vadd.f32 %v2017_v14, %v2003_v3 }
 0x1bf   : > { %v1983_v0 = vrot.slane %v1982_v41, 4  ;;  %v2019_v16 = vadd.f32 %v2018_v13, %v2004_v55 }
 0x1c1   : > { %v1984_v36 = vadd.f32 %v1983_v0, %v1982_v41  ;;  %v2020_v19 = vrot.slane %v2019_v16, 4 }
 0x1c3   : > { %v1985_v24 = vrot.slane %v1984_v36, 2  ;;  %v2021_v32 = vadd.f32 %v2020_v19, %v2019_v16 }
 0x1c5   : > { %v1986_v4 = vadd.f32 %v1985_v24, %v1984_v36  ;;  %v2022_v21 = vrot.slane %v2021_v32, 2 }
 0x1c7   : > { %v1987_v48 = vrot.slane %v1986_v4, 1  ;;  %v2023_v6 = vadd.f32 %v2022_v21, %v2021_v32  ;;  %2029 = sbr.rel (%p2386_p11) target bundleno = 462 (0x1ce), region = 124 }
 0x1c9   : > { %v1988_v17 = vadd.f32 %v1987_v48, %v1986_v4  ;;  %v2024_v38 = vrot.slane %v2023_v6, 1 }
 0x1cb   : > { %v2025_v7 = vadd.f32 %v2024_v38, %v2023_v6 }
 0x1cc   : > { %v3005_v20 = vmov 0.0  }
 0x1cd   : > { %2030 = vst [vmem:[%s3081_s12] sm:$0x3] %v3005_v20 }
 0x1ce PF: > { %v2033_v34 = vsel %vm692_vm4, %v1988_v17, %v2025_v7  ;;  %v2467_v22 = vpack.c.bf16 %v3895_v15, %v3886_v46  ;;  %v2472_v58 = vpack.c.bf16 %v3903_v42, %v3893_v60  ;;  %v2477_v44 = vpack.c.bf16 %v3937_v53, %v3917_v49 }
 0x1cf   : > { %v2482_v12 = vpack.c.bf16 %v3944_v52, %v3932_v1  ;;  %v2487_v18 = vpack.c.bf16 %v3965_v27, %v3955_v57  ;;  %v2492_v29 = vpack.c.bf16 %v3985_v26, %v3976_v33  ;;  %v2497_v46 = vpack.c.bf16 %v1957_v39, %v1954_v62 }
 0x1d0   : > { %2468 = vst [vmem:[%s3092_s27] sm:$0xff] %v2467_v22   ;;  %2511 = vst [vmem:[%s3092_s27 + $0x8] sm:$0xff] %v2472_v58   ;;  %v2502_v15 = vpack.c.bf16 %v1965_v51, %v1962_v25 }
 0x1d1   : > { %2512 = vst [vmem:[%s3092_s27 + $0x10] sm:$0xff] %v2477_v44   ;;  %2513 = vst [vmem:[%s3092_s27 + $0x18] sm:$0xff] %v2482_v12  }
 0x1d2   : > { %2514 = vst [vmem:[%s3092_s27 + $0x20] sm:$0xff] %v2487_v18   ;;  %2515 = vst [vmem:[%s3092_s27 + $0x28] sm:$0xff] %v2492_v29  }
 0x1d3   : > { %2516 = vst [vmem:[%s3092_s27 + $0x30] sm:$0xff] %v2497_v46   ;;  %2517 = vst [vmem:[%s3092_s27 + $0x38] sm:$0xff] %v2502_v15  }
 0x1d4   : > { %v2031_v59 = vld [vmem:[%s3081_s12] sm:$0x3] }
 0x1d5   : > { %v2034_v23 = vadd.f32 %v2033_v34, %v2031_v59 }
 0x1d7   : > { %2035 = vst [vmem:[%s3081_s12] sm:$0x3] %v2034_v23 }
 0x1d8 PF: > { %s17_s25 = sadd.s32 1, %s3003_s25   ;;  %s4113_s20 = sld [smem:[#allocation8_spill]] }
 0x1d9   : > { %p14_p12 = scmp.ge.s32.totalorder %s17_s25, 6   ;;  %s4114_s21 = smov %s2995_s23 }
 0x1da   : > { %s4115_s22 = smov %s2999_s24  ;;  %s4116_s23 = smov %s4119_s26 }
 0x1db   :  { %16 = sbr.rel (!%p14_p12) target bundleno = 3 (0x3), region = 189 }
 0x1de   : > { %s4117_s24 = smov %s4113_s20 }
 0x1e0   :  { %2162 = vsyncmov [#allocation3] }
 0x1e3   :  { %s2163_s27 = vpop.sfrf %2162 }
 0x1e4   :  { %p2405_p13 = scmp.ne.s32.totalorder %s2163_s27, 0 }
 0x1e6   :  { %2167 = shalt.err (%p2405_p13)  }
 0x1e7   :  { %2169 = vsyncmov [#allocation3 + $0x1] }
 0x1ea   :  { %s2170_s12 = vpop.sfrf %2169 }
 0x1eb   :  { %p2406_p0 = scmp.ne.s32.totalorder %s2170_s12, 0 }
 0x1ed   :  { %2174 = shalt.err (%p2406_p0)  }

</bundles_post_ra>
